<compile_context>
chip_gen: v7x
topology: tpu7x:2x2x1
jax: 0.10.0
libtpu: 0.0.40
codegen_flags: <defaults>
</compile_context>

<pallas_src>
from functools import partial

import jax
import jax.numpy as jnp
from jax import lax
from jax.experimental import pallas as pl
from jax.experimental.pallas import tpu as pltpu


# ----------------------------------------------------------------------------
# Fused Conv3d + InstanceNorm3d + (ReLU) + (residual) Pallas kernel
# ----------------------------------------------------------------------------
def _fused_conv_in_act_kernel(x_ref, w_ref, *rest, ksize, stride, dq, howo, m,
                              inv_cnt, eps, relu, has_res):
    # x_ref: [R, K]      bf16  (R = stride*dq*howo rows, K = k^2*Cin lanes)
    # w_ref: [k, K, Ct]  bf16  (per-kd folded weights)
    # r_ref: [M, Ct]     bf16  (optional residual)
    # o_ref: [M, Ct]     bf16
    if has_res:
        r_ref, o_ref = rest
    else:
        (o_ref,) = rest

    # Unrolled reduction over the remaining depth taps; bases are static Python
    # ints (multiples of howo -> sublane-aligned), so each tap is a plain slice.
    acc = None
    for kd in range(ksize):
        base = (kd % stride) * (dq * howo) + (kd // stride) * howo
        x_tap = x_ref[pl.ds(base, m), :]                       # [M, K] bf16
        p = jnp.dot(x_tap, w_ref[kd],                          # [K, Ct] bf16
                    preferred_element_type=jnp.float32)        # -> [M, Ct] f32 (MXU)
        acc = p if acc is None else acc + p

    # InstanceNorm3d (affine=False): per-channel stats over all M spatial positions,
    # biased variance, f32 math.
    mean = jnp.sum(acc, axis=0, keepdims=True) * inv_cnt
    xc = acc - mean
    var = jnp.sum(xc * xc, axis=0, keepdims=True) * inv_cnt
    y = xc * lax.rsqrt(var + eps)
    if relu:
        y = jnp.maximum(y, 0.0)
    if has_res:
        y = y + r_ref[...].astype(jnp.float32)
    o_ref[...] = y.astype(o_ref.dtype)


def conv3d_block(x, w, *, stride, pad, relu, residual=None):
    """Fused zero-pad -> Conv3d(no bias) -> InstanceNorm3d -> [ReLU] [-> +residual].

    x:        [N, D, H, W, Cin]     bf16/f32 (channel-last)
    w:        [k, k, k, Cin, Cout]  f32
    residual: [N, Do, Ho, Wo, Cout] bf16 or None
    returns   [N, Do, Ho, Wo, Cout] bf16
    """
    N, D, H, W_sp, Cin = x.shape
    ksz = w.shape[0]
    Cout = w.shape[-1]
    s = stride

    Dp, Hp, Wp = D + 2 * pad, H + 2 * pad, W_sp + 2 * pad
    Do, Ho, Wo = (Dp - ksz) // s + 1, (Hp - ksz) // s + 1, (Wp - ksz) // s + 1
    HoWo = Ho * Wo
    M = Do * HoWo                      # valid output positions (no garbage columns)
    K = ksz * ksz * Cin                # folded contraction dim
    Dq = -(-Dp // s)                   # per-phase depth extent
    R = s * Dq * HoWo                  # slab rows

    # ---- host-side data prep (bf16, ~(k/s)^2 x activation bytes; no k^3 blow-up) --
    xb = x.astype(jnp.bfloat16)
    xpad = jnp.pad(xb, ((0, 0), (pad, pad), (pad, pad), (pad, pad), (0, 0)))
    # Partial im2col: fold (kh, kw) taps into the channel/contraction axis.
    patches = [xpad[:, :, kh:kh + s * (Ho - 1) + 1:s, kw:kw + s * (Wo - 1) + 1:s, :]
               for kh in range(ksz) for kw in range(ksz)]
    xf = jnp.concatenate(patches, axis=-1)                  # [N, Dp, Ho, Wo, K]
    xf = jnp.pad(xf, ((0, 0), (0, s * Dq - Dp), (0, 0), (0, 0), (0, 0)))
    # Phase-decompose D' so each kd tap window is one contiguous sublane slice.
    xq = jnp.transpose(xf.reshape(N, Dq, s, Ho, Wo, K), (0, 2, 1, 3, 4, 5))
    xs = xq.reshape(N, R, K)

    # Folded weights [k, k^2*Cin, Cout]; channel order (kh, kw, cin) matches patches.
    wf = w.reshape(ksz, ksz * ksz * Cin, Cout).astype(jnp.bfloat16)

    # Static in-bounds proof for every tap window (no runtime VMEM bounds check).
    max_base = max(((kd % s) * Dq + kd // s) * HoWo for kd in range(ksz))
    assert max_base + M <= R, (max_base, M, R)

    # Cout tiling: second 'parallel' grid axis (per-channel IN stats are independent).
    ct = Cout if (Cout <= 128 or Cout % 128 != 0) else 128
    CT = Cout // ct

    has_res = residual is not None
    inputs = [xs, wf]
    in_specs = [
        pl.BlockSpec((None, R, K), lambda n, c: (n, 0, 0)),    # resident folded slab
        pl.BlockSpec((ksz, K, ct), lambda n, c: (0, 0, c)),    # folded weights
    ]
    if has_res:
        rflat = residual.reshape(N, M, Cout).astype(jnp.bfloat16)
        inputs.append(rflat)
        in_specs.append(pl.BlockSpec((None, M, ct), lambda n, c: (n, 0, c)))

    # VMEM budget estimate (lane/sublane padded, double-buffered) + headroom.
    rup = lambda v, mult: -(-v // mult) * mult
    Kp, ctp, Mpad = rup(K, 128), rup(ct, 128), rup(M, 16)
    est = (2 * R * Kp * 2                      # slab (double-buffered)
           + 2 * ksz * Kp * ctp * 2            # weights
           + (4 if has_res else 2) * Mpad * ctp * 2   # out (+ residual)
           + 6 * Mpad * ctp * 4)               # f32 accumulator + IN temporaries
    vmem_limit = int(min(112 * 2 ** 20, max(32 * 2 ** 20, int(est * 1.25))))

    y = pl.pallas_call(
        partial(_fused_conv_in_act_kernel, ksize=ksz, stride=s, dq=Dq, howo=HoWo,
                m=M, inv_cnt=1.0 / M, eps=1e-5, relu=relu, has_res=has_res),
        out_shape=jax.ShapeDtypeStruct((N, M, Cout), jnp.bfloat16),
        grid=(N, CT),
        in_specs=in_specs,
        out_specs=pl.BlockSpec((None, M, ct), lambda n, c: (n, 0, c)),
        compiler_params=pltpu.CompilerParams(
            dimension_semantics=("parallel", "parallel"),
            vmem_limit_bytes=vmem_limit),
    )(*inputs)

    # Exact valid extent -> plain reshape, channel-last (consumed directly next layer).
    return y.reshape(N, Do, Ho, Wo, Cout)


# ----------------------------------------------------------------------------
# ContentEncoder3D forward
# ----------------------------------------------------------------------------
def content_encoder_3d_forward(x, conv_layers, res_layers):
    """x: [N, C, D, H, W] f32 (PyTorch NCDHW).  Returns [N, C_out, Do, Ho, Wo] f32."""
    h = jnp.transpose(x, (0, 2, 3, 4, 1)).astype(jnp.bfloat16)   # NDHWC bf16, once
    for w, stride, pad in conv_layers:
        h = conv3d_block(h, w, stride=stride, pad=pad, relu=True)
    for w1, w2 in res_layers:
        y = conv3d_block(h, w1, stride=1, pad=1, relu=True)
        # Second block of the ResBlock: norm='in', activation='none', fused +residual.
        h = conv3d_block(y, w2, stride=1, pad=1, relu=False, residual=h)
    return jnp.transpose(h, (0, 4, 1, 2, 3)).astype(jnp.float32)  # back to NCDHW f32


# ----------------------------------------------------------------------------
# Deterministic parameter init (nn.Conv3d default uniform bounds; biases omitted
# because InstanceNorm3d with affine=False cancels them exactly).
# ----------------------------------------------------------------------------
def init_conv_weight(key, k, cin, cout):
    fan_in = cin * k * k * k
    bound = 1.0 / (fan_in ** 0.5)
    return jax.random.uniform(key, (k, k, k, cin, cout), jnp.float32,
                              minval=-bound, maxval=bound)


def init_content_encoder_3d(key, n_downsample, n_res, input_dim, dim):
    keys = jax.random.split(key, 1 + n_downsample + 2 * n_res)
    ki = 0
    conv_layers = []
    # first 7x7x7 conv, stride 1, pad 3
    conv_layers.append((init_conv_weight(keys[ki], 7, input_dim, dim), 1, 3)); ki += 1
    d = dim
    # downsampling 4x4x4 convs, stride 2, pad 1
    for _ in range(n_downsample):
        conv_layers.append((init_conv_weight(keys[ki], 4, d, 2 * d), 2, 1)); ki += 1
        d *= 2
    # residual blocks (two 3x3x3 convs each)
    res_layers = []
    for _ in range(n_res):
        w1 = init_conv_weight(keys[ki], 3, d, d); ki += 1
        w2 = init_conv_weight(keys[ki], 3, d, d); ki += 1
        res_layers.append((w1, w2))
    return conv_layers, res_layers, d


# ----------------------------------------------------------------------------
if __name__ == "__main__":
    key = jax.random.PRNGKey(0)
    pkey, xkey = jax.random.split(key)

    # ContentEncoder3D(n_downsample=1, n_res=1, input_dim=3, dim=8,
    #                  norm='in', activ='relu', pad_type='zero')
    n_downsample, n_res, input_dim, dim = 1, 1, 3, 8
    conv_layers, res_layers, out_dim = init_content_encoder_3d(
        pkey, n_downsample, n_res, input_dim, dim)

    # PyTorch-style NCDHW input: [N=2, C=3, D=8, H=8, W=8]
    x = jax.random.normal(xkey, (2, input_dim, 8, 8, 8), dtype=jnp.float32)

    @jax.jit
    def forward(x):
        return content_encoder_3d_forward(x, conv_layers, res_layers)

    out = forward(x)
    jax.block_until_ready(out)

    # 1 downsample: 8 -> 4 spatial; channels: dim*2 = 16
    assert out.shape == (2, out_dim, 4, 4, 4), out.shape
    assert out.dtype == jnp.float32
    assert bool(jnp.isfinite(out).all())

    print("KERNEL_OK")
</pallas_src>

<mosaic_0001>
module attributes {stable_mosaic.version = 11 : i64} {
  func.func @_fused_conv_in_act_kernel(%arg0: i32, %arg1: i32, %arg2: memref<1x896x147xbf16, #tpu.memory_space<vmem>>, %arg3: memref<7x147x8xbf16, #tpu.memory_space<vmem>>, %arg4: memref<1x512x8xbf16, #tpu.memory_space<vmem>>) attributes {dimension_semantics = [#tpu.dimension_semantics<parallel>, #tpu.dimension_semantics<parallel>], iteration_bounds = array<i64: 2, 1>, scalar_prefetch = 0 : i64, scratch_operands = 0 : i64, tpu.core_type = #tpu.core_type<tc>, window_params = [{transform_indices = @transform_0, window_bounds = array<i64: 1, 896, 147>}, {transform_indices = @transform_1, window_bounds = array<i64: 7, 147, 8>}, {transform_indices = @transform_2, window_bounds = array<i64: 1, 512, 8>}]} {
    %c0 = arith.constant 0 : index
    %c0_0 = arith.constant 0 : index
    %c0_1 = arith.constant 0 : index
    %0 = vector.load %arg2[%c0, %c0_0, %c0_1] : memref<1x896x147xbf16, #tpu.memory_space<vmem>>, vector<1x512x147xbf16>
    %1 = vector.shape_cast %0 : vector<1x512x147xbf16> to vector<512x147xbf16>
    %c0_2 = arith.constant 0 : index
    %c0_3 = arith.constant 0 : index
    %c0_4 = arith.constant 0 : index
    %2 = vector.load %arg3[%c0_2, %c0_3, %c0_4] : memref<7x147x8xbf16, #tpu.memory_space<vmem>>, vector<1x147x8xbf16>
    %3 = vector.shape_cast %2 : vector<1x147x8xbf16> to vector<147x8xbf16>
    %cst = arith.constant dense<0.000000e+00> : vector<512x8xf32>
    %4 = tpu.matmul %1, %3, %cst {dimension_numbers = #tpu.dot_dimension_numbers<[1], [0], [0], [1], [0, 0, 1, 1], [], []>} : vector<512x147xbf16>, vector<147x8xbf16>, vector<512x8xf32> -> vector<512x8xf32>
    %c0_5 = arith.constant 0 : index
    %c64 = arith.constant 64 : index
    %c0_6 = arith.constant 0 : index
    %5 = vector.load %arg2[%c0_5, %c64, %c0_6] : memref<1x896x147xbf16, #tpu.memory_space<vmem>>, vector<1x512x147xbf16>
    %6 = vector.shape_cast %5 : vector<1x512x147xbf16> to vector<512x147xbf16>
    %c1 = arith.constant 1 : index
    %c0_7 = arith.constant 0 : index
    %c0_8 = arith.constant 0 : index
    %7 = vector.load %arg3[%c1, %c0_7, %c0_8] : memref<7x147x8xbf16, #tpu.memory_space<vmem>>, vector<1x147x8xbf16>
    %8 = vector.shape_cast %7 : vector<1x147x8xbf16> to vector<147x8xbf16>
    %cst_9 = arith.constant dense<0.000000e+00> : vector<512x8xf32>
    %9 = tpu.matmul %6, %8, %cst_9 {dimension_numbers = #tpu.dot_dimension_numbers<[1], [0], [0], [1], [0, 0, 1, 1], [], []>} : vector<512x147xbf16>, vector<147x8xbf16>, vector<512x8xf32> -> vector<512x8xf32>
    %10 = arith.addf %4, %9 : vector<512x8xf32>
    %c0_10 = arith.constant 0 : index
    %c128 = arith.constant 128 : index
    %c0_11 = arith.constant 0 : index
    %11 = vector.load %arg2[%c0_10, %c128, %c0_11] : memref<1x896x147xbf16, #tpu.memory_space<vmem>>, vector<1x512x147xbf16>
    %12 = vector.shape_cast %11 : vector<1x512x147xbf16> to vector<512x147xbf16>
    %c2 = arith.constant 2 : index
    %c0_12 = arith.constant 0 : index
    %c0_13 = arith.constant 0 : index
    %13 = vector.load %arg3[%c2, %c0_12, %c0_13] : memref<7x147x8xbf16, #tpu.memory_space<vmem>>, vector<1x147x8xbf16>
    %14 = vector.shape_cast %13 : vector<1x147x8xbf16> to vector<147x8xbf16>
    %cst_14 = arith.constant dense<0.000000e+00> : vector<512x8xf32>
    %15 = tpu.matmul %12, %14, %cst_14 {dimension_numbers = #tpu.dot_dimension_numbers<[1], [0], [0], [1], [0, 0, 1, 1], [], []>} : vector<512x147xbf16>, vector<147x8xbf16>, vector<512x8xf32> -> vector<512x8xf32>
    %16 = arith.addf %10, %15 : vector<512x8xf32>
    %c0_15 = arith.constant 0 : index
    %c192 = arith.constant 192 : index
    %c0_16 = arith.constant 0 : index
    %17 = vector.load %arg2[%c0_15, %c192, %c0_16] : memref<1x896x147xbf16, #tpu.memory_space<vmem>>, vector<1x512x147xbf16>
    %18 = vector.shape_cast %17 : vector<1x512x147xbf16> to vector<512x147xbf16>
    %c3 = arith.constant 3 : index
    %c0_17 = arith.constant 0 : index
    %c0_18 = arith.constant 0 : index
    %19 = vector.load %arg3[%c3, %c0_17, %c0_18] : memref<7x147x8xbf16, #tpu.memory_space<vmem>>, vector<1x147x8xbf16>
    %20 = vector.shape_cast %19 : vector<1x147x8xbf16> to vector<147x8xbf16>
    %cst_19 = arith.constant dense<0.000000e+00> : vector<512x8xf32>
    %21 = tpu.matmul %18, %20, %cst_19 {dimension_numbers = #tpu.dot_dimension_numbers<[1], [0], [0], [1], [0, 0, 1, 1], [], []>} : vector<512x147xbf16>, vector<147x8xbf16>, vector<512x8xf32> -> vector<512x8xf32>
    %22 = arith.addf %16, %21 : vector<512x8xf32>
    %c0_20 = arith.constant 0 : index
    %c256 = arith.constant 256 : index
    %c0_21 = arith.constant 0 : index
    %23 = vector.load %arg2[%c0_20, %c256, %c0_21] : memref<1x896x147xbf16, #tpu.memory_space<vmem>>, vector<1x512x147xbf16>
    %24 = vector.shape_cast %23 : vector<1x512x147xbf16> to vector<512x147xbf16>
    %c4 = arith.constant 4 : index
    %c0_22 = arith.constant 0 : index
    %c0_23 = arith.constant 0 : index
    %25 = vector.load %arg3[%c4, %c0_22, %c0_23] : memref<7x147x8xbf16, #tpu.memory_space<vmem>>, vector<1x147x8xbf16>
    %26 = vector.shape_cast %25 : vector<1x147x8xbf16> to vector<147x8xbf16>
    %cst_24 = arith.constant dense<0.000000e+00> : vector<512x8xf32>
    %27 = tpu.matmul %24, %26, %cst_24 {dimension_numbers = #tpu.dot_dimension_numbers<[1], [0], [0], [1], [0, 0, 1, 1], [], []>} : vector<512x147xbf16>, vector<147x8xbf16>, vector<512x8xf32> -> vector<512x8xf32>
    %28 = arith.addf %22, %27 : vector<512x8xf32>
    %c0_25 = arith.constant 0 : index
    %c320 = arith.constant 320 : index
    %c0_26 = arith.constant 0 : index
    %29 = vector.load %arg2[%c0_25, %c320, %c0_26] : memref<1x896x147xbf16, #tpu.memory_space<vmem>>, vector<1x512x147xbf16>
    %30 = vector.shape_cast %29 : vector<1x512x147xbf16> to vector<512x147xbf16>
    %c5 = arith.constant 5 : index
    %c0_27 = arith.constant 0 : index
    %c0_28 = arith.constant 0 : index
    %31 = vector.load %arg3[%c5, %c0_27, %c0_28] : memref<7x147x8xbf16, #tpu.memory_space<vmem>>, vector<1x147x8xbf16>
    %32 = vector.shape_cast %31 : vector<1x147x8xbf16> to vector<147x8xbf16>
    %cst_29 = arith.constant dense<0.000000e+00> : vector<512x8xf32>
    %33 = tpu.matmul %30, %32, %cst_29 {dimension_numbers = #tpu.dot_dimension_numbers<[1], [0], [0], [1], [0, 0, 1, 1], [], []>} : vector<512x147xbf16>, vector<147x8xbf16>, vector<512x8xf32> -> vector<512x8xf32>
    %34 = arith.addf %28, %33 : vector<512x8xf32>
    %c0_30 = arith.constant 0 : index
    %c384 = arith.constant 384 : index
    %c0_31 = arith.constant 0 : index
    %35 = vector.load %arg2[%c0_30, %c384, %c0_31] : memref<1x896x147xbf16, #tpu.memory_space<vmem>>, vector<1x512x147xbf16>
    %36 = vector.shape_cast %35 : vector<1x512x147xbf16> to vector<512x147xbf16>
    %c6 = arith.constant 6 : index
    %c0_32 = arith.constant 0 : index
    %c0_33 = arith.constant 0 : index
    %37 = vector.load %arg3[%c6, %c0_32, %c0_33] : memref<7x147x8xbf16, #tpu.memory_space<vmem>>, vector<1x147x8xbf16>
    %38 = vector.shape_cast %37 : vector<1x147x8xbf16> to vector<147x8xbf16>
    %cst_34 = arith.constant dense<0.000000e+00> : vector<512x8xf32>
    %39 = tpu.matmul %36, %38, %cst_34 {dimension_numbers = #tpu.dot_dimension_numbers<[1], [0], [0], [1], [0, 0, 1, 1], [], []>} : vector<512x147xbf16>, vector<147x8xbf16>, vector<512x8xf32> -> vector<512x8xf32>
    %40 = arith.addf %34, %39 : vector<512x8xf32>
    %cst_35 = arith.constant dense<0.000000e+00> : vector<8xf32>
    %41 = vector.multi_reduction <add>, %40, %cst_35 [0] : vector<512x8xf32> to vector<8xf32>
    %42 = vector.shape_cast %41 : vector<8xf32> to vector<1x8xf32>
    %cst_36 = arith.constant 0.001953125 : f32
    %43 = vector.broadcast %cst_36 : f32 to vector<1x8xf32>
    %44 = arith.mulf %42, %43 : vector<1x8xf32>
    %45 = vector.broadcast %44 : vector<1x8xf32> to vector<512x8xf32>
    %46 = arith.subf %40, %45 : vector<512x8xf32>
    %47 = arith.mulf %46, %46 : vector<512x8xf32>
    %cst_37 = arith.constant dense<0.000000e+00> : vector<8xf32>
    %48 = vector.multi_reduction <add>, %47, %cst_37 [0] : vector<512x8xf32> to vector<8xf32>
    %49 = vector.shape_cast %48 : vector<8xf32> to vector<1x8xf32>
    %cst_38 = arith.constant 0.001953125 : f32
    %50 = vector.broadcast %cst_38 : f32 to vector<1x8xf32>
    %51 = arith.mulf %49, %50 : vector<1x8xf32>
    %cst_39 = arith.constant 9.99999974E-6 : f32
    %52 = vector.broadcast %cst_39 : f32 to vector<1x8xf32>
    %53 = arith.addf %51, %52 : vector<1x8xf32>
    %54 = math.rsqrt %53 : vector<1x8xf32>
    %55 = vector.broadcast %54 : vector<1x8xf32> to vector<512x8xf32>
    %56 = arith.mulf %46, %55 : vector<512x8xf32>
    %cst_40 = arith.constant 0.000000e+00 : f32
    %57 = vector.broadcast %cst_40 : f32 to vector<512x8xf32>
    %58 = arith.maximumf %56, %57 : vector<512x8xf32>
    %59 = arith.truncf %58 : vector<512x8xf32> to vector<512x8xbf16>
    %c0_41 = arith.constant 0 : index
    %c0_42 = arith.constant 0 : index
    %c0_43 = arith.constant 0 : index
    %60 = vector.load %arg4[%c0_41, %c0_42, %c0_43] : memref<1x512x8xbf16, #tpu.memory_space<vmem>>, vector<1x512x8xbf16>
    %61 = vector.shape_cast %60 : vector<1x512x8xbf16> to vector<512x8xbf16>
    %62 = vector.shape_cast %59 : vector<512x8xbf16> to vector<1x512x8xbf16>
    tpu.vector_store %arg4[%c0_41, %c0_42, %c0_43], %62 {strides = array<i32>} : memref<1x512x8xbf16, #tpu.memory_space<vmem>>, vector<1x512x8xbf16>,
    return
  }
  func.func @transform_0(%arg0: i32, %arg1: i32) -> (i32, i32, i32) {
    %c0_i32 = arith.constant 0 : i32
    %c0_i32_0 = arith.constant 0 : i32
    %c0_i32_1 = arith.constant 0 : i32
    return %arg0, %c0_i32, %c0_i32_0 : i32, i32, i32
  }
  func.func @transform_1(%arg0: i32, %arg1: i32) -> (i32, i32, i32) {
    %c0_i32 = arith.constant 0 : i32
    %c0_i32_0 = arith.constant 0 : i32
    %c0_i32_1 = arith.constant 0 : i32
    return %c0_i32, %c0_i32_0, %arg1 : i32, i32, i32
  }
  func.func @transform_2(%arg0: i32, %arg1: i32) -> (i32, i32, i32) {
    %c0_i32 = arith.constant 0 : i32
    %c0_i32_0 = arith.constant 0 : i32
    return %arg0, %c0_i32, %arg1 : i32, i32, i32
  }
}

module attributes {stable_mosaic.version = 11 : i64} {
  func.func @_fused_conv_in_act_kernel(%arg0: i32, %arg1: i32, %arg2: memref<1x160x128xbf16, #tpu.memory_space<vmem>>, %arg3: memref<4x128x16xbf16, #tpu.memory_space<vmem>>, %arg4: memref<1x64x16xbf16, #tpu.memory_space<vmem>>) attributes {dimension_semantics = [#tpu.dimension_semantics<parallel>, #tpu.dimension_semantics<parallel>], iteration_bounds = array<i64: 2, 1>, scalar_prefetch = 0 : i64, scratch_operands = 0 : i64, tpu.core_type = #tpu.core_type<tc>, window_params = [{transform_indices = @transform_0, window_bounds = array<i64: 1, 160, 128>}, {transform_indices = @transform_1, window_bounds = array<i64: 4, 128, 16>}, {transform_indices = @transform_2, window_bounds = array<i64: 1, 64, 16>}]} {
    %c0 = arith.constant 0 : index
    %c0_0 = arith.constant 0 : index
    %c0_1 = arith.constant 0 : index
    %0 = vector.load %arg2[%c0, %c0_0, %c0_1] : memref<1x160x128xbf16, #tpu.memory_space<vmem>>, vector<1x64x128xbf16>
    %1 = vector.shape_cast %0 : vector<1x64x128xbf16> to vector<64x128xbf16>
    %c0_2 = arith.constant 0 : index
    %c0_3 = arith.constant 0 : index
    %c0_4 = arith.constant 0 : index
    %2 = vector.load %arg3[%c0_2, %c0_3, %c0_4] : memref<4x128x16xbf16, #tpu.memory_space<vmem>>, vector<1x128x16xbf16>
    %3 = vector.shape_cast %2 : vector<1x128x16xbf16> to vector<128x16xbf16>
    %cst = arith.constant dense<0.000000e+00> : vector<64x16xf32>
    %4 = tpu.matmul %1, %3, %cst {dimension_numbers = #tpu.dot_dimension_numbers<[1], [0], [0], [1], [0, 0, 1, 1], [], []>} : vector<64x128xbf16>, vector<128x16xbf16>, vector<64x16xf32> -> vector<64x16xf32>
    %c0_5 = arith.constant 0 : index
    %c80 = arith.constant 80 : index
    %c0_6 = arith.constant 0 : index
    %5 = vector.load %arg2[%c0_5, %c80, %c0_6] : memref<1x160x128xbf16, #tpu.memory_space<vmem>>, vector<1x64x128xbf16>
    %6 = vector.shape_cast %5 : vector<1x64x128xbf16> to vector<64x128xbf16>
    %c1 = arith.constant 1 : index
    %c0_7 = arith.constant 0 : index
    %c0_8 = arith.constant 0 : index
    %7 = vector.load %arg3[%c1, %c0_7, %c0_8] : memref<4x128x16xbf16, #tpu.memory_space<vmem>>, vector<1x128x16xbf16>
    %8 = vector.shape_cast %7 : vector<1x128x16xbf16> to vector<128x16xbf16>
    %cst_9 = arith.constant dense<0.000000e+00> : vector<64x16xf32>
    %9 = tpu.matmul %6, %8, %cst_9 {dimension_numbers = #tpu.dot_dimension_numbers<[1], [0], [0], [1], [0, 0, 1, 1], [], []>} : vector<64x128xbf16>, vector<128x16xbf16>, vector<64x16xf32> -> vector<64x16xf32>
    %10 = arith.addf %4, %9 : vector<64x16xf32>
    %c0_10 = arith.constant 0 : index
    %c16 = arith.constant 16 : index
    %c0_11 = arith.constant 0 : index
    %11 = vector.load %arg2[%c0_10, %c16, %c0_11] : memref<1x160x128xbf16, #tpu.memory_space<vmem>>, vector<1x64x128xbf16>
    %12 = vector.shape_cast %11 : vector<1x64x128xbf16> to vector<64x128xbf16>
    %c2 = arith.constant 2 : index
    %c0_12 = arith.constant 0 : index
    %c0_13 = arith.constant 0 : index
    %13 = vector.load %arg3[%c2, %c0_12, %c0_13] : memref<4x128x16xbf16, #tpu.memory_space<vmem>>, vector<1x128x16xbf16>
    %14 = vector.shape_cast %13 : vector<1x128x16xbf16> to vector<128x16xbf16>
    %cst_14 = arith.constant dense<0.000000e+00> : vector<64x16xf32>
    %15 = tpu.matmul %12, %14, %cst_14 {dimension_numbers = #tpu.dot_dimension_numbers<[1], [0], [0], [1], [0, 0, 1, 1], [], []>} : vector<64x128xbf16>, vector<128x16xbf16>, vector<64x16xf32> -> vector<64x16xf32>
    %16 = arith.addf %10, %15 : vector<64x16xf32>
    %c0_15 = arith.constant 0 : index
    %c96 = arith.constant 96 : index
    %c0_16 = arith.constant 0 : index
    %17 = vector.load %arg2[%c0_15, %c96, %c0_16] : memref<1x160x128xbf16, #tpu.memory_space<vmem>>, vector<1x64x128xbf16>
    %18 = vector.shape_cast %17 : vector<1x64x128xbf16> to vector<64x128xbf16>
    %c3 = arith.constant 3 : index
    %c0_17 = arith.constant 0 : index
    %c0_18 = arith.constant 0 : index
    %19 = vector.load %arg3[%c3, %c0_17, %c0_18] : memref<4x128x16xbf16, #tpu.memory_space<vmem>>, vector<1x128x16xbf16>
    %20 = vector.shape_cast %19 : vector<1x128x16xbf16> to vector<128x16xbf16>
    %cst_19 = arith.constant dense<0.000000e+00> : vector<64x16xf32>
    %21 = tpu.matmul %18, %20, %cst_19 {dimension_numbers = #tpu.dot_dimension_numbers<[1], [0], [0], [1], [0, 0, 1, 1], [], []>} : vector<64x128xbf16>, vector<128x16xbf16>, vector<64x16xf32> -> vector<64x16xf32>
    %22 = arith.addf %16, %21 : vector<64x16xf32>
    %cst_20 = arith.constant dense<0.000000e+00> : vector<16xf32>
    %23 = vector.multi_reduction <add>, %22, %cst_20 [0] : vector<64x16xf32> to vector<16xf32>
    %24 = vector.shape_cast %23 : vector<16xf32> to vector<1x16xf32>
    %cst_21 = arith.constant 1.562500e-02 : f32
    %25 = vector.broadcast %cst_21 : f32 to vector<1x16xf32>
    %26 = arith.mulf %24, %25 : vector<1x16xf32>
    %27 = vector.broadcast %26 : vector<1x16xf32> to vector<64x16xf32>
    %28 = arith.subf %22, %27 : vector<64x16xf32>
    %29 = arith.mulf %28, %28 : vector<64x16xf32>
    %cst_22 = arith.constant dense<0.000000e+00> : vector<16xf32>
    %30 = vector.multi_reduction <add>, %29, %cst_22 [0] : vector<64x16xf32> to vector<16xf32>
    %31 = vector.shape_cast %30 : vector<16xf32> to vector<1x16xf32>
    %cst_23 = arith.constant 1.562500e-02 : f32
    %32 = vector.broadcast %cst_23 : f32 to vector<1x16xf32>
    %33 = arith.mulf %31, %32 : vector<1x16xf32>
    %cst_24 = arith.constant 9.99999974E-6 : f32
    %34 = vector.broadcast %cst_24 : f32 to vector<1x16xf32>
    %35 = arith.addf %33, %34 : vector<1x16xf32>
    %36 = math.rsqrt %35 : vector<1x16xf32>
    %37 = vector.broadcast %36 : vector<1x16xf32> to vector<64x16xf32>
    %38 = arith.mulf %28, %37 : vector<64x16xf32>
    %cst_25 = arith.constant 0.000000e+00 : f32
    %39 = vector.broadcast %cst_25 : f32 to vector<64x16xf32>
    %40 = arith.maximumf %38, %39 : vector<64x16xf32>
    %41 = arith.truncf %40 : vector<64x16xf32> to vector<64x16xbf16>
    %c0_26 = arith.constant 0 : index
    %c0_27 = arith.constant 0 : index
    %c0_28 = arith.constant 0 : index
    %42 = vector.load %arg4[%c0_26, %c0_27, %c0_28] : memref<1x64x16xbf16, #tpu.memory_space<vmem>>, vector<1x64x16xbf16>
    %43 = vector.shape_cast %42 : vector<1x64x16xbf16> to vector<64x16xbf16>
    %44 = vector.shape_cast %41 : vector<64x16xbf16> to vector<1x64x16xbf16>
    tpu.vector_store %arg4[%c0_26, %c0_27, %c0_28], %44 {strides = array<i32>} : memref<1x64x16xbf16, #tpu.memory_space<vmem>>, vector<1x64x16xbf16>,
    return
  }
  func.func @transform_0(%arg0: i32, %arg1: i32) -> (i32, i32, i32) {
    %c0_i32 = arith.constant 0 : i32
    %c0_i32_0 = arith.constant 0 : i32
    %c0_i32_1 = arith.constant 0 : i32
    return %arg0, %c0_i32, %c0_i32_0 : i32, i32, i32
  }
  func.func @transform_1(%arg0: i32, %arg1: i32) -> (i32, i32, i32) {
    %c0_i32 = arith.constant 0 : i32
    %c0_i32_0 = arith.constant 0 : i32
    %c0_i32_1 = arith.constant 0 : i32
    return %c0_i32, %c0_i32_0, %arg1 : i32, i32, i32
  }
  func.func @transform_2(%arg0: i32, %arg1: i32) -> (i32, i32, i32) {
    %c0_i32 = arith.constant 0 : i32
    %c0_i32_0 = arith.constant 0 : i32
    return %arg0, %c0_i32, %arg1 : i32, i32, i32
  }
}

module attributes {stable_mosaic.version = 11 : i64} {
  func.func @_fused_conv_in_act_kernel(%arg0: i32, %arg1: i32, %arg2: memref<1x96x144xbf16, #tpu.memory_space<vmem>>, %arg3: memref<3x144x16xbf16, #tpu.memory_space<vmem>>, %arg4: memref<1x64x16xbf16, #tpu.memory_space<vmem>>) attributes {dimension_semantics = [#tpu.dimension_semantics<parallel>, #tpu.dimension_semantics<parallel>], iteration_bounds = array<i64: 2, 1>, scalar_prefetch = 0 : i64, scratch_operands = 0 : i64, tpu.core_type = #tpu.core_type<tc>, window_params = [{transform_indices = @transform_0, window_bounds = array<i64: 1, 96, 144>}, {transform_indices = @transform_1, window_bounds = array<i64: 3, 144, 16>}, {transform_indices = @transform_2, window_bounds = array<i64: 1, 64, 16>}]} {
    %c0 = arith.constant 0 : index
    %c0_0 = arith.constant 0 : index
    %c0_1 = arith.constant 0 : index
    %0 = vector.load %arg2[%c0, %c0_0, %c0_1] : memref<1x96x144xbf16, #tpu.memory_space<vmem>>, vector<1x64x144xbf16>
    %1 = vector.shape_cast %0 : vector<1x64x144xbf16> to vector<64x144xbf16>
    %c0_2 = arith.constant 0 : index
    %c0_3 = arith.constant 0 : index
    %c0_4 = arith.constant 0 : index
    %2 = vector.load %arg3[%c0_2, %c0_3, %c0_4] : memref<3x144x16xbf16, #tpu.memory_space<vmem>>, vector<1x144x16xbf16>
    %3 = vector.shape_cast %2 : vector<1x144x16xbf16> to vector<144x16xbf16>
    %cst = arith.constant dense<0.000000e+00> : vector<64x16xf32>
    %4 = tpu.matmul %1, %3, %cst {dimension_numbers = #tpu.dot_dimension_numbers<[1], [0], [0], [1], [0, 0, 1, 1], [], []>} : vector<64x144xbf16>, vector<144x16xbf16>, vector<64x16xf32> -> vector<64x16xf32>
    %c0_5 = arith.constant 0 : index
    %c16 = arith.constant 16 : index
    %c0_6 = arith.constant 0 : index
    %5 = vector.load %arg2[%c0_5, %c16, %c0_6] : memref<1x96x144xbf16, #tpu.memory_space<vmem>>, vector<1x64x144xbf16>
    %6 = vector.shape_cast %5 : vector<1x64x144xbf16> to vector<64x144xbf16>
    %c1 = arith.constant 1 : index
    %c0_7 = arith.constant 0 : index
    %c0_8 = arith.constant 0 : index
    %7 = vector.load %arg3[%c1, %c0_7, %c0_8] : memref<3x144x16xbf16, #tpu.memory_space<vmem>>, vector<1x144x16xbf16>
    %8 = vector.shape_cast %7 : vector<1x144x16xbf16> to vector<144x16xbf16>
    %cst_9 = arith.constant dense<0.000000e+00> : vector<64x16xf32>
    %9 = tpu.matmul %6, %8, %cst_9 {dimension_numbers = #tpu.dot_dimension_numbers<[1], [0], [0], [1], [0, 0, 1, 1], [], []>} : vector<64x144xbf16>, vector<144x16xbf16>, vector<64x16xf32> -> vector<64x16xf32>
    %10 = arith.addf %4, %9 : vector<64x16xf32>
    %c0_10 = arith.constant 0 : index
    %c32 = arith.constant 32 : index
    %c0_11 = arith.constant 0 : index
    %11 = vector.load %arg2[%c0_10, %c32, %c0_11] : memref<1x96x144xbf16, #tpu.memory_space<vmem>>, vector<1x64x144xbf16>
    %12 = vector.shape_cast %11 : vector<1x64x144xbf16> to vector<64x144xbf16>
    %c2 = arith.constant 2 : index
    %c0_12 = arith.constant 0 : index
    %c0_13 = arith.constant 0 : index
    %13 = vector.load %arg3[%c2, %c0_12, %c0_13] : memref<3x144x16xbf16, #tpu.memory_space<vmem>>, vector<1x144x16xbf16>
    %14 = vector.shape_cast %13 : vector<1x144x16xbf16> to vector<144x16xbf16>
    %cst_14 = arith.constant dense<0.000000e+00> : vector<64x16xf32>
    %15 = tpu.matmul %12, %14, %cst_14 {dimension_numbers = #tpu.dot_dimension_numbers<[1], [0], [0], [1], [0, 0, 1, 1], [], []>} : vector<64x144xbf16>, vector<144x16xbf16>, vector<64x16xf32> -> vector<64x16xf32>
    %16 = arith.addf %10, %15 : vector<64x16xf32>
    %cst_15 = arith.constant dense<0.000000e+00> : vector<16xf32>
    %17 = vector.multi_reduction <add>, %16, %cst_15 [0] : vector<64x16xf32> to vector<16xf32>
    %18 = vector.shape_cast %17 : vector<16xf32> to vector<1x16xf32>
    %cst_16 = arith.constant 1.562500e-02 : f32
    %19 = vector.broadcast %cst_16 : f32 to vector<1x16xf32>
    %20 = arith.mulf %18, %19 : vector<1x16xf32>
    %21 = vector.broadcast %20 : vector<1x16xf32> to vector<64x16xf32>
    %22 = arith.subf %16, %21 : vector<64x16xf32>
    %23 = arith.mulf %22, %22 : vector<64x16xf32>
    %cst_17 = arith.constant dense<0.000000e+00> : vector<16xf32>
    %24 = vector.multi_reduction <add>, %23, %cst_17 [0] : vector<64x16xf32> to vector<16xf32>
    %25 = vector.shape_cast %24 : vector<16xf32> to vector<1x16xf32>
    %cst_18 = arith.constant 1.562500e-02 : f32
    %26 = vector.broadcast %cst_18 : f32 to vector<1x16xf32>
    %27 = arith.mulf %25, %26 : vector<1x16xf32>
    %cst_19 = arith.constant 9.99999974E-6 : f32
    %28 = vector.broadcast %cst_19 : f32 to vector<1x16xf32>
    %29 = arith.addf %27, %28 : vector<1x16xf32>
    %30 = math.rsqrt %29 : vector<1x16xf32>
    %31 = vector.broadcast %30 : vector<1x16xf32> to vector<64x16xf32>
    %32 = arith.mulf %22, %31 : vector<64x16xf32>
    %cst_20 = arith.constant 0.000000e+00 : f32
    %33 = vector.broadcast %cst_20 : f32 to vector<64x16xf32>
    %34 = arith.maximumf %32, %33 : vector<64x16xf32>
    %35 = arith.truncf %34 : vector<64x16xf32> to vector<64x16xbf16>
    %c0_21 = arith.constant 0 : index
    %c0_22 = arith.constant 0 : index
    %c0_23 = arith.constant 0 : index
    %36 = vector.load %arg4[%c0_21, %c0_22, %c0_23] : memref<1x64x16xbf16, #tpu.memory_space<vmem>>, vector<1x64x16xbf16>
    %37 = vector.shape_cast %36 : vector<1x64x16xbf16> to vector<64x16xbf16>
    %38 = vector.shape_cast %35 : vector<64x16xbf16> to vector<1x64x16xbf16>
    tpu.vector_store %arg4[%c0_21, %c0_22, %c0_23], %38 {strides = array<i32>} : memref<1x64x16xbf16, #tpu.memory_space<vmem>>, vector<1x64x16xbf16>,
    return
  }
  func.func @transform_0(%arg0: i32, %arg1: i32) -> (i32, i32, i32) {
    %c0_i32 = arith.constant 0 : i32
    %c0_i32_0 = arith.constant 0 : i32
    %c0_i32_1 = arith.constant 0 : i32
    return %arg0, %c0_i32, %c0_i32_0 : i32, i32, i32
  }
  func.func @transform_1(%arg0: i32, %arg1: i32) -> (i32, i32, i32) {
    %c0_i32 = arith.constant 0 : i32
    %c0_i32_0 = arith.constant 0 : i32
    %c0_i32_1 = arith.constant 0 : i32
    return %c0_i32, %c0_i32_0, %arg1 : i32, i32, i32
  }
  func.func @transform_2(%arg0: i32, %arg1: i32) -> (i32, i32, i32) {
    %c0_i32 = arith.constant 0 : i32
    %c0_i32_0 = arith.constant 0 : i32
    return %arg0, %c0_i32, %arg1 : i32, i32, i32
  }
}

module attributes {stable_mosaic.version = 11 : i64} {
  func.func @_fused_conv_in_act_kernel(%arg0: i32, %arg1: i32, %arg2: memref<1x96x144xbf16, #tpu.memory_space<vmem>>, %arg3: memref<3x144x16xbf16, #tpu.memory_space<vmem>>, %arg4: memref<1x64x16xbf16, #tpu.memory_space<vmem>>, %arg5: memref<1x64x16xbf16, #tpu.memory_space<vmem>>) attributes {dimension_semantics = [#tpu.dimension_semantics<parallel>, #tpu.dimension_semantics<parallel>], iteration_bounds = array<i64: 2, 1>, scalar_prefetch = 0 : i64, scratch_operands = 0 : i64, tpu.core_type = #tpu.core_type<tc>, window_params = [{transform_indices = @transform_0, window_bounds = array<i64: 1, 96, 144>}, {transform_indices = @transform_1, window_bounds = array<i64: 3, 144, 16>}, {transform_indices = @transform_2, window_bounds = array<i64: 1, 64, 16>}, {transform_indices = @transform_3, window_bounds = array<i64: 1, 64, 16>}]} {
    %c0 = arith.constant 0 : index
    %c0_0 = arith.constant 0 : index
    %c0_1 = arith.constant 0 : index
    %0 = vector.load %arg2[%c0, %c0_0, %c0_1] : memref<1x96x144xbf16, #tpu.memory_space<vmem>>, vector<1x64x144xbf16>
    %1 = vector.shape_cast %0 : vector<1x64x144xbf16> to vector<64x144xbf16>
    %c0_2 = arith.constant 0 : index
    %c0_3 = arith.constant 0 : index
    %c0_4 = arith.constant 0 : index
    %2 = vector.load %arg3[%c0_2, %c0_3, %c0_4] : memref<3x144x16xbf16, #tpu.memory_space<vmem>>, vector<1x144x16xbf16>
    %3 = vector.shape_cast %2 : vector<1x144x16xbf16> to vector<144x16xbf16>
    %cst = arith.constant dense<0.000000e+00> : vector<64x16xf32>
    %4 = tpu.matmul %1, %3, %cst {dimension_numbers = #tpu.dot_dimension_numbers<[1], [0], [0], [1], [0, 0, 1, 1], [], []>} : vector<64x144xbf16>, vector<144x16xbf16>, vector<64x16xf32> -> vector<64x16xf32>
    %c0_5 = arith.constant 0 : index
    %c16 = arith.constant 16 : index
    %c0_6 = arith.constant 0 : index
    %5 = vector.load %arg2[%c0_5, %c16, %c0_6] : memref<1x96x144xbf16, #tpu.memory_space<vmem>>, vector<1x64x144xbf16>
    %6 = vector.shape_cast %5 : vector<1x64x144xbf16> to vector<64x144xbf16>
    %c1 = arith.constant 1 : index
    %c0_7 = arith.constant 0 : index
    %c0_8 = arith.constant 0 : index
    %7 = vector.load %arg3[%c1, %c0_7, %c0_8] : memref<3x144x16xbf16, #tpu.memory_space<vmem>>, vector<1x144x16xbf16>
    %8 = vector.shape_cast %7 : vector<1x144x16xbf16> to vector<144x16xbf16>
    %cst_9 = arith.constant dense<0.000000e+00> : vector<64x16xf32>
    %9 = tpu.matmul %6, %8, %cst_9 {dimension_numbers = #tpu.dot_dimension_numbers<[1], [0], [0], [1], [0, 0, 1, 1], [], []>} : vector<64x144xbf16>, vector<144x16xbf16>, vector<64x16xf32> -> vector<64x16xf32>
    %10 = arith.addf %4, %9 : vector<64x16xf32>
    %c0_10 = arith.constant 0 : index
    %c32 = arith.constant 32 : index
    %c0_11 = arith.constant 0 : index
    %11 = vector.load %arg2[%c0_10, %c32, %c0_11] : memref<1x96x144xbf16, #tpu.memory_space<vmem>>, vector<1x64x144xbf16>
    %12 = vector.shape_cast %11 : vector<1x64x144xbf16> to vector<64x144xbf16>
    %c2 = arith.constant 2 : index
    %c0_12 = arith.constant 0 : index
    %c0_13 = arith.constant 0 : index
    %13 = vector.load %arg3[%c2, %c0_12, %c0_13] : memref<3x144x16xbf16, #tpu.memory_space<vmem>>, vector<1x144x16xbf16>
    %14 = vector.shape_cast %13 : vector<1x144x16xbf16> to vector<144x16xbf16>
    %cst_14 = arith.constant dense<0.000000e+00> : vector<64x16xf32>
    %15 = tpu.matmul %12, %14, %cst_14 {dimension_numbers = #tpu.dot_dimension_numbers<[1], [0], [0], [1], [0, 0, 1, 1], [], []>} : vector<64x144xbf16>, vector<144x16xbf16>, vector<64x16xf32> -> vector<64x16xf32>
    %16 = arith.addf %10, %15 : vector<64x16xf32>
    %cst_15 = arith.constant dense<0.000000e+00> : vector<16xf32>
    %17 = vector.multi_reduction <add>, %16, %cst_15 [0] : vector<64x16xf32> to vector<16xf32>
    %18 = vector.shape_cast %17 : vector<16xf32> to vector<1x16xf32>
    %cst_16 = arith.constant 1.562500e-02 : f32
    %19 = vector.broadcast %cst_16 : f32 to vector<1x16xf32>
    %20 = arith.mulf %18, %19 : vector<1x16xf32>
    %21 = vector.broadcast %20 : vector<1x16xf32> to vector<64x16xf32>
    %22 = arith.subf %16, %21 : vector<64x16xf32>
    %23 = arith.mulf %22, %22 : vector<64x16xf32>
    %cst_17 = arith.constant dense<0.000000e+00> : vector<16xf32>
    %24 = vector.multi_reduction <add>, %23, %cst_17 [0] : vector<64x16xf32> to vector<16xf32>
    %25 = vector.shape_cast %24 : vector<16xf32> to vector<1x16xf32>
    %cst_18 = arith.constant 1.562500e-02 : f32
    %26 = vector.broadcast %cst_18 : f32 to vector<1x16xf32>
    %27 = arith.mulf %25, %26 : vector<1x16xf32>
    %cst_19 = arith.constant 9.99999974E-6 : f32
    %28 = vector.broadcast %cst_19 : f32 to vector<1x16xf32>
    %29 = arith.addf %27, %28 : vector<1x16xf32>
    %30 = math.rsqrt %29 : vector<1x16xf32>
    %31 = vector.broadcast %30 : vector<1x16xf32> to vector<64x16xf32>
    %32 = arith.mulf %22, %31 : vector<64x16xf32>
    %c0_20 = arith.constant 0 : index
    %c0_21 = arith.constant 0 : index
    %c0_22 = arith.constant 0 : index
    %33 = vector.load %arg4[%c0_20, %c0_21, %c0_22] : memref<1x64x16xbf16, #tpu.memory_space<vmem>>, vector<1x64x16xbf16>
    %34 = vector.shape_cast %33 : vector<1x64x16xbf16> to vector<64x16xbf16>
    %35 = arith.extf %34 : vector<64x16xbf16> to vector<64x16xf32>
    %36 = arith.addf %32, %35 : vector<64x16xf32>
    %37 = arith.truncf %36 : vector<64x16xf32> to vector<64x16xbf16>
    %c0_23 = arith.constant 0 : index
    %c0_24 = arith.constant 0 : index
    %c0_25 = arith.constant 0 : index
    %38 = vector.load %arg5[%c0_23, %c0_24, %c0_25] : memref<1x64x16xbf16, #tpu.memory_space<vmem>>, vector<1x64x16xbf16>
    %39 = vector.shape_cast %38 : vector<1x64x16xbf16> to vector<64x16xbf16>
    %40 = vector.shape_cast %37 : vector<64x16xbf16> to vector<1x64x16xbf16>
    tpu.vector_store %arg5[%c0_23, %c0_24, %c0_25], %40 {strides = array<i32>} : memref<1x64x16xbf16, #tpu.memory_space<vmem>>, vector<1x64x16xbf16>,
    return
  }
  func.func @transform_0(%arg0: i32, %arg1: i32) -> (i32, i32, i32) {
    %c0_i32 = arith.constant 0 : i32
    %c0_i32_0 = arith.constant 0 : i32
    %c0_i32_1 = arith.constant 0 : i32
    return %arg0, %c0_i32, %c0_i32_0 : i32, i32, i32
  }
  func.func @transform_1(%arg0: i32, %arg1: i32) -> (i32, i32, i32) {
    %c0_i32 = arith.constant 0 : i32
    %c0_i32_0 = arith.constant 0 : i32
    %c0_i32_1 = arith.constant 0 : i32
    return %c0_i32, %c0_i32_0, %arg1 : i32, i32, i32
  }
  func.func @transform_2(%arg0: i32, %arg1: i32) -> (i32, i32, i32) {
    %c0_i32 = arith.constant 0 : i32
    %c0_i32_0 = arith.constant 0 : i32
    return %arg0, %c0_i32, %arg1 : i32, i32, i32
  }
  func.func @transform_3(%arg0: i32, %arg1: i32) -> (i32, i32, i32) {
    %c0_i32 = arith.constant 0 : i32
    %c0_i32_0 = arith.constant 0 : i32
    return %arg0, %c0_i32, %arg1 : i32, i32, i32
  }
}

</mosaic_0001>

<bundles_post_ra>
// kernel: forward.4
= control target key start
LH: loop header
LB: loop body
LE: loop exit
PB: predicated region body
PF: predicated region fallthrough
CT: control target
= control target key end

     0   :  { %s8897_s9 = smov 0   ;;  %s8899_s10 = smov 0   ;;  %s11757_s0 = inlined_call_operand.vmem [shape: bf16[2,896,147], index: 0, kind: input, shape index: {}]   ;;  %s11758_s1 = inlined_call_operand.vmem [shape: bf16[7,147,8], index: 1, kind: input, shape index: {}]   ;;  %s11759_s2 = inlined_call_operand.vmem [shape: bf16[2,512,8], index: 2, kind: output, shape index: {}]  }
   0x1   :  { %s8901_s11 = smov 0  }
   0x2 LB: > { %s24_s12 = sadd.s32 1, %s8874_s10  ;;  %p6779_p0 = scmp.ge.s32.totalorder %s8878_s11, 1  ;;  %s8878_s11 = sphi %s8901_s11, %s12_s11   ;;  %s8874_s10 = sphi %s8899_s10, %s12019_s10   ;;  %s8870_s9 = sphi %s8897_s9, %s12018_s9  }
   0x3   : > { %p26_p1 = scmp.ge.s32.totalorder %s24_s12, 2  ;;  %p135_p2 = scmp.lt.s32.totalorder %s8878_s11, 3 }
   0x5   : > { %s12021_s12 = smov (%p26_p1, %s24_s12), 0  ;;  %p136_p3 = pnand %p6779_p0, %p135_p2 }
   0x7   : > { %139 = sbr.rel (%p136_p3) target bundleno = 1391 (0x56f), region = 28 }
   0xe   : > { %v8465_v0 = vld [vmem:[%s11758_s1 + $0x4c] sm:$0xff]   ;;  %v11761_v1 = vmov 0   ;;  %v8466_v2 = vld [vmem:[%s11758_s1 + $0xe4] sm:$0xff]   ;;  %v8467_v3 = vld [vmem:[%s11758_s1 + $0x54] sm:$0xff]   ;;  %p164_p4 = scmp.lt.s32.totalorder %s8870_s9, 1  ;;  %vm638_vm0 = vcmask 154624  }
   0xf   : > { %742 = vmatprep.subr.bf16.mxu1 %v11761_v1  ;;  %2837 = vmatprep.subr.bf16.mxu0 %v11761_v1  ;;  %v8468_v4 = vld [vmem:[%s11758_s1 + $0xec] sm:$0xff]   ;;  %v8469_v5 = vld [vmem:[%s11758_s1 + $0x5c] sm:$0xff]   ;;  %v8470_v6 = vld [vmem:[%s11758_s1 + $0xf4] sm:$0xff]   ;;  %vm735_vm1 = vcmask 1040384   ;;  %vm736_vm2 = vcmask 1041408   ;;  %v8881_v19 = vmov 65535  }
  0x10   : > { %743 = vmatpush1.bf16.msra.mxu1 %v8465_v0  ;;  %2838 = vmatpush1.bf16.msra.mxu0 %v8466_v2  ;;  %s12023_s9 = smov (!%p164_p4, %s8870_s9), 1  ;;  %v8471_v7 = vld [vmem:[%s11758_s1 + $0x64] sm:$0xff]   ;;  %v8472_v8 = vld [vmem:[%s11758_s1 + $0xfc] sm:$0xff]   ;;  %v8473_v9 = vld [vmem:[%s11758_s1 + $0x6c] sm:$0xff]   ;;  %v737_v20 = vsel %vm735_vm1, 4294967295, %v8881_v19  ;;  %vm5833_vm3 = vcmask 64512  }
  0x11   : > { %744 = vmatprep.subr.bf16.mxu1 %v11761_v1  ;;  %2839 = vmatprep.subr.bf16.mxu0 %v11761_v1  ;;  %s8438_s29 = smul.u32 896, %s12023_s9  ;;  %v8474_v10 = vld [vmem:[%s11758_s1 + $0x104] sm:$0xff]   ;;  %v8475_v11 = vld [vmem:[%s11758_s1 + $0x74] sm:$0xff]   ;;  %v8476_v12 = vld [vmem:[%s11758_s1 + $0x10c] sm:$0xff]   ;;  %v9004_v24 = vsel %vm736_vm2, %v737_v20, 0  ;;  %vm6616_vm4 = vcmask 60416  }
  0x12   : > { %v8477_v15 = vld [vmem:[%s11758_s1 + $0x7c] sm:$0xff]   ;;  %v8478_v16 = vld [vmem:[%s11758_s1 + $0x114] sm:$0xff]   ;;  %v8479_v17 = vld [vmem:[%s11758_s1 + $0x84] sm:$0xff]  }
  0x13   : > { %s8961_s8 = scalar_lea.vmem %s11757_s0, %s8438_s29  ;;  %v8480_v18 = vld [vmem:[%s11758_s1 + $0x11c] sm:$0xff]   ;;  %v8481_v21 = vld [vmem:[%s11758_s1 + $0x8c] sm:$0xff]   ;;  %v8482_v22 = vld [vmem:[%s11758_s1 + $0x124] sm:$0xff]  }
  0x14   : > { %745 = vmatpush1.bf16.msra.mxu1 %v8467_v3  ;;  %2840 = vmatpush1.bf16.msra.mxu0 %v8468_v4  ;;  %v8487_v13 = vld [vmem:[%s8961_s8 + $0x44] ss:$8 sps:$4 sm:$0xff]   ;;  %v8483_v23 = vld [vmem:[%s11758_s1 + $0x94] ss:$0 sps:$4 sm:$0x33]   ;;  %v8499_v36 = vld [vmem:[%s11758_s1 + $0x138] sm:$0xff]  }
  0x15   : > { %746 = vmatprep.subr.bf16.mxu1 %v11761_v1  ;;  %2841 = vmatprep.subr.bf16.mxu0 %v11761_v1  ;;  %v8973_v14 = vld [vmem:[%s8961_s8 + $0xc4] ss:$8 sps:$4 sm:$0xff]   ;;  %v740_v26 = vand.u32 %v8483_v23, %v9004_v24  ;;  %v8485_v28 = vld [vmem:[%s8961_s8 + $0x40] ss:$8 sps:$4 sm:$0xff]   ;;  %v8492_v31 = vld [vmem:[%s11758_s1 + $0x130] sm:$0xff]  }
  0x16   : > { %6876 = vmatprep.mubr.msk.bf16.mxu1 %vm638_vm0, %v8487_v13  ;;  %7176 = vmatprep.mubr.msk.bf16.mxu0 %vm638_vm0, %v8973_v14  ;;  %v8484_v25 = vld [vmem:[%s11758_s1 + $0x12c] ss:$0 sps:$4 sm:$0x33]   ;;  %v9018_v29 = vld [vmem:[%s8961_s8 + $0xc0] ss:$8 sps:$4 sm:$0xff]   ;;  %v8533_v41 = vld [vmem:[%s11758_s1 + $0x10] sm:$0xff]  }
  0x17   : > { %v9013_v27 = vand.u32 %v8484_v25, %v9004_v24  ;;  %v8491_v30 = vld [vmem:[%s11758_s1] sm:$0xff]   ;;  %v8493_v32 = vld [vmem:[%s8961_s8 + $0x54] ss:$8 sps:$4 sm:$0xff]   ;;  %v8512_v34 = vld [vmem:[%s11758_s1 + $0x8] sm:$0xff]  }
  0x18   : > { %747 = vmatpush1.bf16.msra.mxu1 %v8469_v5  ;;  %2842 = vmatpush1.bf16.msra.mxu0 %v8470_v6  ;;  %v9031_v33 = vld [vmem:[%s8961_s8 + $0xd4] ss:$8 sps:$4 sm:$0xff]   ;;  %v8497_v35 = vld [vmem:[%s8961_s8 + $0x50] ss:$8 sps:$4 sm:$0xff]   ;;  %v8500_v38 = vld [vmem:[%s8961_s8 + $0x64] ss:$8 sps:$4 sm:$0xff]  }
  0x19   : > { %748 = vmatprep.subr.bf16.mxu1 %v11761_v1  ;;  %2843 = vmatprep.subr.bf16.mxu0 %v11761_v1  ;;  %v9045_v37 = vld [vmem:[%s8961_s8 + $0xd0] ss:$8 sps:$4 sm:$0xff]   ;;  %v9051_v39 = vld [vmem:[%s8961_s8 + $0xe4] ss:$8 sps:$4 sm:$0xff]   ;;  %v8504_v42 = vld [vmem:[%s8961_s8 + $0x60] ss:$8 sps:$4 sm:$0xff]  }
  0x1a   : > { %v8513_v40 = vld [vmem:[%s11758_s1 + $0x140] sm:$0xff]   ;;  %v8526_v43 = vld [vmem:[%s11758_s1 + $0x148] sm:$0xff]   ;;  %v8548_v45 = vld [vmem:[%s11758_s1 + $0x18] sm:$0xff]  }
  0x1b   : > { %v9070_v44 = vld [vmem:[%s8961_s8 + $0xe0] ss:$8 sps:$4 sm:$0xff]   ;;  %v8506_v46 = vld [vmem:[%s8961_s8 + $0x74] ss:$8 sps:$4 sm:$0xff]   ;;  %v8510_v50 = vld [vmem:[%s8961_s8 + $0x70] ss:$8 sps:$4 sm:$0xff]  }
  0x1c   : > { %749 = vmatpush1.bf16.msra.mxu1 %v8471_v7  ;;  %2844 = vmatpush1.bf16.msra.mxu0 %v8472_v8  ;;  %v9079_v47 = vld [vmem:[%s8961_s8 + $0xf4] ss:$8 sps:$4 sm:$0xff]   ;;  %v9096_v51 = vld [vmem:[%s8961_s8 + $0xf0] ss:$8 sps:$4 sm:$0xff]   ;;  %v8562_v52 = vld [vmem:[%s11758_s1 + $0x20] sm:$0xff]  }
  0x1d   : > { %750 = vmatprep.subr.bf16.mxu1 %v11761_v1  ;;  %2845 = vmatprep.subr.bf16.mxu0 %v11761_v1  ;;  %v8534_v48 = vld [vmem:[%s11758_s1 + $0x150] sm:$0xff]   ;;  %v8544_v49 = vld [vmem:[%s11758_s1 + $0x158] sm:$0xff]   ;;  %v8514_v53 = vld [vmem:[%s8961_s8 + $0x84] ss:$8 sps:$4 sm:$0xff]  }
  0x1e   : > { %v9103_v54 = vld [vmem:[%s8961_s8 + $0x104] ss:$8 sps:$4 sm:$0xff]   ;;  %v9118_v57 = vld [vmem:[%s8961_s8 + $0x80] ss:$8 sps:$4 sm:$0xff]   ;;  %v9127_v60 = vld [vmem:[%s8961_s8 + $0x94] ss:$8 sps:$4 sm:$0xff]  }
  0x1f   : > { %v8549_v55 = vld [vmem:[%s11758_s1 + $0x160] sm:$0xff]   ;;  %v8572_v56 = vld [vmem:[%s11758_s1 + $0x28] sm:$0xff]   ;;  %v8574_v61 = vld [vmem:[%s11758_s1 + $0x30] sm:$0xff]  }
  0x20   : > { %751 = vmatpush1.bf16.msra.mxu1 %v8473_v9  ;;  %2846 = vmatpush1.bf16.msra.mxu0 %v8474_v10  ;;  %v8556_v58 = vld [vmem:[%s11758_s1 + $0x168] sm:$0xff]   ;;  %v9134_v62 = vld [vmem:[%s8961_s8 + $0x114] ss:$8 sps:$4 sm:$0xff]   ;;  %v8568_v0 = vld [vmem:[%s11758_s1 + $0x178] ss:$0 sps:$4 sm:$0x33]  }
  0x21   : > { %752 = vmatprep.subr.bf16.mxu1 %v11761_v1  ;;  %2847 = vmatprep.subr.bf16.mxu0 %v11761_v1  ;;  %v9124_v59 = vld [vmem:[%s8961_s8 + $0x100] ss:$8 sps:$4 sm:$0xff]   ;;  %v8564_v63 = vld [vmem:[%s11758_s1 + $0x170] sm:$0xff]   ;;  %v3716_v3 = vand.u32 %v8568_v0, %v9004_v24  ;;  %v9159_v5 = vld [vmem:[%s8961_s8 + $0xa4] ss:$8 sps:$4 sm:$0xff]  }
  0x22   : > { %v9152_v2 = vld [vmem:[%s8961_s8 + $0x90] ss:$8 sps:$4 sm:$0xff]   ;;  %v9163_v6 = vld [vmem:[%s8961_s8 + $0x124] ss:$8 sps:$4 sm:$0xff]   ;;  %v9173_v7 = vld [vmem:[%s8961_s8 + $0xa0] ss:$8 sps:$4 sm:$0xff]  }
  0x23   : > { %v9156_v4 = vld [vmem:[%s8961_s8 + $0x110] ss:$8 sps:$4 sm:$0xff]   ;;  %v9176_v8 = vld [vmem:[%s8961_s8 + $0x120] ss:$8 sps:$4 sm:$0xff]   ;;  %v9179_v9 = vld [vmem:[%s8961_s8 + $0xb4] ss:$8 sps:$4 sm:$0xff]  }
  0x24   : > { %753 = vmatpush1.bf16.msra.mxu1 %v8475_v11  ;;  %2848 = vmatpush1.bf16.msra.mxu0 %v8476_v12  ;;  %v9182_v10 = vld [vmem:[%s8961_s8 + $0x134] ss:$8 sps:$4 sm:$0xff]   ;;  %v9194_v12 = vld [vmem:[%s8961_s8 + $0xb0] ss:$8 sps:$4 sm:$0xff]   ;;  %v8584_v19 = vld [vmem:[%s11758_s1 + $0x40] sm:$0xff]  }
  0x25   : > { %754 = vmatprep.subr.bf16.mxu1 %v11761_v1  ;;  %2849 = vmatprep.subr.bf16.mxu0 %v11761_v1  ;;  %v8576_v11 = vld [vmem:[%s11758_s1 + $0x38] sm:$0xff]   ;;  %v9237_v20 = vld [vmem:[%s8961_s8 + $0x160] ss:$8 sps:$4 sm:$0xff]   ;;  %v9253_v23 = vld [vmem:[%s8961_s8 + $0x184] ss:$8 sps:$4 sm:$0xff]  }
  0x26   : > { %v9197_v13 = vld [vmem:[%s8961_s8 + $0x130] ss:$8 sps:$4 sm:$0xff]   ;;  %v9262_v25 = vld [vmem:[%s8961_s8 + $0x180] ss:$8 sps:$4 sm:$0xff]   ;;  %v8608_v0 = vld [vmem:[%s8961_s8 + $0x4] ss:$8 sps:$4 sm:$0xff]  }
  0x28   : > { %755 = vmatpush1.bf16.msra.mxu1 %v8477_v15  ;;  %2850 = vmatpush1.bf16.msra.mxu0 %v8478_v16  ;;  %v9200_v15 = vld [vmem:[%s8961_s8 + $0x144] ss:$8 sps:$4 sm:$0xff]   ;;  %v9210_v16 = vld [vmem:[%s8961_s8 + $0x140] ss:$8 sps:$4 sm:$0xff]  }
  0x29   : > { %756 = vmatprep.subr.bf16.mxu1 %v11761_v1  ;;  %2851 = vmatprep.subr.bf16.mxu0 %v11761_v1 }
  0x2c   : > { %757 = vmatpush1.bf16.msra.mxu1 %v8479_v17  ;;  %2852 = vmatpush1.bf16.msra.mxu0 %v8480_v18  ;;  %v9213_v17 = vld [vmem:[%s8961_s8 + $0x154] ss:$8 sps:$4 sm:$0xff]   ;;  %v9225_v18 = vld [vmem:[%s8961_s8 + $0x164] ss:$8 sps:$4 sm:$0xff]  }
  0x2d   : > { %758 = vmatprep.subr.bf16.mxu1 %v11761_v1  ;;  %2853 = vmatprep.subr.bf16.mxu0 %v11761_v1 }
  0x30   : > { %759 = vmatpush1.bf16.msra.mxu1 %v8481_v21  ;;  %2854 = vmatpush1.bf16.msra.mxu0 %v8482_v22  ;;  %v9240_v21 = vld [vmem:[%s8961_s8 + $0x174] ss:$8 sps:$4 sm:$0xff]   ;;  %v9250_v22 = vld [vmem:[%s8961_s8 + $0x170] ss:$8 sps:$4 sm:$0xff]  }
  0x31   : > { %760 = vmatprep.subr.bf16.mxu1 %v11761_v1  ;;  %2855 = vmatprep.subr.bf16.mxu0 %v11761_v1 }
  0x34   : > { %761 = vmatpush1.bf16.msra.mxu1 %v740_v26  ;;  %2856 = vmatpush1.bf16.msra.mxu0 %v9013_v27  ;;  %v9265_v26 = vld [vmem:[%s8961_s8 + $0x194] ss:$8 sps:$4 sm:$0xff]  }
  0x35   : > { %1139 = vmatprep.subr.bf16.mxu1 %v11761_v1  ;;  %3718 = vmatprep.subr.bf16.mxu0 %v11761_v1 }
  0x37   : > { %775 = vmatmul.mubr.bf16.vlgmr.msra.gmra.mrb[0].mxu1 %v8485_v28  ;;  %2870 = vmatmul.mubr.bf16.vlgmr.msra.gmra.mrb[0].mxu0 %v9018_v29  ;;  %v9274_v28 = vld [vmem:[%s8961_s8 + $0x190] ss:$8 sps:$4 sm:$0xff]  }
  0x38   : > { %1140 = vmatpush1.bf16.msra.mxu1 %v8491_v30  ;;  %3719 = vmatpush1.bf16.msra.mxu0 %v8492_v31  ;;  %v8598_v30 = vld [vmem:[%s11758_s1 + $0x48] ss:$0 sps:$4 sm:$0x33]  }
  0x39   : > { %6877 = vmatprep.mubr.msk.bf16.mxu1 %vm638_vm0, %v8493_v32  ;;  %7177 = vmatprep.mubr.msk.bf16.mxu0 %vm638_vm0, %v9031_v33  ;;  %v1137_v31 = vand.u32 %v8598_v30, %v9004_v24  ;;  %v9290_v32 = vld [vmem:[%s8961_s8 + $0x1a0] ss:$8 sps:$4 sm:$0xff]   ;;  %v8614_v30 = vld [vmem:[%s8961_s8 + $0x24] ss:$8 sps:$4 sm:$0xff]  }
  0x3a   : > { %3720 = vmatprep.subr.bf16.mxu0 %v11761_v1  ;;  %1141 = vmatprep.subr.bf16.mxu1 %v11761_v1 }
  0x3c   : > { %1142 = vmatpush1.bf16.msra.mxu1 %v8512_v34  ;;  %3721 = vmatpush1.bf16.msra.mxu0 %v8499_v36  ;;  %v9303_v34 = vld [vmem:[%s8961_s8 + $0x1b0] ss:$8 sps:$4 sm:$0xff]   ;;  %v8575_v36 = vld [vmem:[%s11758_s1 + $0x184] sm:$0xff]  }
  0x3d   : > { %1143 = vmatprep.subr.bf16.mxu1 %v11761_v1  ;;  %3722 = vmatprep.subr.bf16.mxu0 %v11761_v1 }
  0x3f   : > { %783 = vmatmul.mubr.bf16.gmra.mrb[4].mxu1 %v8497_v35  ;;  %2878 = vmatmul.mubr.bf16.gmra.mrb[4].mxu0 %v9045_v37  ;;  %v8573_v35 = vld [vmem:[%s11758_s1 + $0x17c] sm:$0xff]  }
  0x40   : > { %6878 = vmatprep.mubr.msk.bf16.mxu1 %vm638_vm0, %v8500_v38  ;;  %7178 = vmatprep.mubr.msk.bf16.mxu0 %vm638_vm0, %v9051_v39  ;;  %v8585_v38 = vld [vmem:[%s11758_s1 + $0x194] sm:$0xff]  }
  0x41   : > { %3723 = vmatpush1.bf16.msra.mxu0 %v8513_v40  ;;  %1144 = vmatpush1.bf16.msra.mxu1 %v8533_v41  ;;  %v8610_v40 = vld [vmem:[%s11758_s1 + $0x1a4] sm:$0xff]   ;;  %v8621_v41 = vld [vmem:[%s11758_s1 + $0x1ac] sm:$0xff]  }
  0x42   : > { %3724 = vmatprep.subr.bf16.mxu0 %v11761_v1  ;;  %1145 = vmatprep.subr.bf16.mxu1 %v11761_v1 }
  0x45   : > { %3725 = vmatpush1.bf16.msra.mxu0 %v8526_v43  ;;  %1146 = vmatpush1.bf16.msra.mxu1 %v8548_v45  ;;  %v9386_v43 = vld [vmem:[%s8961_s8 + $0x1c4] ss:$8 sps:$4 sm:$0xff]   ;;  %v9398_v45 = vld [vmem:[%s8961_s8 + $0x1d4] ss:$8 sps:$4 sm:$0xff]  }
  0x46   : > { %3726 = vmatprep.subr.bf16.mxu0 %v11761_v1  ;;  %1147 = vmatprep.subr.bf16.mxu1 %v11761_v1 }
  0x47   : > { %791 = vmatmul.mubr.bf16.gmra.mrb[8].mxu1 %v8504_v42  ;;  %2886 = vmatmul.mubr.bf16.gmra.mrb[8].mxu0 %v9070_v44  ;;  %v8632_v42 = vld [vmem:[%s11758_s1 + $0x1b4] sm:$0xff]  }
  0x48   : > { %6879 = vmatprep.mubr.msk.bf16.mxu1 %vm638_vm0, %v8506_v46  ;;  %7179 = vmatprep.mubr.msk.bf16.mxu0 %vm638_vm0, %v9079_v47  ;;  %v9407_v46 = vld [vmem:[%s8961_s8 + $0x1d0] ss:$8 sps:$4 sm:$0xff]  }
  0x49   : > { %3727 = vmatpush1.bf16.msra.mxu0 %v8534_v48  ;;  %1148 = vmatpush1.bf16.msra.mxu1 %v8562_v52  ;;  %v8643_v48 = vld [vmem:[%s11758_s1 + $0x1bc] sm:$0xff]   ;;  %v9438_v52 = vld [vmem:[%s8961_s8 + $0x204] ss:$8 sps:$4 sm:$0xff]  }
  0x4a   : > { %3728 = vmatprep.subr.bf16.mxu0 %v11761_v1  ;;  %1149 = vmatprep.subr.bf16.mxu1 %v11761_v1 }
  0x4d   : > { %3729 = vmatpush1.bf16.msra.mxu0 %v8544_v49  ;;  %1150 = vmatpush1.bf16.msra.mxu1 %v8572_v56  ;;  %v9422_v49 = vld [vmem:[%s8961_s8 + $0x1e0] ss:$8 sps:$4 sm:$0xff]   ;;  %v9462_v56 = vld [vmem:[%s8961_s8 + $0x224] ss:$8 sps:$4 sm:$0xff]  }
  0x4e   : > { %3730 = vmatprep.subr.bf16.mxu0 %v11761_v1  ;;  %1151 = vmatprep.subr.bf16.mxu1 %v11761_v1 }
  0x4f   : > { %799 = vmatmul.mubr.bf16.gmra.mrb[12].mxu1 %v8510_v50  ;;  %2894 = vmatmul.mubr.bf16.gmra.mrb[12].mxu0 %v9096_v51  ;;  %v9426_v50 = vld [vmem:[%s8961_s8 + $0x1f4] ss:$8 sps:$4 sm:$0xff]  }
  0x50   : > { %6880 = vmatprep.mubr.msk.bf16.mxu1 %vm638_vm0, %v8514_v53  ;;  %7180 = vmatprep.mubr.msk.bf16.mxu0 %vm638_vm0, %v9103_v54  ;;  %v9447_v53 = vld [vmem:[%s8961_s8 + $0x200] ss:$8 sps:$4 sm:$0xff]  }
  0x51   : > { %3731 = vmatpush1.bf16.msra.mxu0 %v8549_v55  ;;  %1152 = vmatpush1.bf16.msra.mxu1 %v8574_v61  ;;  %v9459_v55 = vld [vmem:[%s8961_s8 + $0x210] ss:$8 sps:$4 sm:$0xff]   ;;  %v9475_v61 = vld [vmem:[%s8961_s8 + $0x220] ss:$8 sps:$4 sm:$0xff]  }
  0x52   : > { %3732 = vmatprep.subr.bf16.mxu0 %v11761_v1  ;;  %1153 = vmatprep.subr.bf16.mxu1 %v11761_v1 }
  0x55   : > { %3733 = vmatpush1.bf16.msra.mxu0 %v8556_v58  ;;  %1154 = vmatpush1.bf16.msra.mxu1 %v8576_v11  ;;  %v8657_v58 = vld [vmem:[%s11758_s1 + $0x1c4] ss:$0 sps:$4 sm:$0x33]  }
  0x56   : > { %3734 = vmatprep.subr.bf16.mxu0 %v11761_v1  ;;  %1155 = vmatprep.subr.bf16.mxu1 %v11761_v1  ;;  %v8620_v11 = vld [vmem:[%s11758_s1 + $0xa0] sm:$0xff]  }
  0x57   : > { %807 = vmatmul.mubr.bf16.gmra.mrb[16].mxu1 %v9118_v57  ;;  %2902 = vmatmul.mubr.bf16.gmra.mrb[16].mxu0 %v9124_v59 }
  0x58   : > { %6881 = vmatprep.mubr.msk.bf16.mxu1 %vm638_vm0, %v9127_v60  ;;  %7181 = vmatprep.mubr.msk.bf16.mxu0 %vm638_vm0, %v9134_v62 }
  0x59   : > { %3735 = vmatpush1.bf16.msra.mxu0 %v8564_v63  ;;  %1156 = vmatpush1.bf16.msra.mxu1 %v8584_v19  ;;  %v9488_v63 = vld [vmem:[%s8961_s8 + $0x230] ss:$8 sps:$4 sm:$0xff]  }
  0x5a   : > { %3736 = vmatprep.subr.bf16.mxu0 %v11761_v1  ;;  %1157 = vmatprep.subr.bf16.mxu1 %v11761_v1  ;;  %v8613_v19 = vld [vmem:[%s8961_s8 + $0x10] ss:$8 sps:$4 sm:$0xff]  }
  0x5d   : > { %3737 = vmatpush1.bf16.msra.mxu0 %v3716_v3  ;;  %1158 = vmatpush1.bf16.msra.mxu1 %v1137_v31  ;;  %v8606_v3 = vld [vmem:[%s8961_s8] ss:$8 sps:$4 sm:$0xff]  }
  0x5e   : > { %4599 = vmatprep.subr.bf16.mxu0 %v11761_v1  ;;  %1956 = vmatprep.subr.bf16.mxu1 %v11761_v1  ;;  %v8631_v31 = vld [vmem:[%s11758_s1 + $0xa8] sm:$0xff]  }
  0x5f   : > { %815 = vmatmul.mubr.bf16.gmra.mrb[20].mxu1 %v9152_v2  ;;  %2910 = vmatmul.mubr.bf16.gmra.mrb[20].mxu0 %v9156_v4 }
  0x60   : > { %6882 = vmatprep.mubr.msk.bf16.mxu1 %vm638_vm0, %v9159_v5  ;;  %7182 = vmatprep.mubr.msk.bf16.mxu0 %vm638_vm0, %v9163_v6 }
  0x67   : > { %823 = vmatmul.mubr.bf16.gmra.mrb[24].mxu1 %v9173_v7  ;;  %2918 = vmatmul.mubr.bf16.gmra.mrb[24].mxu0 %v9176_v8 }
  0x68   : > { %6883 = vmatprep.mubr.msk.bf16.mxu1 %vm638_vm0, %v9179_v9  ;;  %7183 = vmatprep.mubr.msk.bf16.mxu0 %vm638_vm0, %v9182_v10 }
  0x6f   : > { %831 = vmatmul.mubr.bf16.gmra.mrb[28].mxu1 %v9194_v12  ;;  %2926 = vmatmul.mubr.bf16.gmra.mrb[28].mxu0 %v9197_v13 }
  0x70   : > { %6884 = vmatprep.mubr.msk.bf16.mxu1 %vm638_vm0, %v8973_v14  ;;  %7184 = vmatprep.mubr.msk.bf16.mxu0 %vm638_vm0, %v9200_v15  ;;  %v9222_v14 = vld [vmem:[%s8961_s8 + $0x150] ss:$8 sps:$4 sm:$0xff]  }
  0x77   : > { %839 = vmatmul.mubr.bf16.gmra.mrb[32].mxu1 %v9018_v29  ;;  %2934 = vmatmul.mubr.bf16.gmra.mrb[32].mxu0 %v9210_v16  ;;  %v9277_v29 = vld [vmem:[%s8961_s8 + $0x1a4] ss:$8 sps:$4 sm:$0xff]  }
  0x78   : > { %6885 = vmatprep.mubr.msk.bf16.mxu1 %vm638_vm0, %v9031_v33  ;;  %7185 = vmatprep.mubr.msk.bf16.mxu0 %vm638_vm0, %v9213_v17  ;;  %v9294_v33 = vld [vmem:[%s8961_s8 + $0x1b4] ss:$8 sps:$4 sm:$0xff]  }
  0x7f   : > { %847 = vmatmul.mubr.bf16.gmra.mrb[36].mxu1 %v9045_v37  ;;  %2942 = vmatmul.mubr.bf16.gmra.mrb[36].mxu0 %v9222_v14  ;;  %v8577_v37 = vld [vmem:[%s11758_s1 + $0x18c] sm:$0xff]  }
  0x80   : > { %6886 = vmatprep.mubr.msk.bf16.mxu1 %vm638_vm0, %v9051_v39  ;;  %7186 = vmatprep.mubr.msk.bf16.mxu0 %vm638_vm0, %v9225_v18  ;;  %v8599_v39 = vld [vmem:[%s11758_s1 + $0x19c] sm:$0xff]  }
  0x87   : > { %855 = vmatmul.mubr.bf16.gmra.mrb[40].mxu1 %v9070_v44  ;;  %2950 = vmatmul.mubr.bf16.gmra.mrb[40].mxu0 %v9237_v20  ;;  %v9395_v44 = vld [vmem:[%s8961_s8 + $0x1c0] ss:$8 sps:$4 sm:$0xff]  }
  0x88   : > { %6887 = vmatprep.mubr.msk.bf16.mxu1 %vm638_vm0, %v9079_v47  ;;  %7187 = vmatprep.mubr.msk.bf16.mxu0 %vm638_vm0, %v9240_v21  ;;  %v9410_v47 = vld [vmem:[%s8961_s8 + $0x1e4] ss:$8 sps:$4 sm:$0xff]  }
  0x8f   : > { %863 = vmatmul.mubr.bf16.gmra.mrb[44].mxu1 %v9096_v51  ;;  %2958 = vmatmul.mubr.bf16.gmra.mrb[44].mxu0 %v9250_v22  ;;  %v9435_v51 = vld [vmem:[%s8961_s8 + $0x1f0] ss:$8 sps:$4 sm:$0xff]  }
  0x90   : > { %6888 = vmatprep.mubr.msk.bf16.mxu1 %vm638_vm0, %v9103_v54  ;;  %7188 = vmatprep.mubr.msk.bf16.mxu0 %vm638_vm0, %v9253_v23 }
  0x97   : > { %871 = vmatmul.mubr.bf16.gmra.mrb[48].mxu1 %v9124_v59  ;;  %2966 = vmatmul.mubr.bf16.gmra.mrb[48].mxu0 %v9262_v25 }
  0x98   : > { %6889 = vmatprep.mubr.msk.bf16.mxu1 %vm638_vm0, %v9134_v62  ;;  %7189 = vmatprep.mubr.msk.bf16.mxu0 %vm638_vm0, %v9265_v26 }
  0x9f   : > { %879 = vmatmul.mubr.bf16.gmra.mrb[52].mxu1 %v9156_v4  ;;  %2974 = vmatmul.mubr.bf16.gmra.mrb[52].mxu0 %v9274_v28 }
  0xa0   : > { %6890 = vmatprep.mubr.msk.bf16.mxu1 %vm638_vm0, %v9163_v6  ;;  %7190 = vmatprep.mubr.msk.bf16.mxu0 %vm638_vm0, %v9277_v29 }
  0xa7   : > { %887 = vmatmul.mubr.bf16.gmra.mrb[56].mxu1 %v9176_v8  ;;  %2982 = vmatmul.mubr.bf16.gmra.mrb[56].mxu0 %v9290_v32 }
  0xa8   : > { %6891 = vmatprep.mubr.msk.bf16.mxu1 %vm638_vm0, %v9182_v10  ;;  %7191 = vmatprep.mubr.msk.bf16.mxu0 %vm638_vm0, %v9294_v33 }
  0xaf   : > { %895 = vmatmul.mubr.bf16.gmra.mrb[60].mxu1 %v9197_v13  ;;  %2990 = vmatmul.mubr.bf16.gmra.mrb[60].mxu0 %v9303_v34 }
  0xb0   : > { %6892 = vmatprep.mubr.msk.bf16.mxu1 %vm638_vm0, %v9200_v15  ;;  %7301 = vmatprep.mubr.msk.bf16.mxu0 %vm638_vm0, %v9103_v54  ;;  %v9450_v54 = vld [vmem:[%s8961_s8 + $0x214] ss:$8 sps:$4 sm:$0xff]  }
  0xb7   : > { %903 = vmatmul.mubr.bf16.gmra.mrb[64].mxu1 %v9210_v16  ;;  %3751 = vmatmul.mubr.bf16.vlgmr.msra.gmra.mrb[0].mxu0 %v9124_v59  ;;  %v4597_v59 = vand.u32 %v8657_v58, %v9004_v24  ;;  %v9552_v58 = vld [vmem:[%s8961_s8 + $0x240] ss:$8 sps:$4 sm:$0xff]  }
  0xb8   : > { %6893 = vmatprep.mubr.msk.bf16.mxu1 %vm638_vm0, %v9213_v17  ;;  %4600 = vmatpush1.bf16.msra.mxu0 %v8573_v35  ;;  %v8642_v35 = vld [vmem:[%s11758_s1 + $0xb0] sm:$0xff]  }
  0xb9   : > { %7302 = vmatprep.mubr.msk.bf16.mxu0 %vm638_vm0, %v9134_v62  ;;  %4601 = vmatprep.subr.bf16.mxu0 %v11761_v1  ;;  %v9478_v62 = vld [vmem:[%s8961_s8 + $0x234] ss:$8 sps:$4 sm:$0xff]  }
  0xbc   : > { %4602 = vmatpush1.bf16.msra.mxu0 %v8575_v36  ;;  %v8616_v36 = vld [vmem:[%s8961_s8 + $0x20] ss:$8 sps:$4 sm:$0xff]  }
  0xbd   : > { %4603 = vmatprep.subr.bf16.mxu0 %v11761_v1 }
  0xbf   : > { %911 = vmatmul.mubr.bf16.gmra.mrb[68].mxu1 %v9222_v14  ;;  %3759 = vmatmul.mubr.bf16.gmra.mrb[4].mxu0 %v9156_v4  ;;  %v8609_v4 = vld [vmem:[%s11758_s1 + $0x98] sm:$0xff]  }
  0xc0   : > { %6894 = vmatprep.mubr.msk.bf16.mxu1 %vm638_vm0, %v9225_v18  ;;  %7303 = vmatprep.mubr.msk.bf16.mxu0 %vm638_vm0, %v9163_v6  ;;  %v8611_v6 = vld [vmem:[%s8961_s8 + $0x14] ss:$8 sps:$4 sm:$0xff]  }
  0xc1   : > { %4604 = vmatpush1.bf16.msra.mxu0 %v8577_v37  ;;  %v8617_v37 = vld [vmem:[%s8961_s8 + $0x34] ss:$8 sps:$4 sm:$0xff]  }
  0xc2   : > { %4605 = vmatprep.subr.bf16.mxu0 %v11761_v1 }
  0xc5   : > { %4606 = vmatpush1.bf16.msra.mxu0 %v8585_v38  ;;  %v8655_v38 = vld [vmem:[%s11758_s1 + $0xb8] sm:$0xff]  }
  0xc6   : > { %4607 = vmatprep.subr.bf16.mxu0 %v11761_v1 }
  0xc7   : > { %919 = vmatmul.mubr.bf16.gmra.mrb[72].mxu1 %v9237_v20  ;;  %3767 = vmatmul.mubr.bf16.gmra.mrb[8].mxu0 %v9176_v8 }
  0xc8   : > { %6895 = vmatprep.mubr.msk.bf16.mxu1 %vm638_vm0, %v9240_v21  ;;  %7304 = vmatprep.mubr.msk.bf16.mxu0 %vm638_vm0, %v9182_v10 }
  0xc9   : > { %4608 = vmatpush1.bf16.msra.mxu0 %v8599_v39  ;;  %v8667_v39 = vld [vmem:[%s11758_s1 + $0xc0] sm:$0xff]  }
  0xca   : > { %4609 = vmatprep.subr.bf16.mxu0 %v11761_v1 }
  0xcd   : > { %4610 = vmatpush1.bf16.msra.mxu0 %v8610_v40  ;;  %v8619_v40 = vld [vmem:[%s8961_s8 + $0x30] ss:$8 sps:$4 sm:$0xff]  }
  0xce   : > { %4611 = vmatprep.subr.bf16.mxu0 %v11761_v1 }
  0xcf   : > { %927 = vmatmul.mubr.bf16.gmra.mrb[76].mxu1 %v9250_v22  ;;  %3775 = vmatmul.mubr.bf16.gmra.mrb[12].mxu0 %v9197_v13 }
  0xd0   : > { %6896 = vmatprep.mubr.msk.bf16.mxu1 %vm638_vm0, %v9253_v23  ;;  %7305 = vmatprep.mubr.msk.bf16.mxu0 %vm638_vm0, %v9200_v15 }
  0xd1   : > { %4612 = vmatpush1.bf16.msra.mxu0 %v8621_v41  ;;  %v9539_v41 = vld [vmem:[%s8961_s8 + $0x244] ss:$8 sps:$4 sm:$0xff]  }
  0xd2   : > { %4613 = vmatprep.subr.bf16.mxu0 %v11761_v1 }
  0xd5   : > { %4614 = vmatpush1.bf16.msra.mxu0 %v8632_v42  ;;  %v8825_v42 = vld [vmem:[%s8961_s8 + $0x44] ss:$8 sps:$4 sm:$0xff]  }
  0xd6   : > { %4615 = vmatprep.subr.bf16.mxu0 %v11761_v1 }
  0xd7   : > { %935 = vmatmul.mubr.bf16.gmra.mrb[80].mxu1 %v9262_v25  ;;  %3783 = vmatmul.mubr.bf16.gmra.mrb[16].mxu0 %v9210_v16 }
  0xd8   : > { %6897 = vmatprep.mubr.msk.bf16.mxu1 %vm638_vm0, %v9265_v26  ;;  %7306 = vmatprep.mubr.msk.bf16.mxu0 %vm638_vm0, %v9213_v17 }
  0xd9   : > { %4616 = vmatpush1.bf16.msra.mxu0 %v8643_v48  ;;  %v8678_v48 = vld [vmem:[%s11758_s1 + $0xc8] sm:$0xff]  }
  0xda   : > { %4617 = vmatprep.subr.bf16.mxu0 %v11761_v1 }
  0xdd   : > { %4618 = vmatpush1.bf16.msra.mxu0 %v4597_v59  ;;  %v9555_v59 = vld [vmem:[%s8961_s8 + $0x254] ss:$8 sps:$4 sm:$0xff]  }
  0xde   : > { %5480 = vmatprep.subr.bf16.mxu0 %v11761_v1 }
  0xdf   : > { %943 = vmatmul.mubr.bf16.gmra.mrb[84].mxu1 %v9274_v28  ;;  %3791 = vmatmul.mubr.bf16.gmra.mrb[20].mxu0 %v9222_v14 }
  0xe0   : > { %6898 = vmatprep.mubr.msk.bf16.mxu1 %vm638_vm0, %v9277_v29  ;;  %7307 = vmatprep.mubr.msk.bf16.mxu0 %vm638_vm0, %v9225_v18 }
  0xe7   : > { %951 = vmatmul.mubr.bf16.gmra.mrb[88].mxu1 %v9290_v32  ;;  %3799 = vmatmul.mubr.bf16.gmra.mrb[24].mxu0 %v9237_v20 }
  0xe8   : > { %6899 = vmatprep.mubr.msk.bf16.mxu1 %vm638_vm0, %v9294_v33  ;;  %7308 = vmatprep.mubr.msk.bf16.mxu0 %vm638_vm0, %v9240_v21 }
  0xef   : > { %959 = vmatmul.mubr.bf16.gmra.mrb[92].mxu1 %v9303_v34  ;;  %3807 = vmatmul.mubr.bf16.gmra.mrb[28].mxu0 %v9250_v22 }
  0xf0   : > { %6900 = vmatprep.mubr.msk.bf16.mxu1 %vm638_vm0, %v9386_v43  ;;  %7309 = vmatprep.mubr.msk.bf16.mxu0 %vm638_vm0, %v9253_v23 }
  0xf7   : > { %967 = vmatmul.mubr.bf16.gmra.mrb[96].mxu1 %v9395_v44  ;;  %3815 = vmatmul.mubr.bf16.gmra.mrb[32].mxu0 %v9262_v25 }
  0xf8   : > { %6901 = vmatprep.mubr.msk.bf16.mxu1 %vm638_vm0, %v9398_v45  ;;  %7310 = vmatprep.mubr.msk.bf16.mxu0 %vm638_vm0, %v9265_v26 }
  0xff   : > { %975 = vmatmul.mubr.bf16.gmra.mrb[100].mxu1 %v9407_v46  ;;  %3823 = vmatmul.mubr.bf16.gmra.mrb[36].mxu0 %v9274_v28 }
 0x100   : > { %6902 = vmatprep.mubr.msk.bf16.mxu1 %vm638_vm0, %v9410_v47  ;;  %7311 = vmatprep.mubr.msk.bf16.mxu0 %vm638_vm0, %v9277_v29 }
 0x107   : > { %983 = vmatmul.mubr.bf16.gmra.mrb[104].mxu1 %v9422_v49  ;;  %3831 = vmatmul.mubr.bf16.gmra.mrb[40].mxu0 %v9290_v32 }
 0x108   : > { %6903 = vmatprep.mubr.msk.bf16.mxu1 %vm638_vm0, %v9426_v50  ;;  %7312 = vmatprep.mubr.msk.bf16.mxu0 %vm638_vm0, %v9294_v33 }
 0x10f   : > { %991 = vmatmul.mubr.bf16.gmra.mrb[108].mxu1 %v9435_v51  ;;  %3839 = vmatmul.mubr.bf16.gmra.mrb[44].mxu0 %v9303_v34 }
 0x110   : > { %6904 = vmatprep.mubr.msk.bf16.mxu1 %vm638_vm0, %v9438_v52  ;;  %7313 = vmatprep.mubr.msk.bf16.mxu0 %vm638_vm0, %v9386_v43 }
 0x117   : > { %999 = vmatmul.mubr.bf16.gmra.mrb[112].mxu1 %v9447_v53  ;;  %3847 = vmatmul.mubr.bf16.gmra.mrb[48].mxu0 %v9395_v44 }
 0x118   : > { %6905 = vmatprep.mubr.msk.bf16.mxu1 %vm638_vm0, %v9450_v54  ;;  %7314 = vmatprep.mubr.msk.bf16.mxu0 %vm638_vm0, %v9398_v45 }
 0x11f   : > { %1007 = vmatmul.mubr.bf16.gmra.mrb[116].mxu1 %v9459_v55  ;;  %3855 = vmatmul.mubr.bf16.gmra.mrb[52].mxu0 %v9407_v46 }
 0x120   : > { %6906 = vmatprep.mubr.msk.bf16.mxu1 %vm638_vm0, %v9462_v56  ;;  %7315 = vmatprep.mubr.msk.bf16.mxu0 %vm638_vm0, %v9410_v47 }
 0x127   : > { %1015 = vmatmul.mubr.bf16.gmra.mrb[120].mxu1 %v9475_v61  ;;  %3863 = vmatmul.mubr.bf16.gmra.mrb[56].mxu0 %v9422_v49 }
 0x128   : > { %6907 = vmatprep.mubr.msk.bf16.mxu1 %vm638_vm0, %v9478_v62  ;;  %7316 = vmatprep.mubr.msk.bf16.mxu0 %vm638_vm0, %v9426_v50 }
 0x12f   : > { %1023 = vmatmul.mubr.bf16.gmra.mrb[124].mxu1 %v9488_v63  ;;  %3871 = vmatmul.mubr.bf16.gmra.mrb[60].mxu0 %v9435_v51 }
 0x130   : > { %6926 = vmatprep.mubr.msk.bf16.mxu1 %vm638_vm0, %v8608_v0  ;;  %7317 = vmatprep.mubr.msk.bf16.mxu0 %vm638_vm0, %v9438_v52  ;;  %v8826_v0 = vld [vmem:[%s8961_s8 + $0x40] ss:$8 sps:$4 sm:$0xff]  }
 0x137   : > { %1172 = vmatmul.mubr.bf16.vlgmr.msra.gmra.mrb[0].mxu1 %v8606_v3  ;;  %3879 = vmatmul.mubr.bf16.gmra.mrb[64].mxu0 %v9447_v53  ;;  %v8827_v3 = vld [vmem:[%s8961_s8 + $0x54] ss:$8 sps:$4 sm:$0xff]  }
 0x138   : > { %1957 = vmatpush1.bf16.msra.mxu1 %v8609_v4  ;;  %6927 = vmatprep.mubr.msk.bf16.mxu1 %vm638_vm0, %v8611_v6  ;;  %v9564_v4 = vld [vmem:[%s8961_s8 + $0x250] ss:$8 sps:$4 sm:$0xff]   ;;  %v9567_v6 = vld [vmem:[%s8961_s8 + $0x264] ss:$8 sps:$4 sm:$0xff]  }
 0x139   : > { %7318 = vmatprep.mubr.msk.bf16.mxu0 %vm638_vm0, %v9450_v54  ;;  %1958 = vmatprep.subr.bf16.mxu1 %v11761_v1 }
 0x13c   : > { %1959 = vmatpush1.bf16.msra.mxu1 %v8620_v11  ;;  %v8828_v11 = vld [vmem:[%s8961_s8 + $0x50] ss:$8 sps:$4 sm:$0xff]  }
 0x13d   : > { %1960 = vmatprep.subr.bf16.mxu1 %v11761_v1 }
 0x13f   : > { %1180 = vmatmul.mubr.bf16.gmra.mrb[4].mxu1 %v8613_v19  ;;  %3887 = vmatmul.mubr.bf16.gmra.mrb[68].mxu0 %v9459_v55  ;;  %v8829_v19 = vld [vmem:[%s8961_s8 + $0x64] ss:$8 sps:$4 sm:$0xff]  }
 0x140   : > { %6928 = vmatprep.mubr.msk.bf16.mxu1 %vm638_vm0, %v8614_v30  ;;  %7319 = vmatprep.mubr.msk.bf16.mxu0 %vm638_vm0, %v9462_v56  ;;  %v9576_v30 = vld [vmem:[%s8961_s8 + $0x260] ss:$8 sps:$4 sm:$0xff]  }
 0x141   : > { %1961 = vmatpush1.bf16.msra.mxu1 %v8631_v31  ;;  %v9579_v31 = vld [vmem:[%s8961_s8 + $0x274] ss:$8 sps:$4 sm:$0xff]  }
 0x142   : > { %1962 = vmatprep.subr.bf16.mxu1 %v11761_v1 }
 0x145   : > { %1963 = vmatpush1.bf16.msra.mxu1 %v8642_v35  ;;  %v8830_v35 = vld [vmem:[%s8961_s8 + $0x60] ss:$8 sps:$4 sm:$0xff]  }
 0x146   : > { %1964 = vmatprep.subr.bf16.mxu1 %v11761_v1 }
 0x147   : > { %1188 = vmatmul.mubr.bf16.gmra.mrb[8].mxu1 %v8616_v36  ;;  %3895 = vmatmul.mubr.bf16.gmra.mrb[72].mxu0 %v9475_v61  ;;  %v8831_v36 = vld [vmem:[%s8961_s8 + $0x74] ss:$8 sps:$4 sm:$0xff]  }
 0x148   : > { %6929 = vmatprep.mubr.msk.bf16.mxu1 %vm638_vm0, %v8617_v37  ;;  %7320 = vmatprep.mubr.msk.bf16.mxu0 %vm638_vm0, %v9478_v62  ;;  %v8689_v37 = vld [vmem:[%s11758_s1 + $0xd0] sm:$0xff]  }
 0x149   : > { %1965 = vmatpush1.bf16.msra.mxu1 %v8655_v38  ;;  %v9592_v38 = vld [vmem:[%s8961_s8 + $0x270] ss:$8 sps:$4 sm:$0xff]  }
 0x14a   : > { %1966 = vmatprep.subr.bf16.mxu1 %v11761_v1 }
 0x14d   : > { %1967 = vmatpush1.bf16.msra.mxu1 %v8667_v39  ;;  %v9595_v39 = vld [vmem:[%s8961_s8 + $0x284] ss:$8 sps:$4 sm:$0xff]  }
 0x14e   : > { %1968 = vmatprep.subr.bf16.mxu1 %v11761_v1 }
 0x14f   : > { %1196 = vmatmul.mubr.bf16.gmra.mrb[12].mxu1 %v8619_v40  ;;  %3903 = vmatmul.mubr.bf16.gmra.mrb[76].mxu0 %v9488_v63  ;;  %v8832_v40 = vld [vmem:[%s8961_s8 + $0x70] ss:$8 sps:$4 sm:$0xff]  }
 0x150   : > { %6930 = vmatprep.mubr.msk.bf16.mxu1 %vm638_vm0, %v8825_v42  ;;  %7321 = vmatprep.mubr.msk.bf16.mxu0 %vm638_vm0, %v9539_v41  ;;  %v8833_v42 = vld [vmem:[%s8961_s8 + $0x84] ss:$8 sps:$4 sm:$0xff]  }
 0x151   : > { %1969 = vmatpush1.bf16.msra.mxu1 %v8678_v48  ;;  %v9604_v48 = vld [vmem:[%s8961_s8 + $0x280] ss:$8 sps:$4 sm:$0xff]  }
 0x152   : > { %1970 = vmatprep.subr.bf16.mxu1 %v11761_v1 }
 0x155   : > { %1971 = vmatpush1.bf16.msra.mxu1 %v8689_v37  ;;  %v8836_v37 = vld [vmem:[%s8961_s8 + $0xd4] ss:$8 sps:$4 sm:$0xff]  }
 0x156   : > { %1972 = vmatprep.subr.bf16.mxu1 %v11761_v1 }
 0x157   : > { %1204 = vmatmul.mubr.bf16.gmra.mrb[16].mxu1 %v8826_v0  ;;  %3911 = vmatmul.mubr.bf16.gmra.mrb[80].mxu0 %v9552_v58  ;;  %v9607_v0 = vld [vmem:[%s8961_s8 + $0x294] ss:$8 sps:$4 sm:$0xff]  }
 0x158   : > { %6931 = vmatprep.mubr.msk.bf16.mxu1 %vm638_vm0, %v8827_v3  ;;  %7322 = vmatprep.mubr.msk.bf16.mxu0 %vm638_vm0, %v9555_v59  ;;  %v9616_v3 = vld [vmem:[%s8961_s8 + $0x290] ss:$8 sps:$4 sm:$0xff]  }
 0x15f   : > { %1212 = vmatmul.mubr.bf16.gmra.mrb[20].mxu1 %v8828_v11  ;;  %3919 = vmatmul.mubr.bf16.gmra.mrb[84].mxu0 %v9564_v4  ;;  %v9619_v11 = vld [vmem:[%s8961_s8 + $0x2a4] ss:$8 sps:$4 sm:$0xff]  }
 0x160   : > { %6932 = vmatprep.mubr.msk.bf16.mxu1 %vm638_vm0, %v8829_v19  ;;  %7323 = vmatprep.mubr.msk.bf16.mxu0 %vm638_vm0, %v9567_v6  ;;  %v9647_v19 = vld [vmem:[%s8961_s8 + $0x2c4] ss:$8 sps:$4 sm:$0xff]  }
 0x167   : > { %1220 = vmatmul.mubr.bf16.gmra.mrb[24].mxu1 %v8830_v35  ;;  %3927 = vmatmul.mubr.bf16.gmra.mrb[88].mxu0 %v9576_v30  ;;  %v9659_v35 = vld [vmem:[%s8961_s8 + $0x2d4] ss:$8 sps:$4 sm:$0xff]  }
 0x168   : > { %6933 = vmatprep.mubr.msk.bf16.mxu1 %vm638_vm0, %v8831_v36  ;;  %7324 = vmatprep.mubr.msk.bf16.mxu0 %vm638_vm0, %v9579_v31  ;;  %v8835_v36 = vld [vmem:[%s8961_s8 + $0xc0] ss:$8 sps:$4 sm:$0xff]  }
 0x16f   : > { %1228 = vmatmul.mubr.bf16.gmra.mrb[28].mxu1 %v8832_v40  ;;  %3935 = vmatmul.mubr.bf16.gmra.mrb[92].mxu0 %v9592_v38  ;;  %v9671_v40 = vld [vmem:[%s8961_s8 + $0x2e4] ss:$8 sps:$4 sm:$0xff]  }
 0x170   : > { %6934 = vmatprep.mubr.msk.bf16.mxu1 %vm638_vm0, %v8833_v42  ;;  %7325 = vmatprep.mubr.msk.bf16.mxu0 %vm638_vm0, %v9595_v39  ;;  %11825 = vst [vmem:[#allocation3_spill] sm:$0xff] %v9671_v40  ;;  %v8837_v42 = vld [vmem:[%s8961_s8 + $0xd0] ss:$8 sps:$4 sm:$0xff]  }
 0x177   : > { %1236 = vmatmul.mubr.bf16.gmra.mrb[32].mxu1 %v9118_v57  ;;  %3943 = vmatmul.mubr.bf16.gmra.mrb[96].mxu0 %v9604_v48  ;;  %v8694_v57 = vld [vmem:[%s11758_s1 + $0xd8] sm:$0xff]  }
 0x178   : > { %6935 = vmatprep.mubr.msk.bf16.mxu1 %vm638_vm0, %v9127_v60  ;;  %7326 = vmatprep.mubr.msk.bf16.mxu0 %vm638_vm0, %v9607_v0  ;;  %v9632_v60 = vld [vmem:[%s8961_s8 + $0x2a0] ss:$8 sps:$4 sm:$0xff]  }
 0x179   : > { %1973 = vmatpush1.bf16.msra.mxu1 %v8694_v57  ;;  %v8696_v57 = vld [vmem:[%s11758_s1 + $0xe0] ss:$0 sps:$4 sm:$0x33]  }
 0x17a   : > { %1974 = vmatprep.subr.bf16.mxu1 %v11761_v1 }
 0x17f   : > { %1244 = vmatmul.mubr.bf16.gmra.mrb[36].mxu1 %v9152_v2  ;;  %3951 = vmatmul.mubr.bf16.gmra.mrb[100].mxu0 %v9616_v3  ;;  %v9635_v2 = vld [vmem:[%s8961_s8 + $0x2b4] ss:$8 sps:$4 sm:$0xff]  }
 0x180   : > { %6936 = vmatprep.mubr.msk.bf16.mxu1 %vm638_vm0, %v9159_v5  ;;  %7327 = vmatprep.mubr.msk.bf16.mxu0 %vm638_vm0, %v9619_v11  ;;  %v9644_v5 = vld [vmem:[%s8961_s8 + $0x2b0] ss:$8 sps:$4 sm:$0xff]  }
 0x187   : > { %1252 = vmatmul.mubr.bf16.gmra.mrb[40].mxu1 %v9173_v7  ;;  %3959 = vmatmul.mubr.bf16.gmra.mrb[104].mxu0 %v9632_v60  ;;  %v8834_v7 = vld [vmem:[%s8961_s8 + $0xc4] ss:$8 sps:$4 sm:$0xff]  }
 0x188   : > { %6937 = vmatprep.mubr.msk.bf16.mxu1 %vm638_vm0, %v9179_v9  ;;  %7328 = vmatprep.mubr.msk.bf16.mxu0 %vm638_vm0, %v9635_v2  ;;  %v9656_v9 = vld [vmem:[%s8961_s8 + $0x2c0] ss:$8 sps:$4 sm:$0xff]  }
 0x18f   : > { %1260 = vmatmul.mubr.bf16.gmra.mrb[44].mxu1 %v9194_v12  ;;  %3967 = vmatmul.mubr.bf16.gmra.mrb[108].mxu0 %v9644_v5  ;;  %v9668_v12 = vld [vmem:[%s8961_s8 + $0x2d0] ss:$8 sps:$4 sm:$0xff]  }
 0x190   : > { %6938 = vmatprep.mubr.msk.bf16.mxu1 %vm638_vm0, %v8834_v7  ;;  %7329 = vmatprep.mubr.msk.bf16.mxu0 %vm638_vm0, %v9647_v19  ;;  %11824 = vst [vmem:[#allocation2_spill] sm:$0xff] %v9668_v12  ;;  %v8838_v7 = vld [vmem:[%s8961_s8 + $0xe4] ss:$8 sps:$4 sm:$0xff]  }
 0x197   : > { %1268 = vmatmul.mubr.bf16.gmra.mrb[48].mxu1 %v8835_v36  ;;  %3975 = vmatmul.mubr.bf16.gmra.mrb[112].mxu0 %v9656_v9  ;;  %v1954_v36 = vand.u32 %v8696_v57, %v9004_v24  ;;  %v9697_v57 = vld [vmem:[%s8961_s8 + $0x2f0] ss:$8 sps:$4 sm:$0xff]  }
 0x198   : > { %6939 = vmatprep.mubr.msk.bf16.mxu1 %vm638_vm0, %v8836_v37  ;;  %7330 = vmatprep.mubr.msk.bf16.mxu0 %vm638_vm0, %v9659_v35  ;;  %v9684_v37 = vld [vmem:[%s8961_s8 + $0x2e0] ss:$8 sps:$4 sm:$0xff]   ;;  %11828 = vst [vmem:[#allocation6_spill] sm:$0xff] %v9697_v57 }
 0x199   : > { %1975 = vmatpush1.bf16.msra.mxu1 %v1954_v36  ;;  %11826 = vst [vmem:[#allocation4_spill] sm:$0xff] %v9684_v37  ;;  %v9700_v36 = vld [vmem:[%s8961_s8 + $0x144] ss:$8 sps:$4 sm:$0xff]  }
 0x19a   : > { %7714 = vmatprep.subr.bf16.mxu1 %v11761_v1  ;;  %11829 = vst [vmem:[#allocation7_spill] sm:$0xff] %v9700_v36  ;;  %v8841_v1 = vld [vmem:[%s8961_s8 + $0xf0] ss:$8 sps:$4 sm:$0xff]  }
 0x19f   : > { %1276 = vmatmul.mubr.bf16.gmra.mrb[52].mxu1 %v8837_v42  ;;  %3983 = vmatmul.mubr.bf16.gmra.mrb[116].mxu0 %v9668_v12  ;;  %v9688_v42 = vld [vmem:[%s8961_s8 + $0x2f4] ss:$8 sps:$4 sm:$0xff]   ;;  %v8839_v12 = vld [vmem:[%s8961_s8 + $0xe0] ss:$8 sps:$4 sm:$0xff]  }
 0x1a0   : > { %6940 = vmatprep.mubr.msk.bf16.mxu1 %vm638_vm0, %v8838_v7  ;;  %7331 = vmatprep.mubr.msk.bf16.mxu0 %vm638_vm0, %v9671_v40  ;;  %11827 = vst [vmem:[#allocation5_spill] sm:$0xff] %v9688_v42  ;;  %v8840_v7 = vld [vmem:[%s8961_s8 + $0xf4] ss:$8 sps:$4 sm:$0xff]   ;;  %v9728_v40 = vld [vmem:[%s8961_s8 + $0x150] ss:$8 sps:$4 sm:$0xff]  }
 0x1a7   : > { %1284 = vmatmul.mubr.bf16.gmra.mrb[56].mxu1 %v8839_v12  ;;  %3991 = vmatmul.mubr.bf16.gmra.mrb[120].mxu0 %v9684_v37  ;;  %v8842_v12 = vld [vmem:[%s8961_s8 + $0x104] ss:$8 sps:$4 sm:$0xff]   ;;  %v9715_v37 = vld [vmem:[%s8961_s8 + $0x154] ss:$8 sps:$4 sm:$0xff]  }
 0x1a8   : > { %6941 = vmatprep.mubr.msk.bf16.mxu1 %vm638_vm0, %v8840_v7  ;;  %7332 = vmatprep.mubr.msk.bf16.mxu0 %vm638_vm0, %v9688_v42  ;;  %v9709_v7 = vld [vmem:[%s8961_s8 + $0x140] ss:$8 sps:$4 sm:$0xff]   ;;  %11831 = vst [vmem:[#allocation9_spill] sm:$0xff] %v9715_v37 }
 0x1a9   : > { %11830 = vst [vmem:[#allocation8_spill] sm:$0xff] %v9709_v7  ;;  %v8668_v42 = vld [vmem:[%s11758_s1 + $0x1c8] sm:$0xff]  }
 0x1af   : > { %1292 = vmatmul.mubr.bf16.gmra.mrb[60].mxu1 %v8841_v1  ;;  %3999 = vmatmul.mubr.bf16.gmra.mrb[124].mxu0 %v9697_v57  ;;  %v8843_v1 = vld [vmem:[%s8961_s8 + $0x100] ss:$8 sps:$4 sm:$0xff]   ;;  %v8844_v57 = vld [vmem:[%s8961_s8 + $0x114] ss:$8 sps:$4 sm:$0xff]  }
 0x1b0   : > { %6942 = vmatprep.mubr.msk.bf16.mxu1 %vm638_vm0, %v8842_v12  ;;  %7426 = vmatprep.mubr.msk.bf16.mxu0 %vm638_vm0, %v9700_v36  ;;  %v8679_v12 = vld [vmem:[%s11758_s1 + $0x1d0] sm:$0xff]   ;;  %v11832_v36 = vmov 0  }
 0x1b7   : > { %1300 = vmatmul.mubr.bf16.gmra.mrb[64].mxu1 %v8843_v1  ;;  %4632 = vmatmul.mubr.bf16.vlgmr.msra.gmra.mrb[0].mxu0 %v9709_v7  ;;  %v9731_v1 = vld [vmem:[%s8961_s8 + $0x164] ss:$8 sps:$4 sm:$0xff]   ;;  %v9748_v7 = vld [vmem:[%s8961_s8 + $0x160] ss:$8 sps:$4 sm:$0xff]  }
 0x1b8   : > { %6943 = vmatprep.mubr.msk.bf16.mxu1 %vm638_vm0, %v8844_v57  ;;  %5481 = vmatpush1.bf16.msra.mxu0 %v8668_v42  ;;  %v8690_v42 = vld [vmem:[%s11758_s1 + $0x1d8] sm:$0xff]  }
 0x1b9   : > { %7427 = vmatprep.mubr.msk.bf16.mxu0 %vm638_vm0, %v9715_v37  ;;  %5482 = vmatprep.subr.bf16.mxu0 %v11832_v36  ;;  %v8845_v57 = vld [vmem:[%s8961_s8 + $0x110] ss:$8 sps:$4 sm:$0xff]   ;;  %v8846_v37 = vld [vmem:[%s8961_s8 + $0x124] ss:$8 sps:$4 sm:$0xff]  }
 0x1bc   : > { %5483 = vmatpush1.bf16.msra.mxu0 %v8679_v12  ;;  %v8695_v12 = vld [vmem:[%s11758_s1 + $0x1e0] sm:$0xff]  }
 0x1bd   : > { %5484 = vmatprep.subr.bf16.mxu0 %v11832_v36 }
 0x1bf   : > { %1308 = vmatmul.mubr.bf16.gmra.mrb[68].mxu1 %v8845_v57  ;;  %4640 = vmatmul.mubr.bf16.gmra.mrb[4].mxu0 %v9728_v40  ;;  %v9751_v57 = vld [vmem:[%s8961_s8 + $0x174] ss:$8 sps:$4 sm:$0xff]  }
 0x1c0   : > { %6944 = vmatprep.mubr.msk.bf16.mxu1 %vm638_vm0, %v8846_v37  ;;  %7428 = vmatprep.mubr.msk.bf16.mxu0 %vm638_vm0, %v9731_v1  ;;  %v8697_v37 = vld [vmem:[%s11758_s1 + $0x1e8] sm:$0xff]  }
 0x1c1   : > { %5485 = vmatpush1.bf16.msra.mxu0 %v8690_v42  ;;  %v8701_v42 = vld [vmem:[%s11758_s1 + $0x1f0] sm:$0xff]  }
 0x1c2   : > { %5486 = vmatprep.subr.bf16.mxu0 %v11832_v36 }
 0x1c5   : > { %5487 = vmatpush1.bf16.msra.mxu0 %v8695_v12  ;;  %v9768_v12 = vld [vmem:[%s8961_s8 + $0x170] ss:$8 sps:$4 sm:$0xff]  }
 0x1c6   : > { %5488 = vmatprep.subr.bf16.mxu0 %v11832_v36 }
 0x1c7   : > { %1316 = vmatmul.mubr.bf16.gmra.mrb[72].mxu1 %v9176_v8  ;;  %4648 = vmatmul.mubr.bf16.gmra.mrb[8].mxu0 %v9748_v7  ;;  %v9771_v8 = vld [vmem:[%s8961_s8 + $0x184] ss:$8 sps:$4 sm:$0xff]  }
 0x1c8   : > { %6945 = vmatprep.mubr.msk.bf16.mxu1 %vm638_vm0, %v9182_v10  ;;  %7429 = vmatprep.mubr.msk.bf16.mxu0 %vm638_vm0, %v9751_v57  ;;  %v8711_v10 = vld [vmem:[%s11758_s1 + $0x1f8] sm:$0xff]  }
 0x1c9   : > { %5489 = vmatpush1.bf16.msra.mxu0 %v8697_v37  ;;  %v9785_v37 = vld [vmem:[%s8961_s8 + $0x180] ss:$8 sps:$4 sm:$0xff]  }
 0x1ca   : > { %5490 = vmatprep.subr.bf16.mxu0 %v11832_v36 }
 0x1cd   : > { %5491 = vmatpush1.bf16.msra.mxu0 %v8701_v42  ;;  %v9800_v42 = vld [vmem:[%s8961_s8 + $0x1a4] ss:$8 sps:$4 sm:$0xff]  }
 0x1ce   : > { %5492 = vmatprep.subr.bf16.mxu0 %v11832_v36 }
 0x1cf   : > { %1324 = vmatmul.mubr.bf16.gmra.mrb[76].mxu1 %v9197_v13  ;;  %4656 = vmatmul.mubr.bf16.gmra.mrb[12].mxu0 %v9768_v12  ;;  %v9788_v13 = vld [vmem:[%s8961_s8 + $0x194] ss:$8 sps:$4 sm:$0xff]  }
 0x1d0   : > { %6946 = vmatprep.mubr.msk.bf16.mxu1 %vm638_vm0, %v9200_v15  ;;  %7430 = vmatprep.mubr.msk.bf16.mxu0 %vm638_vm0, %v9771_v8  ;;  %v9797_v15 = vld [vmem:[%s8961_s8 + $0x190] ss:$8 sps:$4 sm:$0xff]  }
 0x1d1   : > { %5493 = vmatpush1.bf16.msra.mxu0 %v8711_v10  ;;  %v10026_v10 = vld [vmem:[%s8961_s8 + $0x320] ss:$8 sps:$4 sm:$0xff]  }
 0x1d2   : > { %5494 = vmatprep.subr.bf16.mxu0 %v11832_v36 }
 0x1d7   : > { %1332 = vmatmul.mubr.bf16.gmra.mrb[80].mxu1 %v9210_v16  ;;  %4664 = vmatmul.mubr.bf16.gmra.mrb[16].mxu0 %v9785_v37  ;;  %v9809_v16 = vld [vmem:[%s8961_s8 + $0x1a0] ss:$8 sps:$4 sm:$0xff]  }
 0x1d8   : > { %6947 = vmatprep.mubr.msk.bf16.mxu1 %vm638_vm0, %v9213_v17  ;;  %7431 = vmatprep.mubr.msk.bf16.mxu0 %vm638_vm0, %v9788_v13  ;;  %v9812_v17 = vld [vmem:[%s8961_s8 + $0x1b4] ss:$8 sps:$4 sm:$0xff]  }
 0x1df   : > { %1340 = vmatmul.mubr.bf16.gmra.mrb[84].mxu1 %v9222_v14  ;;  %4672 = vmatmul.mubr.bf16.gmra.mrb[20].mxu0 %v9797_v15  ;;  %v8721_v14 = vld [vmem:[%s11758_s1 + $0x200] sm:$0xff]  }
 0x1e0   : > { %6948 = vmatprep.mubr.msk.bf16.mxu1 %vm638_vm0, %v9225_v18  ;;  %7432 = vmatprep.mubr.msk.bf16.mxu0 %vm638_vm0, %v9800_v42  ;;  %v9825_v18 = vld [vmem:[%s8961_s8 + $0x1b0] ss:$8 sps:$4 sm:$0xff]  }
 0x1e1   : > { %5495 = vmatpush1.bf16.msra.mxu0 %v8721_v14  ;;  %v10029_v14 = vld [vmem:[%s8961_s8 + $0x334] ss:$8 sps:$4 sm:$0xff]  }
 0x1e2   : > { %5496 = vmatprep.subr.bf16.mxu0 %v11832_v36 }
 0x1e7   : > { %1348 = vmatmul.mubr.bf16.gmra.mrb[88].mxu1 %v9237_v20  ;;  %4680 = vmatmul.mubr.bf16.gmra.mrb[24].mxu0 %v9809_v16  ;;  %v8731_v20 = vld [vmem:[%s11758_s1 + $0x208] sm:$0xff]  }
 0x1e8   : > { %6949 = vmatprep.mubr.msk.bf16.mxu1 %vm638_vm0, %v9240_v21  ;;  %7433 = vmatprep.mubr.msk.bf16.mxu0 %vm638_vm0, %v9812_v17  ;;  %v8744_v21 = vld [vmem:[%s11758_s1 + $0x210] ss:$0 sps:$4 sm:$0x33]  }
 0x1e9   : > { %5497 = vmatpush1.bf16.msra.mxu0 %v8731_v20  ;;  %v10137_v20 = vld [vmem:[%s8961_s8 + $0x224] ss:$8 sps:$4 sm:$0xff]  }
 0x1ea   : > { %5498 = vmatprep.subr.bf16.mxu0 %v11832_v36 }
 0x1ef   : > { %1356 = vmatmul.mubr.bf16.gmra.mrb[92].mxu1 %v9250_v22  ;;  %4688 = vmatmul.mubr.bf16.gmra.mrb[28].mxu0 %v9825_v18  ;;  %v5478_v22 = vand.u32 %v8744_v21, %v9004_v24  ;;  %v8698_v24 = vld [vmem:[%s8961_s8 + $0x80] ss:$8 sps:$4 sm:$0xff]  }
 0x1f0   : > { %6950 = vmatprep.mubr.msk.bf16.mxu1 %vm638_vm0, %v9253_v23  ;;  %7434 = vmatprep.mubr.msk.bf16.mxu0 %vm638_vm0, %v9386_v43  ;;  %v8700_v23 = vld [vmem:[%s8961_s8 + $0x84] ss:$8 sps:$4 sm:$0xff]   ;;  %v10146_v21 = vld [vmem:[%s8961_s8 + $0x220] ss:$8 sps:$4 sm:$0xff]  }
 0x1f1   : > { %5499 = vmatpush1.bf16.msra.mxu0 %v5478_v22  ;;  %v10149_v22 = vld [vmem:[%s8961_s8 + $0x234] ss:$8 sps:$4 sm:$0xff]  }
 0x1f7   : > { %1364 = vmatmul.mubr.bf16.gmra.mrb[96].mxu1 %v9262_v25  ;;  %4696 = vmatmul.mubr.bf16.gmra.mrb[32].mxu0 %v9395_v44  ;;  %v8702_v25 = vld [vmem:[%s8961_s8 + $0x94] ss:$8 sps:$4 sm:$0xff]  }
 0x1f8   : > { %6951 = vmatprep.mubr.msk.bf16.mxu1 %vm638_vm0, %v9265_v26  ;;  %7435 = vmatprep.mubr.msk.bf16.mxu0 %vm638_vm0, %v9398_v45  ;;  %v8847_v26 = vld [vmem:[%s11758_s1 + $0xe4] sm:$0xff]  }
 0x1ff   : > { %1372 = vmatmul.mubr.bf16.gmra.mrb[100].mxu1 %v9274_v28  ;;  %4704 = vmatmul.mubr.bf16.gmra.mrb[36].mxu0 %v9407_v46  ;;  %v8704_v28 = vld [vmem:[%s8961_s8 + $0x90] ss:$8 sps:$4 sm:$0xff]  }
 0x200   : > { %6952 = vmatprep.mubr.msk.bf16.mxu1 %vm638_vm0, %v9277_v29  ;;  %7436 = vmatprep.mubr.msk.bf16.mxu0 %vm638_vm0, %v9410_v47  ;;  %v8705_v29 = vld [vmem:[%s8961_s8 + $0xa4] ss:$8 sps:$4 sm:$0xff]  }
 0x207   : > { %1380 = vmatmul.mubr.bf16.gmra.mrb[104].mxu1 %v9290_v32  ;;  %4712 = vmatmul.mubr.bf16.gmra.mrb[40].mxu0 %v9422_v49  ;;  %v8848_v32 = vld [vmem:[%s11758_s1 + $0xec] sm:$0xff]  }
 0x208   : > { %6953 = vmatprep.mubr.msk.bf16.mxu1 %vm638_vm0, %v9294_v33  ;;  %7437 = vmatprep.mubr.msk.bf16.mxu0 %vm638_vm0, %v9426_v50  ;;  %v8849_v33 = vld [vmem:[%s11758_s1 + $0xf4] sm:$0xff]  }
 0x20f   : > { %1388 = vmatmul.mubr.bf16.gmra.mrb[108].mxu1 %v9303_v34  ;;  %4720 = vmatmul.mubr.bf16.gmra.mrb[44].mxu0 %v9435_v51  ;;  %v8707_v34 = vld [vmem:[%s8961_s8 + $0xa0] ss:$8 sps:$4 sm:$0xff]  }
 0x210   : > { %6954 = vmatprep.mubr.msk.bf16.mxu1 %vm638_vm0, %v9386_v43  ;;  %7438 = vmatprep.mubr.msk.bf16.mxu0 %vm638_vm0, %v9438_v52  ;;  %v8708_v43 = vld [vmem:[%s8961_s8 + $0xb4] ss:$8 sps:$4 sm:$0xff]  }
 0x211   : > { %v8715_v52 = vld [vmem:[%s8961_s8 + $0xd4] ss:$8 sps:$4 sm:$0xff]  }
 0x217   : > { %1396 = vmatmul.mubr.bf16.gmra.mrb[112].mxu1 %v9395_v44  ;;  %4728 = vmatmul.mubr.bf16.gmra.mrb[48].mxu0 %v9447_v53  ;;  %v8850_v44 = vld [vmem:[%s11758_s1 + $0xfc] sm:$0xff]  }
 0x218   : > { %6955 = vmatprep.mubr.msk.bf16.mxu1 %vm638_vm0, %v9398_v45  ;;  %7439 = vmatprep.mubr.msk.bf16.mxu0 %vm638_vm0, %v9450_v54  ;;  %v8851_v45 = vld [vmem:[%s11758_s1 + $0x104] sm:$0xff]   ;;  %v8854_v53 = vld [vmem:[%s11758_s1 + $0x11c] sm:$0xff]  }
 0x219   : > { %v8855_v54 = vld [vmem:[%s11758_s1 + $0x124] sm:$0xff]  }
 0x21f   : > { %1404 = vmatmul.mubr.bf16.gmra.mrb[116].mxu1 %v9407_v46  ;;  %4736 = vmatmul.mubr.bf16.gmra.mrb[52].mxu0 %v9459_v55  ;;  %v8710_v46 = vld [vmem:[%s8961_s8 + $0xb0] ss:$8 sps:$4 sm:$0xff]  }
 0x220   : > { %6956 = vmatprep.mubr.msk.bf16.mxu1 %vm638_vm0, %v9410_v47  ;;  %7440 = vmatprep.mubr.msk.bf16.mxu0 %vm638_vm0, %v9462_v56  ;;  %v8712_v47 = vld [vmem:[%s8961_s8 + $0xc4] ss:$8 sps:$4 sm:$0xff]   ;;  %v8717_v55 = vld [vmem:[%s8961_s8 + $0xd0] ss:$8 sps:$4 sm:$0xff]  }
 0x221   : > { %v8718_v56 = vld [vmem:[%s8961_s8 + $0xe4] ss:$8 sps:$4 sm:$0xff]  }
 0x227   : > { %1412 = vmatmul.mubr.bf16.gmra.mrb[120].mxu1 %v9422_v49  ;;  %4744 = vmatmul.mubr.bf16.gmra.mrb[56].mxu0 %v9475_v61  ;;  %v8852_v49 = vld [vmem:[%s11758_s1 + $0x10c] sm:$0xff]   ;;  %v8720_v61 = vld [vmem:[%s8961_s8 + $0xe0] ss:$8 sps:$4 sm:$0xff]  }
 0x228   : > { %6957 = vmatprep.mubr.msk.bf16.mxu1 %vm638_vm0, %v9426_v50  ;;  %7441 = vmatprep.mubr.msk.bf16.mxu0 %vm638_vm0, %v9478_v62  ;;  %v8853_v50 = vld [vmem:[%s11758_s1 + $0x114] sm:$0xff]  }
 0x229   : > { %v8722_v62 = vld [vmem:[%s8961_s8 + $0xf4] ss:$8 sps:$4 sm:$0xff]  }
 0x22f   : > { %1420 = vmatmul.mubr.bf16.gmra.mrb[124].mxu1 %v9435_v51  ;;  %4752 = vmatmul.mubr.bf16.gmra.mrb[60].mxu0 %v9488_v63  ;;  %v8714_v51 = vld [vmem:[%s8961_s8 + $0xc0] ss:$8 sps:$4 sm:$0xff]   ;;  %v8725_v63 = vld [vmem:[%s8961_s8 + $0x104] ss:$8 sps:$4 sm:$0xff]  }
 0x230   : > { %7051 = vmatprep.mubr.msk.bf16.mxu1 %vm638_vm0, %v8700_v23  ;;  %7442 = vmatprep.mubr.msk.bf16.mxu0 %vm638_vm0, %v9539_v41  ;;  %v8727_v41 = vld [vmem:[%s8961_s8 + $0x100] ss:$8 sps:$4 sm:$0xff]  }
 0x237   : > { %1989 = vmatmul.mubr.bf16.vlgmr.msra.gmra.mrb[0].mxu1 %v8698_v24  ;;  %4760 = vmatmul.mubr.bf16.gmra.mrb[64].mxu0 %v9552_v58  ;;  %v8728_v58 = vld [vmem:[%s8961_s8 + $0x114] ss:$8 sps:$4 sm:$0xff]  }
 0x238   : > { %7724 = vmatpush1.bf16.msra.mxu1 %v8847_v26  ;;  %7052 = vmatprep.mubr.msk.bf16.mxu1 %vm638_vm0, %v8702_v25  ;;  %v10160_v25 = vld [vmem:[%s8961_s8 + $0x230] ss:$8 sps:$4 sm:$0xff]  }
 0x239   : > { %7443 = vmatprep.mubr.msk.bf16.mxu0 %vm638_vm0, %v9555_v59  ;;  %7715 = vmatprep.subr.bf16.mxu1 %v11832_v36  ;;  %v8730_v59 = vld [vmem:[%s8961_s8 + $0x110] ss:$8 sps:$4 sm:$0xff]  }
 0x23c   : > { %7725 = vmatpush1.bf16.msra.mxu1 %v8848_v32 }
 0x23d   : > { %7716 = vmatprep.subr.bf16.mxu1 %v11832_v36 }
 0x23f   : > { %1997 = vmatmul.mubr.bf16.gmra.mrb[4].mxu1 %v8704_v28  ;;  %4768 = vmatmul.mubr.bf16.gmra.mrb[68].mxu0 %v9564_v4  ;;  %v8732_v4 = vld [vmem:[%s8961_s8 + $0x124] ss:$8 sps:$4 sm:$0xff]  }
 0x240   : > { %7053 = vmatprep.mubr.msk.bf16.mxu1 %vm638_vm0, %v8705_v29  ;;  %7444 = vmatprep.mubr.msk.bf16.mxu0 %vm638_vm0, %v9567_v6  ;;  %v11833_v6 = vld [vmem:[#allocation2_spill] sm:$0xff] }
 0x241   : > { %7726 = vmatpush1.bf16.msra.mxu1 %v8849_v33  ;;  %v10165_v28 = vld [vmem:[%s8961_s8 + $0x244] ss:$8 sps:$4 sm:$0xff]  }
 0x242   : > { %7717 = vmatprep.subr.bf16.mxu1 %v11832_v36 }
 0x245   : > { %7727 = vmatpush1.bf16.msra.mxu1 %v8850_v44  ;;  %v10181_v44 = vld [vmem:[%s8961_s8 + $0x254] ss:$8 sps:$4 sm:$0xff]  }
 0x246   : > { %7718 = vmatprep.subr.bf16.mxu1 %v11832_v36 }
 0x247   : > { %2005 = vmatmul.mubr.bf16.gmra.mrb[8].mxu1 %v8707_v34  ;;  %4776 = vmatmul.mubr.bf16.gmra.mrb[72].mxu0 %v9576_v30  ;;  %v11834_v30 = vld [vmem:[#allocation3_spill] sm:$0xff] }
 0x248   : > { %7054 = vmatprep.mubr.msk.bf16.mxu1 %vm638_vm0, %v8708_v43  ;;  %7445 = vmatprep.mubr.msk.bf16.mxu0 %vm638_vm0, %v9579_v31  ;;  %v8734_v31 = vld [vmem:[%s8961_s8 + $0x120] ss:$8 sps:$4 sm:$0xff]  }
 0x249   : > { %7728 = vmatpush1.bf16.msra.mxu1 %v8851_v45  ;;  %v10176_v34 = vld [vmem:[%s8961_s8 + $0x240] ss:$8 sps:$4 sm:$0xff]  }
 0x24a   : > { %7719 = vmatprep.subr.bf16.mxu1 %v11832_v36 }
 0x24d   : > { %7729 = vmatpush1.bf16.msra.mxu1 %v8852_v49  ;;  %v10192_v49 = vld [vmem:[%s8961_s8 + $0x250] ss:$8 sps:$4 sm:$0xff]  }
 0x24e   : > { %7720 = vmatprep.subr.bf16.mxu1 %v11832_v36 }
 0x24f   : > { %2013 = vmatmul.mubr.bf16.gmra.mrb[12].mxu1 %v8710_v46  ;;  %4784 = vmatmul.mubr.bf16.gmra.mrb[76].mxu0 %v9592_v38  ;;  %v8735_v38 = vld [vmem:[%s8961_s8 + $0x134] ss:$8 sps:$4 sm:$0xff]  }
 0x250   : > { %7055 = vmatprep.mubr.msk.bf16.mxu1 %vm638_vm0, %v8712_v47  ;;  %7446 = vmatprep.mubr.msk.bf16.mxu0 %vm638_vm0, %v9595_v39  ;;  %v11835_v39 = vld [vmem:[#allocation4_spill] sm:$0xff] }
 0x251   : > { %7730 = vmatpush1.bf16.msra.mxu1 %v8853_v50 }
 0x252   : > { %7721 = vmatprep.subr.bf16.mxu1 %v11832_v36 }
 0x255   : > { %7731 = vmatpush1.bf16.msra.mxu1 %v8854_v53 }
 0x256   : > { %7722 = vmatprep.subr.bf16.mxu1 %v11832_v36 }
 0x257   : > { %2021 = vmatmul.mubr.bf16.gmra.mrb[16].mxu1 %v8714_v51  ;;  %4792 = vmatmul.mubr.bf16.gmra.mrb[80].mxu0 %v9604_v48  ;;  %v11836_v48 = vld [vmem:[#allocation5_spill] sm:$0xff]  ;;  %v10197_v51 = vld [vmem:[%s8961_s8 + $0x264] ss:$8 sps:$4 sm:$0xff]  }
 0x258   : > { %7056 = vmatprep.mubr.msk.bf16.mxu1 %vm638_vm0, %v8715_v52  ;;  %7447 = vmatprep.mubr.msk.bf16.mxu0 %vm638_vm0, %v9607_v0  ;;  %v8737_v0 = vld [vmem:[%s8961_s8 + $0x130] ss:$8 sps:$4 sm:$0xff]  }
 0x259   : > { %7732 = vmatpush1.bf16.msra.mxu1 %v8855_v54 }
 0x25a   : > { %7723 = vmatprep.subr.bf16.mxu1 %v11832_v36  ;;  %v10017_v36 = vld [vmem:[%s8961_s8 + $0x324] ss:$8 sps:$4 sm:$0xff]  }
 0x25d   : > { %7733 = vmatpush1.bf16.msra.mxu1 %v9013_v27  ;;  %v8724_v27 = vld [vmem:[%s8961_s8 + $0xf0] ss:$8 sps:$4 sm:$0xff]  }
 0x25f   : > { %2029 = vmatmul.mubr.bf16.gmra.mrb[20].mxu1 %v8717_v55  ;;  %4800 = vmatmul.mubr.bf16.gmra.mrb[84].mxu0 %v9616_v3  ;;  %v9994_v3 = vld [vmem:[%s8961_s8 + $0x304] ss:$8 sps:$4 sm:$0xff]   ;;  %v10208_v55 = vld [vmem:[%s8961_s8 + $0x260] ss:$8 sps:$4 sm:$0xff]  }
 0x260   : > { %7057 = vmatprep.mubr.msk.bf16.mxu1 %vm638_vm0, %v8718_v56  ;;  %7448 = vmatprep.mubr.msk.bf16.mxu0 %vm638_vm0, %v9619_v11  ;;  %v11837_v11 = vld [vmem:[#allocation6_spill] sm:$0xff] }
 0x267   : > { %2037 = vmatmul.mubr.bf16.gmra.mrb[24].mxu1 %v8720_v61  ;;  %4808 = vmatmul.mubr.bf16.gmra.mrb[88].mxu0 %v9632_v60  ;;  %v11838_v60 = vld [vmem:[#allocation7_spill] sm:$0xff]  ;;  %v10213_v61 = vld [vmem:[%s8961_s8 + $0x274] ss:$8 sps:$4 sm:$0xff]  }
 0x268   : > { %7058 = vmatprep.mubr.msk.bf16.mxu1 %vm638_vm0, %v8722_v62  ;;  %7449 = vmatprep.mubr.msk.bf16.mxu0 %vm638_vm0, %v9635_v2  ;;  %v10002_v2 = vld [vmem:[%s8961_s8 + $0x300] ss:$8 sps:$4 sm:$0xff]  }
 0x26f   : > { %2045 = vmatmul.mubr.bf16.gmra.mrb[28].mxu1 %v8724_v27  ;;  %4816 = vmatmul.mubr.bf16.gmra.mrb[92].mxu0 %v9644_v5  ;;  %v10005_v5 = vld [vmem:[%s8961_s8 + $0x314] ss:$8 sps:$4 sm:$0xff]  }
 0x270   : > { %7059 = vmatprep.mubr.msk.bf16.mxu1 %vm638_vm0, %v8725_v63  ;;  %7450 = vmatprep.mubr.msk.bf16.mxu0 %vm638_vm0, %v9647_v19  ;;  %v11839_v19 = vld [vmem:[#allocation8_spill] sm:$0xff] }
 0x277   : > { %2053 = vmatmul.mubr.bf16.gmra.mrb[32].mxu1 %v8727_v41  ;;  %4824 = vmatmul.mubr.bf16.gmra.mrb[96].mxu0 %v9656_v9  ;;  %v11840_v9 = vld [vmem:[#allocation9_spill] sm:$0xff] }
 0x278   : > { %7060 = vmatprep.mubr.msk.bf16.mxu1 %vm638_vm0, %v8728_v58  ;;  %7451 = vmatprep.mubr.msk.bf16.mxu0 %vm638_vm0, %v9659_v35  ;;  %v10014_v35 = vld [vmem:[%s8961_s8 + $0x310] ss:$8 sps:$4 sm:$0xff]  }
 0x279   : > { %v10224_v41 = vld [vmem:[%s8961_s8 + $0x270] ss:$8 sps:$4 sm:$0xff]  }
 0x27f   : > { %2061 = vmatmul.mubr.bf16.gmra.mrb[36].mxu1 %v8730_v59  ;;  %4832 = vmatmul.mubr.bf16.gmra.mrb[100].mxu0 %v11833_v6 }
 0x280   : > { %7061 = vmatprep.mubr.msk.bf16.mxu1 %vm638_vm0, %v8732_v4  ;;  %7452 = vmatprep.mubr.msk.bf16.mxu0 %vm638_vm0, %v11834_v30  ;;  %v10229_v4 = vld [vmem:[%s8961_s8 + $0x284] ss:$8 sps:$4 sm:$0xff]  }
 0x287   : > { %2069 = vmatmul.mubr.bf16.gmra.mrb[40].mxu1 %v8734_v31  ;;  %4840 = vmatmul.mubr.bf16.gmra.mrb[104].mxu0 %v11835_v39 }
 0x288   : > { %7062 = vmatprep.mubr.msk.bf16.mxu1 %vm638_vm0, %v8735_v38  ;;  %7453 = vmatprep.mubr.msk.bf16.mxu0 %vm638_vm0, %v11836_v48  ;;  %v10242_v38 = vld [vmem:[%s8961_s8 + $0x280] ss:$8 sps:$4 sm:$0xff]   ;;  %v10245_v48 = vld [vmem:[%s8961_s8 + $0x294] ss:$8 sps:$4 sm:$0xff]  }
 0x28f   : > { %2077 = vmatmul.mubr.bf16.gmra.mrb[44].mxu1 %v8737_v0  ;;  %4848 = vmatmul.mubr.bf16.gmra.mrb[108].mxu0 %v11837_v11 }
 0x290   : > { %7063 = vmatprep.mubr.msk.bf16.mxu1 %vm638_vm0, %v11838_v60  ;;  %7454 = vmatprep.mubr.msk.bf16.mxu0 %vm638_vm0, %v9994_v3 }
 0x297   : > { %2085 = vmatmul.mubr.bf16.gmra.mrb[48].mxu1 %v11839_v19  ;;  %4856 = vmatmul.mubr.bf16.gmra.mrb[112].mxu0 %v10002_v2  ;;  %v10258_v19 = vld [vmem:[%s8961_s8 + $0x290] ss:$8 sps:$4 sm:$0xff]  }
 0x298   : > { %7064 = vmatprep.mubr.msk.bf16.mxu1 %vm638_vm0, %v11840_v9  ;;  %7455 = vmatprep.mubr.msk.bf16.mxu0 %vm638_vm0, %v10005_v5 }
 0x29f   : > { %2093 = vmatmul.mubr.bf16.gmra.mrb[52].mxu1 %v9728_v40  ;;  %4864 = vmatmul.mubr.bf16.gmra.mrb[116].mxu0 %v10014_v35  ;;  %v10038_v40 = vld [vmem:[%s8961_s8 + $0x330] ss:$8 sps:$4 sm:$0xff]  }
 0x2a0   : > { %7065 = vmatprep.mubr.msk.bf16.mxu1 %vm638_vm0, %v9731_v1  ;;  %7456 = vmatprep.mubr.msk.bf16.mxu0 %vm638_vm0, %v10017_v36  ;;  %v10074_v1 = vld [vmem:[%s8961_s8 + $0x1c0] ss:$8 sps:$4 sm:$0xff]  }
 0x2a7   : > { %2101 = vmatmul.mubr.bf16.gmra.mrb[56].mxu1 %v9748_v7  ;;  %4872 = vmatmul.mubr.bf16.gmra.mrb[120].mxu0 %v10026_v10  ;;  %v10065_v7 = vld [vmem:[%s8961_s8 + $0x1c4] ss:$8 sps:$4 sm:$0xff]  }
 0x2a8   : > { %7066 = vmatprep.mubr.msk.bf16.mxu1 %vm638_vm0, %v9751_v57  ;;  %7457 = vmatprep.mubr.msk.bf16.mxu0 %vm638_vm0, %v10029_v14  ;;  %v10077_v57 = vld [vmem:[%s8961_s8 + $0x1d4] ss:$8 sps:$4 sm:$0xff]  }
 0x2af   : > { %2109 = vmatmul.mubr.bf16.gmra.mrb[60].mxu1 %v9768_v12  ;;  %4880 = vmatmul.mubr.bf16.gmra.mrb[124].mxu0 %v10038_v40  ;;  %v10086_v12 = vld [vmem:[%s8961_s8 + $0x1d0] ss:$8 sps:$4 sm:$0xff]  }
 0x2b0   : > { %7067 = vmatprep.mubr.msk.bf16.mxu1 %vm638_vm0, %v9771_v8  ;;  %7551 = vmatprep.mubr.msk.bf16.mxu0 %vm638_vm0, %v9771_v8  ;;  %v10089_v8 = vld [vmem:[%s8961_s8 + $0x1e4] ss:$8 sps:$4 sm:$0xff]  }
 0x2b7   : > { %2117 = vmatmul.mubr.bf16.gmra.mrb[64].mxu1 %v9785_v37  ;;  %5513 = vmatmul.mubr.bf16.vlgmr.msra.gmra.mrb[0].mxu0 %v9785_v37  ;;  %v10098_v37 = vld [vmem:[%s8961_s8 + $0x1e0] ss:$8 sps:$4 sm:$0xff]  }
 0x2b8   : > { %7068 = vmatprep.mubr.msk.bf16.mxu1 %vm638_vm0, %v9788_v13  ;;  %7552 = vmatprep.mubr.msk.bf16.mxu0 %vm638_vm0, %v9788_v13  ;;  %v10101_v13 = vld [vmem:[%s8961_s8 + $0x1f4] ss:$8 sps:$4 sm:$0xff]  }
 0x2bf   : > { %2125 = vmatmul.mubr.bf16.gmra.mrb[68].mxu1 %v9797_v15  ;;  %5521 = vmatmul.mubr.bf16.gmra.mrb[4].mxu0 %v9797_v15  ;;  %v10110_v15 = vld [vmem:[%s8961_s8 + $0x1f0] ss:$8 sps:$4 sm:$0xff]  }
 0x2c0   : > { %7069 = vmatprep.mubr.msk.bf16.mxu1 %vm638_vm0, %v9800_v42  ;;  %7553 = vmatprep.mubr.msk.bf16.mxu0 %vm638_vm0, %v9800_v42  ;;  %v10113_v42 = vld [vmem:[%s8961_s8 + $0x204] ss:$8 sps:$4 sm:$0xff]  }
 0x2c7   : > { %2133 = vmatmul.mubr.bf16.gmra.mrb[72].mxu1 %v9809_v16  ;;  %5529 = vmatmul.mubr.bf16.gmra.mrb[8].mxu0 %v9809_v16  ;;  %v10122_v16 = vld [vmem:[%s8961_s8 + $0x200] ss:$8 sps:$4 sm:$0xff]  }
 0x2c8   : > { %7070 = vmatprep.mubr.msk.bf16.mxu1 %vm638_vm0, %v9812_v17  ;;  %7554 = vmatprep.mubr.msk.bf16.mxu0 %vm638_vm0, %v9812_v17  ;;  %v10125_v17 = vld [vmem:[%s8961_s8 + $0x214] ss:$8 sps:$4 sm:$0xff]  }
 0x2cf   : > { %2141 = vmatmul.mubr.bf16.gmra.mrb[76].mxu1 %v9825_v18  ;;  %5537 = vmatmul.mubr.bf16.gmra.mrb[12].mxu0 %v9825_v18  ;;  %v10134_v18 = vld [vmem:[%s8961_s8 + $0x210] ss:$8 sps:$4 sm:$0xff]  }
 0x2d0   : > { %7071 = vmatprep.mubr.msk.bf16.mxu1 %vm638_vm0, %v10065_v7  ;;  %7555 = vmatprep.mubr.msk.bf16.mxu0 %vm638_vm0, %v10065_v7 }
 0x2d7   : > { %2149 = vmatmul.mubr.bf16.gmra.mrb[80].mxu1 %v10074_v1  ;;  %5545 = vmatmul.mubr.bf16.gmra.mrb[16].mxu0 %v10074_v1 }
 0x2d8   : > { %7072 = vmatprep.mubr.msk.bf16.mxu1 %vm638_vm0, %v10077_v57  ;;  %7556 = vmatprep.mubr.msk.bf16.mxu0 %vm638_vm0, %v10077_v57 }
 0x2df   : > { %2157 = vmatmul.mubr.bf16.gmra.mrb[84].mxu1 %v10086_v12  ;;  %5553 = vmatmul.mubr.bf16.gmra.mrb[20].mxu0 %v10086_v12 }
 0x2e0   : > { %7073 = vmatprep.mubr.msk.bf16.mxu1 %vm638_vm0, %v10089_v8  ;;  %7557 = vmatprep.mubr.msk.bf16.mxu0 %vm638_vm0, %v10089_v8 }
 0x2e7   : > { %2165 = vmatmul.mubr.bf16.gmra.mrb[88].mxu1 %v10098_v37  ;;  %5561 = vmatmul.mubr.bf16.gmra.mrb[24].mxu0 %v10098_v37 }
 0x2e8   : > { %7074 = vmatprep.mubr.msk.bf16.mxu1 %vm638_vm0, %v10101_v13  ;;  %7558 = vmatprep.mubr.msk.bf16.mxu0 %vm638_vm0, %v10101_v13 }
 0x2ef   : > { %2173 = vmatmul.mubr.bf16.gmra.mrb[92].mxu1 %v10110_v15  ;;  %5569 = vmatmul.mubr.bf16.gmra.mrb[28].mxu0 %v10110_v15 }
 0x2f0   : > { %7075 = vmatprep.mubr.msk.bf16.mxu1 %vm638_vm0, %v10113_v42  ;;  %7559 = vmatprep.mubr.msk.bf16.mxu0 %vm638_vm0, %v10113_v42 }
 0x2f7   : > { %2181 = vmatmul.mubr.bf16.gmra.mrb[96].mxu1 %v10122_v16  ;;  %5577 = vmatmul.mubr.bf16.gmra.mrb[32].mxu0 %v10122_v16 }
 0x2f8   : > { %7076 = vmatprep.mubr.msk.bf16.mxu1 %vm638_vm0, %v10125_v17  ;;  %7560 = vmatprep.mubr.msk.bf16.mxu0 %vm638_vm0, %v10125_v17 }
 0x2ff   : > { %2189 = vmatmul.mubr.bf16.gmra.mrb[100].mxu1 %v10134_v18  ;;  %5585 = vmatmul.mubr.bf16.gmra.mrb[36].mxu0 %v10134_v18 }
 0x300   : > { %7077 = vmatprep.mubr.msk.bf16.mxu1 %vm638_vm0, %v10137_v20  ;;  %7561 = vmatprep.mubr.msk.bf16.mxu0 %vm638_vm0, %v10137_v20 }
 0x307   : > { %2197 = vmatmul.mubr.bf16.gmra.mrb[104].mxu1 %v10146_v21  ;;  %5593 = vmatmul.mubr.bf16.gmra.mrb[40].mxu0 %v10146_v21 }
 0x308   : > { %7078 = vmatprep.mubr.msk.bf16.mxu1 %vm638_vm0, %v10149_v22  ;;  %7562 = vmatprep.mubr.msk.bf16.mxu0 %vm638_vm0, %v10149_v22 }
 0x30a   : > { %v10157_v23 = vpop.f32.mrb[0].mxu1 }
 0x30b   : > { %v1992_v24 = vpop.f32.mrb[1].mxu1 }
 0x30c   : > { %v10162_v26 = vpop.f32.mrb[2].mxu1 }
 0x30d   : > { %v1995_v29 = vpop.f32.mrb[3].mxu1 }
 0x30e   : > { %v10274_v29 = vld [vmem:[%s8961_s8 + $0x2a0] ss:$8 sps:$4 sm:$0xff]  }
 0x30f   : > { %2205 = vmatmul.mubr.bf16.gmra.mrb[108].mxu1 %v10160_v25  ;;  %5601 = vmatmul.mubr.bf16.gmra.mrb[44].mxu0 %v10160_v25 }
 0x310   : > { %7079 = vmatprep.mubr.msk.bf16.mxu1 %vm638_vm0, %v10165_v28  ;;  %7563 = vmatprep.mubr.msk.bf16.mxu0 %vm638_vm0, %v10165_v28 }
 0x312   : > { %v10173_v32 = vpop.f32.mrb[4].mxu1 }
 0x313   : > { %v2000_v33 = vpop.f32.mrb[5].mxu1 }
 0x314   : > { %v10178_v43 = vpop.f32.mrb[6].mxu1 }
 0x315   : > { %v2003_v45 = vpop.f32.mrb[7].mxu1 }
 0x316   : > { %v10277_v45 = vld [vmem:[%s8961_s8 + $0x2b4] ss:$8 sps:$4 sm:$0xff]  }
 0x317   : > { %2213 = vmatmul.mubr.bf16.gmra.mrb[112].mxu1 %v10176_v34  ;;  %5609 = vmatmul.mubr.bf16.gmra.mrb[48].mxu0 %v10176_v34 }
 0x318   : > { %7080 = vmatprep.mubr.msk.bf16.mxu1 %vm638_vm0, %v10181_v44  ;;  %7564 = vmatprep.mubr.msk.bf16.mxu0 %vm638_vm0, %v10181_v44 }
 0x31a   : > { %v10189_v46 = vpop.f32.mrb[8].mxu1 }
 0x31b   : > { %v2008_v47 = vpop.f32.mrb[9].mxu1 }
 0x31c   : > { %v10194_v50 = vpop.f32.mrb[10].mxu1 }
 0x31d   : > { %v2011_v52 = vpop.f32.mrb[11].mxu1 }
 0x31e   : > { %v10290_v52 = vld [vmem:[%s8961_s8 + $0x2b0] ss:$8 sps:$4 sm:$0xff]  }
 0x31f   : > { %2221 = vmatmul.mubr.bf16.gmra.mrb[116].mxu1 %v10192_v49  ;;  %5617 = vmatmul.mubr.bf16.gmra.mrb[52].mxu0 %v10192_v49 }
 0x320   : > { %7081 = vmatprep.mubr.msk.bf16.mxu1 %vm638_vm0, %v10197_v51  ;;  %7565 = vmatprep.mubr.msk.bf16.mxu0 %vm638_vm0, %v10197_v51 }
 0x322   : > { %v10205_v53 = vpop.f32.mrb[12].mxu1 }
 0x323   : > { %v2016_v54 = vpop.f32.mrb[13].mxu1 }
 0x324   : > { %v10210_v56 = vpop.f32.mrb[14].mxu1 }
 0x325   : > { %v2019_v62 = vpop.f32.mrb[15].mxu1 }
 0x326   : > { %v8799_v62 = vld [vmem:[%s8961_s8 + $0x2c4] ss:$8 sps:$4 sm:$0xff]  }
 0x327   : > { %2229 = vmatmul.mubr.bf16.gmra.mrb[120].mxu1 %v10208_v55  ;;  %5625 = vmatmul.mubr.bf16.gmra.mrb[56].mxu0 %v10208_v55 }
 0x328   : > { %7082 = vmatprep.mubr.msk.bf16.mxu1 %vm638_vm0, %v10213_v61  ;;  %7566 = vmatprep.mubr.msk.bf16.mxu0 %vm638_vm0, %v10213_v61 }
 0x32a   : > { %v10221_v27 = vpop.f32.mrb[16].mxu1 }
 0x32b   : > { %v2024_v63 = vpop.f32.mrb[17].mxu1 }
 0x32c   : > { %v10226_v58 = vpop.f32.mrb[18].mxu1 }
 0x32d   : > { %v2027_v59 = vpop.f32.mrb[19].mxu1 }
 0x32e   : > { %v8801_v59 = vld [vmem:[%s8961_s8 + $0x2c0] ss:$8 sps:$4 sm:$0xff]  }
 0x32f   : > { %2237 = vmatmul.mubr.bf16.gmra.mrb[124].mxu1 %v10224_v41  ;;  %5633 = vmatmul.mubr.bf16.gmra.mrb[60].mxu0 %v10224_v41 }
 0x330   : > { %7192 = vmatprep.mubr.msk.bf16.mxu1 %vm638_vm0, %v10065_v7  ;;  %7567 = vmatprep.mubr.msk.bf16.mxu0 %vm638_vm0, %v10229_v4  ;;  %v10261_v7 = vld [vmem:[%s8961_s8 + $0x2a4] ss:$8 sps:$4 sm:$0xff]  }
 0x332   : > { %v10237_v6 = vpop.f32.mrb[20].mxu1 }
 0x333   : > { %v2032_v30 = vpop.f32.mrb[21].mxu1 }
 0x334   : > { %v10239_v31 = vpop.f32.mrb[22].mxu1 }
 0x335   : > { %v2035_v39 = vpop.f32.mrb[23].mxu1 }
 0x336   : > { %v8802_v39 = vld [vmem:[%s8961_s8 + $0x2d4] ss:$8 sps:$4 sm:$0xff]  }
 0x337   : > { %2998 = vmatmul.mubr.bf16.vlgmr.msra.gmra.mrb[64].mxu1 %v10074_v1  ;;  %5641 = vmatmul.mubr.bf16.gmra.mrb[64].mxu0 %v10242_v38 }
 0x338   : > { %7193 = vmatprep.mubr.msk.bf16.mxu1 %vm638_vm0, %v10077_v57  ;;  %7568 = vmatprep.mubr.msk.bf16.mxu0 %vm638_vm0, %v10245_v48 }
 0x33a   : > { %v10253_v0 = vpop.f32.mrb[24].mxu1 }
 0x33b   : > { %v2040_v11 = vpop.f32.mrb[25].mxu1 }
 0x33c   : > { %v10255_v60 = vpop.f32.mrb[26].mxu1 }
 0x33d   : > { %v2043_v9 = vpop.f32.mrb[27].mxu1 }
 0x33e   : > { %v8804_v9 = vld [vmem:[%s8961_s8 + $0x2d0] ss:$8 sps:$4 sm:$0xff]  }
 0x33f   : > { %3006 = vmatmul.mubr.bf16.gmra.mrb[68].mxu1 %v10086_v12  ;;  %5649 = vmatmul.mubr.bf16.gmra.mrb[68].mxu0 %v10258_v19 }
 0x340   : > { %7194 = vmatprep.mubr.msk.bf16.mxu1 %vm638_vm0, %v10089_v8  ;;  %7569 = vmatprep.mubr.msk.bf16.mxu0 %vm638_vm0, %v10261_v7 }
 0x342   : > { %v10269_v1 = vpop.f32.mrb[28].mxu1 }
 0x343   : > { %v2048_v57 = vpop.f32.mrb[29].mxu1 }
 0x344   : > { %v10271_v24 = vpop.f32.mrb[30].mxu1 }
 0x345   : > { %v2051_v33 = vpop.f32.mrb[31].mxu1 }
 0x346   : > { %v8805_v33 = vld [vmem:[%s8961_s8 + $0x2e4] ss:$8 sps:$4 sm:$0xff]  }
 0x347   : > { %3014 = vmatmul.mubr.bf16.gmra.mrb[72].mxu1 %v10098_v37  ;;  %5657 = vmatmul.mubr.bf16.gmra.mrb[72].mxu0 %v10274_v29 }
 0x348   : > { %7195 = vmatprep.mubr.msk.bf16.mxu1 %vm638_vm0, %v10101_v13  ;;  %7570 = vmatprep.mubr.msk.bf16.mxu0 %vm638_vm0, %v10277_v45 }
 0x34a   : > { %v10285_v12 = vpop.f32.mrb[32].mxu1 }
 0x34b   : > { %v2056_v8 = vpop.f32.mrb[33].mxu1 }
 0x34c   : > { %v10287_v47 = vpop.f32.mrb[34].mxu1 }
 0x34d   : > { %v2059_v54 = vpop.f32.mrb[35].mxu1 }
 0x34e   : > { %v8807_v54 = vld [vmem:[%s8961_s8 + $0x2e0] ss:$8 sps:$4 sm:$0xff]  }
 0x34f   : > { %3022 = vmatmul.mubr.bf16.gmra.mrb[76].mxu1 %v10110_v15  ;;  %5665 = vmatmul.mubr.bf16.gmra.mrb[76].mxu0 %v10290_v52 }
 0x350   : > { %7196 = vmatprep.mubr.msk.bf16.mxu1 %vm638_vm0, %v10113_v42  ;;  %7571 = vmatprep.mubr.msk.bf16.mxu0 %vm638_vm0, %v8799_v62 }
 0x352   : > { %v10298_v37 = vpop.f32.mrb[36].mxu1 }
 0x353   : > { %v2064_v13 = vpop.f32.mrb[37].mxu1 }
 0x354   : > { %v10300_v63 = vpop.f32.mrb[38].mxu1  ;;  %v8808_v13 = vld [vmem:[%s8961_s8 + $0x2f4] ss:$8 sps:$4 sm:$0xff]  }
 0x355   : > { %v2067_v30 = vpop.f32.mrb[39].mxu1 }
 0x356   : > { %v8810_v30 = vld [vmem:[%s8961_s8 + $0x2f0] ss:$8 sps:$4 sm:$0xff]  }
 0x357   : > { %3030 = vmatmul.mubr.bf16.gmra.mrb[80].mxu1 %v10122_v16  ;;  %5673 = vmatmul.mubr.bf16.gmra.mrb[80].mxu0 %v8801_v59 }
 0x358   : > { %7197 = vmatprep.mubr.msk.bf16.mxu1 %vm638_vm0, %v10125_v17  ;;  %7572 = vmatprep.mubr.msk.bf16.mxu0 %vm638_vm0, %v8802_v39 }
 0x35a   : > { %v10308_v15 = vpop.f32.mrb[40].mxu1 }
 0x35b   : > { %v2072_v42 = vpop.f32.mrb[41].mxu1 }
 0x35c   : > { %v10310_v11 = vpop.f32.mrb[42].mxu1 }
 0x35d   : > { %v2075_v57 = vpop.f32.mrb[43].mxu1 }
 0x35f   : > { %3038 = vmatmul.mubr.bf16.gmra.mrb[84].mxu1 %v10134_v18  ;;  %5681 = vmatmul.mubr.bf16.gmra.mrb[84].mxu0 %v8804_v9 }
 0x360   : > { %7198 = vmatprep.mubr.msk.bf16.mxu1 %vm638_vm0, %v10137_v20  ;;  %7573 = vmatprep.mubr.msk.bf16.mxu0 %vm638_vm0, %v8805_v33  ;;  %v8811_v33 = vld [vmem:[%s8961_s8 + $0x344] ss:$8 sps:$4 sm:$0xff]  }
 0x362   : > { %v10318_v16 = vpop.f32.mrb[44].mxu1 }
 0x363   : > { %v2080_v17 = vpop.f32.mrb[45].mxu1 }
 0x364   : > { %v10320_v8 = vpop.f32.mrb[46].mxu1 }
 0x365   : > { %v2083_v62 = vpop.f32.mrb[47].mxu1 }
 0x367   : > { %3046 = vmatmul.mubr.bf16.gmra.mrb[88].mxu1 %v10146_v21  ;;  %5689 = vmatmul.mubr.bf16.gmra.mrb[88].mxu0 %v8807_v54  ;;  %v8814_v54 = vld [vmem:[%s8961_s8 + $0x354] ss:$8 sps:$4 sm:$0xff]  }
 0x368   : > { %7199 = vmatprep.mubr.msk.bf16.mxu1 %vm638_vm0, %v10149_v22  ;;  %7574 = vmatprep.mubr.msk.bf16.mxu0 %vm638_vm0, %v8808_v13  ;;  %v8816_v13 = vld [vmem:[%s8961_s8 + $0x350] ss:$8 sps:$4 sm:$0xff]  }
 0x36a   : > { %v10328_v18 = vpop.f32.mrb[48].mxu1 }
 0x36b   : > { %v2088_v20 = vpop.f32.mrb[49].mxu1 }
 0x36c   : > { %v10330_v59 = vpop.f32.mrb[50].mxu1 }
 0x36d   : > { %v2091_v39 = vpop.f32.mrb[51].mxu1 }
 0x36f   : > { %3054 = vmatmul.mubr.bf16.gmra.mrb[92].mxu1 %v10160_v25  ;;  %5697 = vmatmul.mubr.bf16.gmra.mrb[92].mxu0 %v8810_v30 }
 0x370   : > { %7200 = vmatprep.mubr.msk.bf16.mxu1 %vm638_vm0, %v10165_v28  ;;  %7575 = vmatprep.mubr.msk.bf16.mxu0 %vm638_vm0, %v9994_v3 }
 0x372   : > { %v10338_v21 = vpop.f32.mrb[52].mxu1 }
 0x373   : > { %v2096_v22 = vpop.f32.mrb[53].mxu1 }
 0x374   : > { %v10340_v42 = vpop.f32.mrb[54].mxu1  ;;  %v8819_v22 = vld [vmem:[%s8961_s8 + $0x360] ss:$8 sps:$4 sm:$0xff]  }
 0x375   : > { %v2099_v9 = vpop.f32.mrb[55].mxu1 }
 0x377   : > { %3062 = vmatmul.mubr.bf16.gmra.mrb[96].mxu1 %v10176_v34  ;;  %5705 = vmatmul.mubr.bf16.gmra.mrb[96].mxu0 %v10002_v2 }
 0x378   : > { %7201 = vmatprep.mubr.msk.bf16.mxu1 %vm638_vm0, %v10181_v44  ;;  %7576 = vmatprep.mubr.msk.bf16.mxu0 %vm638_vm0, %v10005_v5 }
 0x37a   : > { %v10348_v25 = vpop.f32.mrb[56].mxu1 }
 0x37b   : > { %v2104_v28 = vpop.f32.mrb[57].mxu1 }
 0x37c   : > { %v10350_v3 = vpop.f32.mrb[58].mxu1  ;;  %v8820_v28 = vld [vmem:[%s8961_s8 + $0x374] ss:$8 sps:$4 sm:$0xff]  }
 0x37d   : > { %v2107_v57 = vpop.f32.mrb[59].mxu1 }
 0x37f   : > { %3070 = vmatmul.mubr.bf16.gmra.mrb[100].mxu1 %v10192_v49  ;;  %5713 = vmatmul.mubr.bf16.gmra.mrb[100].mxu0 %v10014_v35 }
 0x380   : > { %7202 = vmatprep.mubr.msk.bf16.mxu1 %vm638_vm0, %v10197_v51  ;;  %7577 = vmatprep.mubr.msk.bf16.mxu0 %vm638_vm0, %v10017_v36 }
 0x382   : > { %v10358_v2 = vpop.f32.mrb[60].mxu1 }
 0x383   : > { %v2112_v5 = vpop.f32.mrb[61].mxu1 }
 0x384   : > { %v10360_v34 = vpop.f32.mrb[62].mxu1  ;;  %v8822_v5 = vld [vmem:[%s8961_s8 + $0x370] ss:$8 sps:$4 sm:$0xff]  }
 0x385   : > { %v2115_v44 = vpop.f32.mrb[63].mxu1 }
 0x387   : > { %3078 = vmatmul.mubr.bf16.gmra.mrb[104].mxu1 %v10208_v55  ;;  %5721 = vmatmul.mubr.bf16.gmra.mrb[104].mxu0 %v10026_v10 }
 0x388   : > { %7203 = vmatprep.mubr.msk.bf16.mxu1 %vm638_vm0, %v10213_v61  ;;  %7578 = vmatprep.mubr.msk.bf16.mxu0 %vm638_vm0, %v10029_v14  ;;  %v8813_v61 = vld [vmem:[%s8961_s8 + $0x340] ss:$8 sps:$4 sm:$0xff]  }
 0x38a   : > { %v5514_v35 = vpop.f32.mrb[0].mxu0 }
 0x38b   : > { %v10369_v36 = vadd.f32 %v5514_v35, %v10157_v23  ;;  %v5516_v49 = vpop.f32.mrb[1].mxu0 }
 0x38c   : > { %v5517_v51 = vpop.f32.mrb[2].mxu0 }
 0x38d   : > { %v10373_v17 = vadd.f32 %v5517_v51, %v10162_v26  ;;  %v5519_v55 = vpop.f32.mrb[3].mxu0 }
 0x38f   : > { %3086 = vmatmul.mubr.bf16.gmra.mrb[108].mxu1 %v10224_v41  ;;  %5729 = vmatmul.mubr.bf16.gmra.mrb[108].mxu0 %v10038_v40 }
 0x390   : > { %7204 = vmatprep.mubr.msk.bf16.mxu1 %vm638_vm0, %v10229_v4  ;;  %7579 = vmatprep.mubr.msk.bf16.mxu0 %vm638_vm0, %v8811_v33 }
 0x392   : > { %v5522_v10 = vpop.f32.mrb[4].mxu0 }
 0x393   : > { %v10381_v14 = vadd.f32 %v5522_v10, %v10173_v32  ;;  %v5524_v23 = vpop.f32.mrb[5].mxu0 }
 0x394   : > { %v5525_v26 = vpop.f32.mrb[6].mxu0 }
 0x395   : > { %v10386_v62 = vadd.f32 %v5525_v26, %v10178_v43  ;;  %v5527_v41 = vpop.f32.mrb[7].mxu0  ;;  %v8817_v43 = vld [vmem:[%s8961_s8 + $0x364] ss:$8 sps:$4 sm:$0xff]   ;;  %s7649_s8 = sshll.u32 %s12023_s9, 8 }
 0x396   : > { %s11422_s14 = scalar_lea.vmem %s11759_s2, %s7649_s8 }
 0x397   : > { %3094 = vmatmul.mubr.bf16.gmra.mrb[112].mxu1 %v10242_v38  ;;  %5737 = vmatmul.mubr.bf16.gmra.mrb[112].mxu0 %v8813_v61 }
 0x398   : > { %7205 = vmatprep.mubr.msk.bf16.mxu1 %vm638_vm0, %v10245_v48  ;;  %7580 = vmatprep.mubr.msk.bf16.mxu0 %vm638_vm0, %v8814_v54 }
 0x39a   : > { %v5530_v40 = vpop.f32.mrb[8].mxu0 }
 0x39b   : > { %v10393_v32 = vadd.f32 %v5530_v40, %v10189_v46  ;;  %v5532_v4 = vpop.f32.mrb[9].mxu0 }
 0x39c   : > { %v5533_v20 = vpop.f32.mrb[10].mxu0  ;;  %v5834_v4 = vsel %vm5833_vm3, %v10369_v36, 0.0 }
 0x39d   : > { %v10398_v30 = vadd.f32 %v5533_v20, %v10194_v50  ;;  %v5535_v38 = vpop.f32.mrb[11].mxu0 }
 0x39f   : > { %3102 = vmatmul.mubr.bf16.gmra.mrb[116].mxu1 %v10258_v19  ;;  %5745 = vmatmul.mubr.bf16.gmra.mrb[116].mxu0 %v8816_v13 }
 0x3a0   : > { %7206 = vmatprep.mubr.msk.bf16.mxu1 %vm638_vm0, %v10261_v7  ;;  %7581 = vmatprep.mubr.msk.bf16.mxu0 %vm638_vm0, %v8817_v43  ;;  %v5839_v43 = vsel %vm5833_vm3, %v10386_v62, 0.0 }
 0x3a2   : > { %v5538_v46 = vpop.f32.mrb[12].mxu0 }
 0x3a3   : > { %v10405_v48 = vadd.f32 %v5538_v46, %v10205_v53  ;;  %v5540_v39 = vpop.f32.mrb[13].mxu0 }
 0x3a4   : > { %v5541_v9 = vpop.f32.mrb[14].mxu0 }
 0x3a5   : > { %v10410_v50 = vadd.f32 %v5541_v9, %v10210_v56  ;;  %v5543_v57 = vpop.f32.mrb[15].mxu0 }
 0x3a7   : > { %3110 = vmatmul.mubr.bf16.gmra.mrb[120].mxu1 %v10274_v29  ;;  %5753 = vmatmul.mubr.bf16.gmra.mrb[120].mxu0 %v8819_v22 }
 0x3a8   : > { %7207 = vmatprep.mubr.msk.bf16.mxu1 %vm638_vm0, %v10277_v45  ;;  %7582 = vmatprep.mubr.msk.bf16.mxu0 %vm638_vm0, %v8820_v28 }
 0x3aa   : > { %v5546_v19 = vpop.f32.mrb[16].mxu0 }
 0x3ab   : > { %v10417_v53 = vadd.f32 %v5546_v19, %v10221_v27  ;;  %v5548_v7 = vpop.f32.mrb[17].mxu0  ;;  %v5843_v19 = vsel %vm5833_vm3, %v10398_v30, 0.0 }
 0x3ac   : > { %v5549_v44 = vpop.f32.mrb[18].mxu0 }
 0x3ad   : > { %v10421_v35 = vadd.f32 %v5549_v44, %v10226_v58  ;;  %v5551_v56 = vpop.f32.mrb[19].mxu0 }
 0x3af   : > { %3118 = vmatmul.mubr.bf16.gmra.mrb[124].mxu1 %v10290_v52  ;;  %5761 = vmatmul.mubr.bf16.gmra.mrb[124].mxu0 %v8822_v5  ;;  %v5845_v5 = vsel %vm5833_vm3, %v10405_v48, 0.0 }
 0x3b2   : > { %v5554_v29 = vpop.f32.mrb[20].mxu0 }
 0x3b3   : > { %v10425_v49 = vadd.f32 %v5554_v29, %v10237_v6  ;;  %v5556_v45 = vpop.f32.mrb[21].mxu0 }
 0x3b4   : > { %v5557_v51 = vpop.f32.mrb[22].mxu0 }
 0x3b5   : > { %v10428_v33 = vadd.f32 %v5557_v51, %v10239_v31  ;;  %v5559_v27 = vpop.f32.mrb[23].mxu0  ;;  %v5835_v31 = vsel %vm5833_vm3, %v10373_v17, 0.0 }
 0x3b6   : > { %v5836_v13 = vadd.f32 %v5835_v31, %v5834_v4  ;;  %v5847_v27 = vsel %vm5833_vm3, %v10410_v50, 0.0 }
 0x3ba   : > { %v5562_v55 = vpop.f32.mrb[24].mxu0 }
 0x3bb   : > { %v10431_v10 = vadd.f32 %v5562_v55, %v10253_v0  ;;  %v5564_v58 = vpop.f32.mrb[25].mxu0  ;;  %v5849_v55 = vsel %vm5833_vm3, %v10417_v53, 0.0 }
 0x3bc   : > { %v5565_v23 = vpop.f32.mrb[26].mxu0 }
 0x3bd   : > { %v10434_v61 = vadd.f32 %v5565_v23, %v10255_v60  ;;  %v5567_v52 = vpop.f32.mrb[27].mxu0  ;;  %v5837_v60 = vsel %vm5833_vm3, %v10381_v14, 0.0 }
 0x3be   : > { %v5838_v20 = vadd.f32 %v5837_v60, %v5836_v13 }
 0x3c0   : > { %v5840_v28 = vadd.f32 %v5839_v43, %v5838_v20 }
 0x3c2   : > { %v5570_v26 = vpop.f32.mrb[28].mxu0 }
 0x3c3   : > { %v10437_v6 = vadd.f32 %v5570_v26, %v10269_v1  ;;  %v5572_v54 = vpop.f32.mrb[29].mxu0 }
 0x3c4   : > { %v5573_v41 = vpop.f32.mrb[30].mxu0 }
 0x3c5   : > { %v10442_v40 = vadd.f32 %v5573_v41, %v10271_v24  ;;  %v5575_v0 = vpop.f32.mrb[31].mxu0  ;;  %v5841_v24 = vsel %vm5833_vm3, %v10393_v32, 0.0 }
 0x3c6   : > { %v5842_v57 = vadd.f32 %v5841_v24, %v5840_v28  ;;  %v5853_v0 = vsel %vm5833_vm3, %v10425_v49, 0.0  ;;  %v5859_v28 = vsel %vm5833_vm3, %v10434_v61, 0.0 }
 0x3c8   : > { %v5844_v56 = vadd.f32 %v5843_v19, %v5842_v57  ;;  %v5861_v19 = vsel %vm5833_vm3, %v10437_v6, 0.0 }
 0x3ca   : > { %v5578_v1 = vpop.f32.mrb[32].mxu0  ;;  %v5846_v51 = vadd.f32 %v5845_v5, %v5844_v56 }
 0x3cb   : > { %v10451_v38 = vadd.f32 %v5578_v1, %v10285_v12  ;;  %v5580_v46 = vpop.f32.mrb[33].mxu0 }
 0x3cc   : > { %v5581_v39 = vpop.f32.mrb[34].mxu0  ;;  %v5848_v58 = vadd.f32 %v5847_v27, %v5846_v51  ;;  %v5857_v46 = vsel %vm5833_vm3, %v10431_v10, 0.0 }
 0x3cd   : > { %v10456_v22 = vadd.f32 %v5581_v39, %v10287_v47  ;;  %v5583_v9 = vpop.f32.mrb[35].mxu0  ;;  %v5865_v51 = vsel %vm5833_vm3, %v10451_v38, 0.0 }
 0x3ce   : > { %v5850_v26 = vadd.f32 %v5849_v55, %v5848_v58 }
 0x3d2   : > { %v5586_v7 = vpop.f32.mrb[36].mxu0 }
 0x3d3   : > { %v10463_v12 = vadd.f32 %v5586_v7, %v10298_v37  ;;  %v5588_v44 = vpop.f32.mrb[37].mxu0 }
 0x3d4   : > { %v5589_v29 = vpop.f32.mrb[38].mxu0 }
 0x3d5   : > { %v10466_v45 = vadd.f32 %v5589_v29, %v10300_v63  ;;  %v5591_v47 = vpop.f32.mrb[39].mxu0  ;;  %v5851_v63 = vsel %vm5833_vm3, %v10421_v35, 0.0 }
 0x3d6   : > { %v5852_v4 = vadd.f32 %v5851_v63, %v5850_v26  ;;  %v5863_v47 = vsel %vm5833_vm3, %v10442_v40, 0.0  ;;  %v5869_v63 = vsel %vm5833_vm3, %v10463_v12, 0.0 }
 0x3d8   : > { %v5854_v60 = vadd.f32 %v5853_v0, %v5852_v4 }
 0x3da   : > { %v5594_v23 = vpop.f32.mrb[40].mxu0 }
 0x3db   : > { %v10473_v52 = vadd.f32 %v5594_v23, %v10308_v15  ;;  %v5596_v37 = vpop.f32.mrb[41].mxu0  ;;  %v5855_v15 = vsel %vm5833_vm3, %v10428_v33, 0.0 }
 0x3dc   : > { %v5597_v54 = vpop.f32.mrb[42].mxu0  ;;  %v5856_v24 = vadd.f32 %v5855_v15, %v5854_v60 }
 0x3dd   : > { %v10478_v41 = vadd.f32 %v5597_v54, %v10310_v11  ;;  %v5599_v31 = vpop.f32.mrb[43].mxu0 }
 0x3de   : > { %v5858_v9 = vadd.f32 %v5857_v46, %v5856_v24 }
 0x3df   : > { %v5875_v24 = vsel %vm5833_vm3, %v10478_v41, 0.0 }
 0x3e0   : > { %v5860_v5 = vadd.f32 %v5859_v28, %v5858_v9 }
 0x3e2   : > { %v5602_v13 = vpop.f32.mrb[44].mxu0  ;;  %v5862_v29 = vadd.f32 %v5861_v19, %v5860_v5 }
 0x3e3   : > { %v10485_v20 = vadd.f32 %v5602_v13, %v10318_v16  ;;  %v5604_v1 = vpop.f32.mrb[45].mxu0 }
 0x3e4   : > { %v5605_v43 = vpop.f32.mrb[46].mxu0  ;;  %v5864_v27 = vadd.f32 %v5863_v47, %v5862_v29  ;;  %v5873_v1 = vsel %vm5833_vm3, %v10473_v52, 0.0 }
 0x3e5   : > { %v10490_v11 = vadd.f32 %v5605_v43, %v10320_v8  ;;  %v5607_v39 = vpop.f32.mrb[47].mxu0  ;;  %v5877_v28 = vsel %vm5833_vm3, %v10485_v20, 0.0 }
 0x3e6   : > { %v5866_v23 = vadd.f32 %v5865_v51, %v5864_v27 }
 0x3ea   : > { %v5610_v57 = vpop.f32.mrb[48].mxu0 }
 0x3eb   : > { %v10497_v16 = vadd.f32 %v5610_v57, %v10328_v18  ;;  %v5612_v7 = vpop.f32.mrb[49].mxu0 }
 0x3ec   : > { %v5613_v44 = vpop.f32.mrb[50].mxu0 }
 0x3ed   : > { %v10500_v56 = vadd.f32 %v5613_v44, %v10330_v59  ;;  %v5615_v8 = vpop.f32.mrb[51].mxu0  ;;  %v5867_v59 = vsel %vm5833_vm3, %v10456_v22, 0.0  ;;  %v5881_v29 = vsel %vm5833_vm3, %v10497_v16, 0.0 }
 0x3ee   : > { %v5868_v31 = vadd.f32 %v5867_v59, %v5866_v23  ;;  %v5879_v8 = vsel %vm5833_vm3, %v10490_v11, 0.0 }
 0x3f0   : > { %v5870_v0 = vadd.f32 %v5869_v63, %v5868_v31 }
 0x3f2   : > { %v5618_v55 = vpop.f32.mrb[52].mxu0 }
 0x3f3   : > { %v10507_v58 = vadd.f32 %v5618_v55, %v10338_v21  ;;  %v5620_v18 = vpop.f32.mrb[53].mxu0  ;;  %v5871_v21 = vsel %vm5833_vm3, %v10466_v45, 0.0 }
 0x3f4   : > { %v5621_v37 = vpop.f32.mrb[54].mxu0  ;;  %v5872_v46 = vadd.f32 %v5871_v21, %v5870_v0 }
 0x3f5   : > { %v10512_v26 = vadd.f32 %v5621_v37, %v10340_v42  ;;  %v5623_v54 = vpop.f32.mrb[55].mxu0  ;;  %v5885_v0 = vsel %vm5833_vm3, %v10507_v58, 0.0 }
 0x3f6   : > { %v5874_v39 = vadd.f32 %v5873_v1, %v5872_v46  ;;  %v5883_v54 = vsel %vm5833_vm3, %v10500_v56, 0.0 }
 0x3f8   : > { %v5876_v19 = vadd.f32 %v5875_v24, %v5874_v39 }
 0x3fa   : > { %v5626_v4 = vpop.f32.mrb[56].mxu0  ;;  %v5878_v44 = vadd.f32 %v5877_v28, %v5876_v19 }
 0x3fb   : > { %v10519_v60 = vadd.f32 %v5626_v4, %v10348_v25  ;;  %v5628_v13 = vpop.f32.mrb[57].mxu0 }
 0x3fc   : > { %v5629_v15 = vpop.f32.mrb[58].mxu0  ;;  %v5880_v51 = vadd.f32 %v5879_v8, %v5878_v44 }
 0x3fd   : > { %v10524_v42 = vadd.f32 %v5629_v15, %v10350_v3  ;;  %v5631_v43 = vpop.f32.mrb[59].mxu0 }
 0x3fe   : > { %v5882_v37 = vadd.f32 %v5881_v29, %v5880_v51  ;;  %v5887_v43 = vsel %vm5833_vm3, %v10512_v26, 0.0 }
 0x3ff   : > { %v5891_v8 = vsel %vm5833_vm3, %v10524_v42, 0.0 }
 0x400   : > { %v5884_v4 = vadd.f32 %v5883_v54, %v5882_v37 }
 0x402   : > { %v5634_v9 = vpop.f32.mrb[60].mxu0  ;;  %v5886_v13 = vadd.f32 %v5885_v0, %v5884_v4 }
 0x403   : > { %v10531_v25 = vadd.f32 %v5634_v9, %v10358_v2  ;;  %v5636_v57 = vpop.f32.mrb[61].mxu0 }
 0x404   : > { %v5637_v7 = vpop.f32.mrb[62].mxu0  ;;  %v5889_v57 = vsel %vm5833_vm3, %v10519_v60, 0.0 }
 0x405   : > { %v10534_v5 = vadd.f32 %v5637_v7, %v10360_v34  ;;  %v5639_v3 = vpop.f32.mrb[63].mxu0 }
 0x406   : > { %v5888_v3 = vadd.f32 %v5887_v43, %v5886_v13 }
 0x407   : > { %v5895_v4 = vsel %vm5833_vm3, %v10534_v5, 0.0 }
 0x408   : > { %v5890_v44 = vadd.f32 %v5889_v57, %v5888_v3 }
 0x40a   : > { %v2999_v47 = vpop.f32.mrb[64].mxu1  ;;  %v5642_v27 = vpop.f32.mrb[64].mxu0  ;;  %v5892_v37 = vadd.f32 %v5891_v8, %v5890_v44 }
 0x40b   : > { %v3001_v55 = vpop.f32.mrb[65].mxu1  ;;  %v10540_v2 = vadd.f32 %v5642_v27, %v2999_v47  ;;  %v5644_v18 = vpop.f32.mrb[65].mxu0  ;;  %v5893_v27 = vsel %vm5833_vm3, %v10531_v25, 0.0 }
 0x40c   : > { %v3002_v23 = vpop.f32.mrb[66].mxu1  ;;  %v5645_v59 = vpop.f32.mrb[66].mxu0  ;;  %v5894_v0 = vadd.f32 %v5893_v27, %v5892_v37 }
 0x40d   : > { %v3004_v34 = vpop.f32.mrb[67].mxu1  ;;  %v10544_v63 = vadd.f32 %v5645_v59, %v3002_v23  ;;  %v5647_v31 = vpop.f32.mrb[67].mxu0 }
 0x40f   : > { %v5899_v3 = vsel %vm5833_vm3, %v10544_v63, 0.0 }
 0x412   : > { %v3007_v21 = vpop.f32.mrb[68].mxu1  ;;  %v5650_v15 = vpop.f32.mrb[68].mxu0 }
 0x413   : > { %v3009_v1 = vpop.f32.mrb[69].mxu1  ;;  %v10550_v46 = vadd.f32 %v5650_v15, %v3007_v21  ;;  %v5652_v39 = vpop.f32.mrb[69].mxu0  ;;  %v5897_v21 = vsel %vm5833_vm3, %v10540_v2, 0.0  ;;  %v5896_v15 = vadd.f32 %v5895_v4, %v5894_v0 }
 0x414   : > { %v3010_v24 = vpop.f32.mrb[70].mxu1  ;;  %v5653_v9 = vpop.f32.mrb[70].mxu0 }
 0x415   : > { %v3012_v28 = vpop.f32.mrb[71].mxu1  ;;  %v10554_v19 = vadd.f32 %v5653_v9, %v3010_v24  ;;  %v5655_v7 = vpop.f32.mrb[71].mxu0 }
 0x416   : > { %v5898_v28 = vadd.f32 %v5897_v21, %v5896_v15 }
 0x417   : > { %11841 = vst [vmem:[#allocation2_spill] sm:$0xff] %v10554_v19  ;;  %v5903_v37 = vsel %vm5833_vm3, %v10554_v19, 0.0 }
 0x41a   : > { %v3015_v29 = vpop.f32.mrb[72].mxu1  ;;  %v5658_v47 = vpop.f32.mrb[72].mxu0 }
 0x41b   : > { %v3017_v51 = vpop.f32.mrb[73].mxu1  ;;  %v10560_v55 = vadd.f32 %v5658_v47, %v3015_v29  ;;  %v5660_v18 = vpop.f32.mrb[73].mxu0  ;;  %v5901_v29 = vsel %vm5833_vm3, %v10550_v46, 0.0  ;;  %v5900_v47 = vadd.f32 %v5899_v3, %v5898_v28 }
 0x41c   : > { %v3018_v23 = vpop.f32.mrb[74].mxu1  ;;  %v5661_v59 = vpop.f32.mrb[74].mxu0 }
 0x41d   : > { %11842 = vst [vmem:[#allocation3_spill] sm:$0xff] %v10560_v55  ;;  %v3020_v34 = vpop.f32.mrb[75].mxu1  ;;  %v10562_v54 = vadd.f32 %v5661_v59, %v3018_v23  ;;  %v5663_v31 = vpop.f32.mrb[75].mxu0  ;;  %v5902_v27 = vadd.f32 %v5901_v29, %v5900_v47  ;;  %v5905_v21 = vsel %vm5833_vm3, %v10560_v55, 0.0 }
 0x41f   : > { %11843 = vst [vmem:[#allocation4_spill] sm:$0xff] %v10562_v54 }
 0x422   : > { %v3023_v13 = vpop.f32.mrb[76].mxu1  ;;  %v5666_v1 = vpop.f32.mrb[76].mxu0 }
 0x423   : > { %v3025_v43 = vpop.f32.mrb[77].mxu1  ;;  %v10568_v39 = vadd.f32 %v5666_v1, %v3023_v13  ;;  %v5668_v24 = vpop.f32.mrb[77].mxu0  ;;  %v5904_v1 = vadd.f32 %v5903_v37, %v5902_v27 }
 0x424   : > { %v3026_v9 = vpop.f32.mrb[78].mxu1  ;;  %v5669_v57 = vpop.f32.mrb[78].mxu0  ;;  %v5907_v24 = vsel %vm5833_vm3, %v10562_v54, 0.0 }
 0x425   : > { %11844 = vst [vmem:[#allocation5_spill] sm:$0xff] %v10568_v39  ;;  %v3028_v7 = vpop.f32.mrb[79].mxu1  ;;  %v10572_v44 = vadd.f32 %v5669_v57, %v3026_v9  ;;  %v5671_v8 = vpop.f32.mrb[79].mxu0  ;;  %v5906_v43 = vadd.f32 %v5905_v21, %v5904_v1 }
 0x426   : > { %v5909_v7 = vsel %vm5833_vm3, %v10568_v39, 0.0 }
 0x427   : > { %11845 = vst [vmem:[#allocation6_spill] sm:$0xff] %v10572_v44  ;;  %v5908_v47 = vadd.f32 %v5907_v24, %v5906_v43 }
 0x429   : > { %v5910_v37 = vadd.f32 %v5909_v7, %v5908_v47 }
 0x42a   : > { %v3031_v51 = vpop.f32.mrb[80].mxu1  ;;  %v5674_v18 = vpop.f32.mrb[80].mxu0 }
 0x42b   : > { %v3033_v23 = vpop.f32.mrb[81].mxu1  ;;  %v10578_v59 = vadd.f32 %v5674_v18, %v3031_v51  ;;  %v5676_v34 = vpop.f32.mrb[81].mxu0 }
 0x42c   : > { %v3034_v31 = vpop.f32.mrb[82].mxu1  ;;  %v5677_v0 = vpop.f32.mrb[82].mxu0  ;;  %v5911_v34 = vsel %vm5833_vm3, %v10572_v44, 0.0 }
 0x42d   : > { %11846 = vst [vmem:[#allocation7_spill] sm:$0xff] %v10578_v59  ;;  %v3036_v4 = vpop.f32.mrb[83].mxu1  ;;  %v10582_v13 = vadd.f32 %v5677_v0, %v3034_v31  ;;  %v5679_v15 = vpop.f32.mrb[83].mxu0  ;;  %v5913_v31 = vsel %vm5833_vm3, %v10578_v59, 0.0 }
 0x42e   : > { %v5912_v4 = vadd.f32 %v5911_v34, %v5910_v37 }
 0x42f   : > { %11847 = vst [vmem:[#allocation8_spill] sm:$0xff] %v10582_v13  ;;  %v5915_v7 = vsel %vm5833_vm3, %v10582_v13, 0.0 }
 0x430   : > { %v5914_v24 = vadd.f32 %v5913_v31, %v5912_v4 }
 0x432   : > { %v3039_v9 = vpop.f32.mrb[84].mxu1  ;;  %v5682_v28 = vpop.f32.mrb[84].mxu0 }
 0x433   : > { %v3041_v57 = vpop.f32.mrb[85].mxu1  ;;  %v10588_v3 = vadd.f32 %v5682_v28, %v3039_v9  ;;  %v5684_v8 = vpop.f32.mrb[85].mxu0 }
 0x434   : > { %v3042_v29 = vpop.f32.mrb[86].mxu1  ;;  %v5685_v51 = vpop.f32.mrb[86].mxu0 }
 0x435   : > { %11848 = vst [vmem:[#allocation9_spill] sm:$0xff] %v10588_v3  ;;  %v3044_v18 = vpop.f32.mrb[87].mxu1  ;;  %v10590_v23 = vadd.f32 %v5685_v51, %v3042_v29  ;;  %v5687_v27 = vpop.f32.mrb[87].mxu0  ;;  %v5917_v47 = vsel %vm5833_vm3, %v10588_v3, 0.0  ;;  %v5916_v51 = vadd.f32 %v5915_v7, %v5914_v24 }
 0x437   : > { %11849 = vst [vmem:[#allocation10_spill] sm:$0xff] %v10590_v23  ;;  %v5918_v27 = vadd.f32 %v5917_v47, %v5916_v51 }
 0x43a   : > { %v3047_v0 = vpop.f32.mrb[88].mxu1  ;;  %v5690_v21 = vpop.f32.mrb[88].mxu0 }
 0x43b   : > { %v3049_v15 = vpop.f32.mrb[89].mxu1  ;;  %v10596_v1 = vadd.f32 %v5690_v21, %v3047_v0  ;;  %v5692_v9 = vpop.f32.mrb[89].mxu0  ;;  %v5919_v0 = vsel %vm5833_vm3, %v10590_v23, 0.0 }
 0x43c   : > { %v3050_v43 = vpop.f32.mrb[90].mxu1  ;;  %v5693_v28 = vpop.f32.mrb[90].mxu0  ;;  %v5920_v24 = vadd.f32 %v5919_v0, %v5918_v27 }
 0x43d   : > { %11850 = vst [vmem:[#allocation11_spill] sm:$0xff] %v10596_v1  ;;  %v3052_v57 = vpop.f32.mrb[91].mxu1  ;;  %v10600_v8 = vadd.f32 %v5693_v28, %v3050_v43  ;;  %v5695_v29 = vpop.f32.mrb[91].mxu0  ;;  %v5921_v43 = vsel %vm5833_vm3, %v10596_v1, 0.0 }
 0x43e   : > { %v5922_v7 = vadd.f32 %v5921_v43, %v5920_v24 }
 0x43f   : > { %11851 = vst [vmem:[#allocation12_spill] sm:$0xff] %v10600_v8  ;;  %v5923_v29 = vsel %vm5833_vm3, %v10600_v8, 0.0 }
 0x440   : > { %v5924_v23 = vadd.f32 %v5923_v29, %v5922_v7 }
 0x442   : > { %v3055_v18 = vpop.f32.mrb[92].mxu1  ;;  %v5698_v37 = vpop.f32.mrb[92].mxu0 }
 0x443   : > { %v3057_v34 = vpop.f32.mrb[93].mxu1  ;;  %v10606_v31 = vadd.f32 %v5698_v37, %v3055_v18  ;;  %v5700_v4 = vpop.f32.mrb[93].mxu0 }
 0x444   : > { %v3058_v21 = vpop.f32.mrb[94].mxu1  ;;  %v5701_v15 = vpop.f32.mrb[94].mxu0 }
 0x445   : > { %11852 = vst [vmem:[#allocation13_spill] sm:$0xff] %v10606_v31  ;;  %v3060_v9 = vpop.f32.mrb[95].mxu1  ;;  %v10610_v28 = vadd.f32 %v5701_v15, %v3058_v21  ;;  %v5703_v57 = vpop.f32.mrb[95].mxu0  ;;  %v5925_v18 = vsel %vm5833_vm3, %v10606_v31, 0.0 }
 0x446   : > { %v5926_v0 = vadd.f32 %v5925_v18, %v5924_v23 }
 0x447   : > { %11853 = vst [vmem:[#allocation14_spill] sm:$0xff] %v10610_v28  ;;  %v5927_v43 = vsel %vm5833_vm3, %v10610_v28, 0.0 }
 0x44a   : > { %v3063_v47 = vpop.f32.mrb[96].mxu1  ;;  %v5706_v51 = vpop.f32.mrb[96].mxu0 }
 0x44b   : > { %v3065_v34 = vpop.f32.mrb[97].mxu1  ;;  %v10616_v37 = vadd.f32 %v5706_v51, %v3063_v47  ;;  %v5708_v4 = vpop.f32.mrb[97].mxu0 }
 0x44c   : > { %v3066_v9 = vpop.f32.mrb[98].mxu1  ;;  %v5709_v1 = vpop.f32.mrb[98].mxu0  ;;  %v5928_v34 = vadd.f32 %v5927_v43, %v5926_v0 }
 0x44d   : > { %11854 = vst [vmem:[#allocation15_spill] sm:$0xff] %v10616_v37  ;;  %v3068_v21 = vpop.f32.mrb[99].mxu1  ;;  %v10618_v15 = vadd.f32 %v5709_v1, %v3066_v9  ;;  %v5711_v27 = vpop.f32.mrb[99].mxu0  ;;  %v5929_v57 = vsel %vm5833_vm3, %v10616_v37, 0.0 }
 0x44e   : > { %v5930_v29 = vadd.f32 %v5929_v57, %v5928_v34 }
 0x44f   : > { %11855 = vst [vmem:[#allocation16_spill] sm:$0xff] %v10618_v15  ;;  %v5931_v23 = vsel %vm5833_vm3, %v10618_v15, 0.0 }
 0x450   : > { %v5932_v37 = vadd.f32 %v5931_v23, %v5930_v29 }
 0x452   : > { %v3071_v24 = vpop.f32.mrb[100].mxu1  ;;  %v5714_v31 = vpop.f32.mrb[100].mxu0 }
 0x453   : > { %v3073_v47 = vpop.f32.mrb[101].mxu1  ;;  %v10624_v51 = vadd.f32 %v5714_v31, %v3071_v24  ;;  %v5716_v4 = vpop.f32.mrb[101].mxu0 }
 0x454   : > { %v3074_v7 = vpop.f32.mrb[102].mxu1  ;;  %v5717_v21 = vpop.f32.mrb[102].mxu0 }
 0x455   : > { %11856 = vst [vmem:[#allocation17_spill] sm:$0xff] %v10624_v51  ;;  %v3076_v1 = vpop.f32.mrb[103].mxu1  ;;  %v10628_v18 = vadd.f32 %v5717_v21, %v3074_v7  ;;  %v5719_v9 = vpop.f32.mrb[103].mxu0  ;;  %v5933_v27 = vsel %vm5833_vm3, %v10624_v51, 0.0 }
 0x456   : > { %v5934_v43 = vadd.f32 %v5933_v27, %v5932_v37 }
 0x457   : > { %11857 = vst [vmem:[#allocation18_spill] sm:$0xff] %v10628_v18  ;;  %v5935_v24 = vsel %vm5833_vm3, %v10628_v18, 0.0 }
 0x458   : > { %v5936_v29 = vadd.f32 %v5935_v24, %v5934_v43 }
 0x45a   : > { %v3079_v0 = vpop.f32.mrb[104].mxu1  ;;  %v5722_v47 = vpop.f32.mrb[104].mxu0 }
 0x45b   : > { %v3081_v31 = vpop.f32.mrb[105].mxu1  ;;  %v10634_v57 = vadd.f32 %v5722_v47, %v3079_v0  ;;  %v5724_v34 = vpop.f32.mrb[105].mxu0 }
 0x45c   : > { %v3082_v4 = vpop.f32.mrb[106].mxu1  ;;  %v5725_v1 = vpop.f32.mrb[106].mxu0 }
 0x45d   : > { %11858 = vst [vmem:[#allocation19_spill] sm:$0xff] %v10634_v57  ;;  %v3084_v15 = vpop.f32.mrb[107].mxu1  ;;  %v5937_v7 = vsel %vm5833_vm3, %v10634_v57, 0.0  ;;  %v10638_v21 = vadd.f32 %v5725_v1, %v3082_v4  ;;  %v5727_v9 = vpop.f32.mrb[107].mxu0 }
 0x45e   : > { %v5938_v23 = vadd.f32 %v5937_v7, %v5936_v29 }
 0x45f   : > { %11859 = vst [vmem:[#allocation20_spill] sm:$0xff] %v10638_v21  ;;  %v5939_v37 = vsel %vm5833_vm3, %v10638_v21, 0.0 }
 0x460   : > { %v5940_v51 = vadd.f32 %v5939_v37, %v5938_v23 }
 0x462   : > { %v3087_v27 = vpop.f32.mrb[108].mxu1  ;;  %v5730_v31 = vpop.f32.mrb[108].mxu0 }
 0x463   : > { %v3089_v18 = vpop.f32.mrb[109].mxu1  ;;  %v10642_v0 = vadd.f32 %v5730_v31, %v3087_v27  ;;  %v5732_v47 = vpop.f32.mrb[109].mxu0 }
 0x464   : > { %v3090_v34 = vpop.f32.mrb[110].mxu1  ;;  %v5733_v15 = vpop.f32.mrb[110].mxu0 }
 0x465   : > { %v3092_v28 = vpop.f32.mrb[111].mxu1  ;;  %v5941_v4 = vsel %vm5833_vm3, %v10642_v0, 0.0  ;;  %v10646_v1 = vadd.f32 %v5733_v15, %v3090_v34  ;;  %v5735_v43 = vpop.f32.mrb[111].mxu0 }
 0x466   : > { %v5942_v24 = vadd.f32 %v5941_v4, %v5940_v51 }
 0x467   : > { %v5943_v7 = vsel %vm5833_vm3, %v10646_v1, 0.0 }
 0x468   : > { %v5944_v9 = vadd.f32 %v5943_v7, %v5942_v24 }
 0x46a   : > { %v3095_v29 = vpop.f32.mrb[112].mxu1  ;;  %v5738_v18 = vpop.f32.mrb[112].mxu0 }
 0x46b   : > { %v3097_v27 = vpop.f32.mrb[113].mxu1  ;;  %v7790_v31 = vadd.f32 %v5738_v18, %v3095_v29  ;;  %v5740_v47 = vpop.f32.mrb[113].mxu0 }
 0x46c   : > { %v3098_v21 = vpop.f32.mrb[114].mxu1  ;;  %v5741_v23 = vpop.f32.mrb[114].mxu0 }
 0x46d   : > { %v3100_v37 = vpop.f32.mrb[115].mxu1  ;;  %v5945_v28 = vsel %vm5833_vm3, %v7790_v31, 0.0  ;;  %v7791_v57 = vadd.f32 %v5741_v23, %v3098_v21  ;;  %v5743_v8 = vpop.f32.mrb[115].mxu0 }
 0x46e   : > { %v5946_v34 = vadd.f32 %v5945_v28, %v5944_v9 }
 0x46f   : > { %v5947_v15 = vsel %vm5833_vm3, %v7791_v57, 0.0 }
 0x470   : > { %v5948_v51 = vadd.f32 %v5947_v15, %v5946_v34 }
 0x472   : > { %v3103_v4 = vpop.f32.mrb[116].mxu1  ;;  %v5746_v43 = vpop.f32.mrb[116].mxu0 }
 0x473   : > { %v3105_v3 = vpop.f32.mrb[117].mxu1  ;;  %v7792_v24 = vadd.f32 %v5746_v43, %v3103_v4  ;;  %v5748_v7 = vpop.f32.mrb[117].mxu0 }
 0x474   : > { %v3106_v13 = vpop.f32.mrb[118].mxu1  ;;  %v5749_v27 = vpop.f32.mrb[118].mxu0 }
 0x475   : > { %v3108_v29 = vpop.f32.mrb[119].mxu1  ;;  %v5949_v18 = vsel %vm5833_vm3, %v7792_v24, 0.0  ;;  %v7793_v47 = vadd.f32 %v5749_v27, %v3106_v13  ;;  %v5751_v37 = vpop.f32.mrb[119].mxu0 }
 0x476   : > { %v5950_v59 = vadd.f32 %v5949_v18, %v5948_v51 }
 0x477   : > { %v5951_v21 = vsel %vm5833_vm3, %v7793_v47, 0.0 }
 0x478   : > { %v5952_v8 = vadd.f32 %v5951_v21, %v5950_v59 }
 0x47a   : > { %v3111_v9 = vpop.f32.mrb[120].mxu1  ;;  %v5754_v23 = vpop.f32.mrb[120].mxu0 }
 0x47b   : > { %v3113_v28 = vpop.f32.mrb[121].mxu1  ;;  %v7794_v34 = vadd.f32 %v5754_v23, %v3111_v9  ;;  %v5756_v15 = vpop.f32.mrb[121].mxu0 }
 0x47c   : > { %v3114_v44 = vpop.f32.mrb[122].mxu1  ;;  %v5757_v3 = vpop.f32.mrb[122].mxu0 }
 0x47d   : > { %v3116_v4 = vpop.f32.mrb[123].mxu1  ;;  %v5953_v43 = vsel %vm5833_vm3, %v7794_v34, 0.0  ;;  %v7795_v7 = vadd.f32 %v5757_v3, %v3114_v44  ;;  %v5759_v29 = vpop.f32.mrb[123].mxu0 }
 0x47e   : > { %v5954_v39 = vadd.f32 %v5953_v43, %v5952_v8 }
 0x47f   : > { %v5955_v13 = vsel %vm5833_vm3, %v7795_v7, 0.0 }
 0x480   : > { %v5956_v27 = vadd.f32 %v5955_v13, %v5954_v39 }
 0x482   : > { %v3119_v51 = vpop.f32.mrb[124].mxu1  ;;  %v5762_v18 = vpop.f32.mrb[124].mxu0 }
 0x483   : > { %v3121_v37 = vpop.f32.mrb[125].mxu1  ;;  %v7796_v59 = vadd.f32 %v5762_v18, %v3119_v51  ;;  %v5764_v21 = vpop.f32.mrb[125].mxu0 }
 0x484   : > { %v3122_v54 = vpop.f32.mrb[126].mxu1  ;;  %v5765_v28 = vpop.f32.mrb[126].mxu0 }
 0x485   : > { %v3124_v9 = vpop.f32.mrb[127].mxu1  ;;  %v5957_v23 = vsel %vm5833_vm3, %v7796_v59, 0.0  ;;  %v7797_v15 = vadd.f32 %v5765_v28, %v3122_v54  ;;  %v5767_v4 = vpop.f32.mrb[127].mxu0 }
 0x486   : > { %v5958_v55 = vadd.f32 %v5957_v23, %v5956_v27 }
 0x487   : > { %v5959_v44 = vsel %vm5833_vm3, %v7797_v15, 0.0 }
 0x488   : > { %v5960_v3 = vadd.f32 %v5959_v44, %v5958_v55 }
 0x48a   : > { %v5961_v8 = vrot.slane %v5960_v3, 4 }
 0x48c   : > { %v5962_v43 = vadd.f32 %v5961_v8, %v5960_v3 }
 0x48e   : > { %v5963_v29 = vrot.slane %v5962_v43, 2 }
 0x490   : > { %v5964_v39 = vadd.f32 %v5963_v29, %v5962_v43 }
 0x492   : > { %v5965_v13 = vrot.slane %v5964_v39, 1 }
 0x494   : > { %v5966_v19 = vadd.f32 %v5965_v13, %v5964_v39 }
 0x496   : > { %v10658_v37 = vmul.f32 0.001953125, %v5966_v19 }
 0x498   : > { %v10662_v51 = vsub.f32 %v10642_v0, %v10658_v37  ;;  %v10666_v54 = vsub.f32 %v10646_v1, %v10658_v37  ;;  %v10669_v27 = vsub.f32 %v7790_v31, %v10658_v37  ;;  %v10672_v55 = vsub.f32 %v7791_v57, %v10658_v37 }
 0x499   : > { %v10675_v18 = vsub.f32 %v7792_v24, %v10658_v37  ;;  %v10678_v19 = vsub.f32 %v7793_v47, %v10658_v37  ;;  %v10681_v21 = vsub.f32 %v7794_v34, %v10658_v37  ;;  %v10684_v0 = vsub.f32 %v7795_v7, %v10658_v37 }
 0x49a   : > { %v10687_v1 = vsub.f32 %v7796_v59, %v10658_v37  ;;  %v10690_v31 = vsub.f32 %v7797_v15, %v10658_v37  ;;  %v10694_v57 = vsub.f32 %v10369_v36, %v10658_v37  ;;  %v10698_v24 = vsub.f32 %v10373_v17, %v10658_v37 }
 0x49b   : > { %11860 = vst [vmem:[#allocation21_spill] sm:$0xff] %v10678_v19  ;;  %11861 = vst [vmem:[#allocation22_spill] sm:$0xff] %v10681_v21  ;;  %v10702_v47 = vsub.f32 %v10381_v14, %v10658_v37  ;;  %v10706_v34 = vsub.f32 %v10386_v62, %v10658_v37  ;;  %v10714_v36 = vsub.f32 %v10393_v32, %v10658_v37 }
 0x49c   : > { %11862 = vst [vmem:[#allocation23_spill] sm:$0xff] %v10684_v0  ;;  %11863 = vst [vmem:[#allocation24_spill] sm:$0xff] %v10687_v1  ;;  %v6032_v7 = vmul.f32 %v10694_v57, %v10694_v57  ;;  %v6033_v59 = vmul.f32 %v10698_v24, %v10698_v24  ;;  %v10720_v14 = vsub.f32 %v10398_v30, %v10658_v37 }
 0x49d   : > { %v6034_v17 = vmul.f32 %v10702_v47, %v10702_v47  ;;  %v6035_v62 = vmul.f32 %v10706_v34, %v10706_v34  ;;  %v10728_v15 = vsub.f32 %v10405_v48, %v10658_v37  ;;  %v6036_v32 = vmul.f32 %v10714_v36, %v10714_v36 }
 0x49e   : > { %v6096_v28 = vsel %vm5833_vm3, %v6032_v7, 0.0  ;;  %v6097_v9 = vsel %vm5833_vm3, %v6033_v59, 0.0  ;;  %v10735_v30 = vsub.f32 %v10410_v50, %v10658_v37  ;;  %v6037_v3 = vmul.f32 %v10720_v14, %v10720_v14 }
 0x49f   : > { %v6098_v23 = vadd.f32 %v6097_v9, %v6096_v28  ;;  %v6099_v4 = vsel %vm5833_vm3, %v6034_v17, 0.0  ;;  %v6101_v8 = vsel %vm5833_vm3, %v6035_v62, 0.0  ;;  %v10742_v48 = vsub.f32 %v10417_v53, %v10658_v37 }
 0x4a0   : > { %v6038_v29 = vmul.f32 %v10728_v15, %v10728_v15  ;;  %v6103_v39 = vsel %vm5833_vm3, %v6036_v32, 0.0  ;;  %v10749_v50 = vsub.f32 %v10421_v35, %v10658_v37  ;;  %v6039_v7 = vmul.f32 %v10735_v30, %v10735_v30 }
 0x4a1   : > { %v6100_v44 = vadd.f32 %v6099_v4, %v6098_v23  ;;  %v6105_v59 = vsel %vm5833_vm3, %v6037_v3, 0.0  ;;  %v10756_v53 = vsub.f32 %v10425_v49, %v10658_v37  ;;  %v6040_v62 = vmul.f32 %v10742_v48, %v10742_v48 }
 0x4a2   : > { %v6107_v28 = vsel %vm5833_vm3, %v6038_v29, 0.0  ;;  %v10763_v35 = vsub.f32 %v10428_v33, %v10658_v37  ;;  %v6041_v23 = vmul.f32 %v10749_v50, %v10749_v50  ;;  %v6109_v32 = vsel %vm5833_vm3, %v6039_v7, 0.0 }
 0x4a3   : > { %v6102_v43 = vadd.f32 %v6101_v8, %v6100_v44  ;;  %v10770_v49 = vsub.f32 %v10431_v10, %v10658_v37  ;;  %v6042_v44 = vmul.f32 %v10756_v53, %v10756_v53  ;;  %v6111_v3 = vsel %vm5833_vm3, %v6040_v62, 0.0 }
 0x4a4   : > { %v10777_v33 = vsub.f32 %v10434_v61, %v10658_v37  ;;  %v6113_v29 = vsel %vm5833_vm3, %v6041_v23, 0.0  ;;  %v10784_v10 = vsub.f32 %v10437_v6, %v10658_v37  ;;  %v10791_v61 = vsub.f32 %v10442_v40, %v10658_v37 }
 0x4a5   : > { %v6104_v13 = vadd.f32 %v6103_v39, %v6102_v43  ;;  %v6043_v43 = vmul.f32 %v10763_v35, %v10763_v35  ;;  %v6115_v7 = vsel %vm5833_vm3, %v6042_v44, 0.0  ;;  %v10798_v6 = vsub.f32 %v10451_v38, %v10658_v37 }
 0x4a6   : > { %v10805_v40 = vsub.f32 %v10456_v22, %v10658_v37  ;;  %v10812_v38 = vsub.f32 %v10463_v12, %v10658_v37  ;;  %v10819_v22 = vsub.f32 %v10466_v45, %v10658_v37  ;;  %v10826_v12 = vsub.f32 %v10473_v52, %v10658_v37 }
 0x4a7   : > { %v6106_v17 = vadd.f32 %v6105_v59, %v6104_v13  ;;  %v6044_v13 = vmul.f32 %v10770_v49, %v10770_v49  ;;  %v6117_v62 = vsel %vm5833_vm3, %v6043_v43, 0.0  ;;  %v10833_v45 = vsub.f32 %v10478_v41, %v10658_v37 }
 0x4a8   : > { %v10840_v52 = vsub.f32 %v10485_v20, %v10658_v37  ;;  %v10847_v41 = vsub.f32 %v10490_v11, %v10658_v37  ;;  %v10854_v20 = vsub.f32 %v10497_v16, %v10658_v37  ;;  %v10861_v11 = vsub.f32 %v10500_v56, %v10658_v37 }
 0x4a9   : > { %v6108_v9 = vadd.f32 %v6107_v28, %v6106_v17  ;;  %v6045_v17 = vmul.f32 %v10777_v33, %v10777_v33  ;;  %v6119_v23 = vsel %vm5833_vm3, %v6044_v13, 0.0  ;;  %v10868_v16 = vsub.f32 %v10507_v58, %v10658_v37 }
 0x4aa   : > { %v10875_v56 = vsub.f32 %v10512_v26, %v10658_v37  ;;  %v10882_v58 = vsub.f32 %v10519_v60, %v10658_v37  ;;  %v10889_v26 = vsub.f32 %v10524_v42, %v10658_v37  ;;  %v10896_v60 = vsub.f32 %v10531_v25, %v10658_v37 }
 0x4ab   : > { %v6110_v4 = vadd.f32 %v6109_v32, %v6108_v9  ;;  %v6046_v9 = vmul.f32 %v10784_v10, %v10784_v10  ;;  %v6121_v44 = vsel %vm5833_vm3, %v6045_v17, 0.0  ;;  %v10903_v42 = vsub.f32 %v10534_v5, %v10658_v37 }
 0x4ac   : > { %v10910_v25 = vsub.f32 %v10540_v2, %v10658_v37  ;;  %v10917_v5 = vsub.f32 %v10544_v63, %v10658_v37  ;;  %v10924_v2 = vsub.f32 %v10550_v46, %v10658_v37 }
 0x4ad   : > { %v6112_v8 = vadd.f32 %v6111_v3, %v6110_v4  ;;  %v6047_v4 = vmul.f32 %v10791_v61, %v10791_v61  ;;  %v6123_v43 = vsel %vm5833_vm3, %v6046_v9, 0.0 }
 0x4af   : > { %v6114_v39 = vadd.f32 %v6113_v29, %v6112_v8  ;;  %v6048_v8 = vmul.f32 %v10798_v6, %v10798_v6  ;;  %v6125_v13 = vsel %vm5833_vm3, %v6047_v4, 0.0 }
 0x4b1   : > { %v6116_v59 = vadd.f32 %v6115_v7, %v6114_v39  ;;  %v6049_v39 = vmul.f32 %v10805_v40, %v10805_v40  ;;  %v6127_v17 = vsel %vm5833_vm3, %v6048_v8, 0.0 }
 0x4b3   : > { %v6118_v28 = vadd.f32 %v6117_v62, %v6116_v59  ;;  %v6050_v59 = vmul.f32 %v10812_v38, %v10812_v38  ;;  %v6129_v9 = vsel %vm5833_vm3, %v6049_v39, 0.0 }
 0x4b5   : > { %v6120_v32 = vadd.f32 %v6119_v23, %v6118_v28  ;;  %v6051_v28 = vmul.f32 %v10819_v22, %v10819_v22  ;;  %v6131_v4 = vsel %vm5833_vm3, %v6050_v59, 0.0 }
 0x4b7   : > { %v6122_v3 = vadd.f32 %v6121_v44, %v6120_v32  ;;  %v6052_v32 = vmul.f32 %v10826_v12, %v10826_v12  ;;  %v6133_v8 = vsel %vm5833_vm3, %v6051_v28, 0.0 }
 0x4b9   : > { %v6124_v29 = vadd.f32 %v6123_v43, %v6122_v3  ;;  %v6053_v3 = vmul.f32 %v10833_v45, %v10833_v45  ;;  %v6135_v39 = vsel %vm5833_vm3, %v6052_v32, 0.0 }
 0x4bb   : > { %v6126_v7 = vadd.f32 %v6125_v13, %v6124_v29  ;;  %v6054_v29 = vmul.f32 %v10840_v52, %v10840_v52  ;;  %v6137_v59 = vsel %vm5833_vm3, %v6053_v3, 0.0 }
 0x4bd   : > { %v6128_v62 = vadd.f32 %v6127_v17, %v6126_v7  ;;  %v6055_v7 = vmul.f32 %v10847_v41, %v10847_v41  ;;  %v6139_v28 = vsel %vm5833_vm3, %v6054_v29, 0.0 }
 0x4bf   : > { %v6130_v23 = vadd.f32 %v6129_v9, %v6128_v62  ;;  %v6056_v62 = vmul.f32 %v10854_v20, %v10854_v20  ;;  %v6141_v32 = vsel %vm5833_vm3, %v6055_v7, 0.0 }
 0x4c1   : > { %v6132_v44 = vadd.f32 %v6131_v4, %v6130_v23  ;;  %v6057_v23 = vmul.f32 %v10861_v11, %v10861_v11  ;;  %v6143_v3 = vsel %vm5833_vm3, %v6056_v62, 0.0 }
 0x4c3   : > { %v6134_v43 = vadd.f32 %v6133_v8, %v6132_v44  ;;  %v6058_v44 = vmul.f32 %v10868_v16, %v10868_v16  ;;  %v6145_v29 = vsel %vm5833_vm3, %v6057_v23, 0.0 }
 0x4c5   : > { %v6136_v13 = vadd.f32 %v6135_v39, %v6134_v43  ;;  %v6059_v43 = vmul.f32 %v10875_v56, %v10875_v56  ;;  %v6147_v7 = vsel %vm5833_vm3, %v6058_v44, 0.0 }
 0x4c7   : > { %v6138_v17 = vadd.f32 %v6137_v59, %v6136_v13  ;;  %v6060_v13 = vmul.f32 %v10882_v58, %v10882_v58  ;;  %v6149_v62 = vsel %vm5833_vm3, %v6059_v43, 0.0 }
 0x4c9   : > { %v6140_v9 = vadd.f32 %v6139_v28, %v6138_v17  ;;  %v6061_v17 = vmul.f32 %v10889_v26, %v10889_v26  ;;  %v6151_v23 = vsel %vm5833_vm3, %v6060_v13, 0.0  ;;  %v6065_v13 = vmul.f32 %v10917_v5, %v10917_v5 }
 0x4cb   : > { %v6142_v4 = vadd.f32 %v6141_v32, %v6140_v9  ;;  %v6062_v9 = vmul.f32 %v10896_v60, %v10896_v60  ;;  %v6153_v44 = vsel %vm5833_vm3, %v6061_v17, 0.0  ;;  %v11865_v17 = vld [vmem:[#allocation3_spill] sm:$0xff] }
 0x4cc   : > { %v10938_v46 = vsub.f32 %v11865_v17, %v10658_v37 }
 0x4cd   : > { %v6144_v8 = vadd.f32 %v6143_v3, %v6142_v4  ;;  %v6063_v4 = vmul.f32 %v10903_v42, %v10903_v42  ;;  %v6155_v43 = vsel %vm5833_vm3, %v6062_v9, 0.0 }
 0x4cf   : > { %v6146_v39 = vadd.f32 %v6145_v29, %v6144_v8  ;;  %v6064_v8 = vmul.f32 %v10910_v25, %v10910_v25 }
 0x4d1   : > { %v6148_v59 = vadd.f32 %v6147_v7, %v6146_v39  ;;  %v11864_v39 = vld [vmem:[#allocation2_spill] sm:$0xff]  ;;  %v6157_v7 = vsel %vm5833_vm3, %v6063_v4, 0.0  ;;  %v6161_v4 = vsel %vm5833_vm3, %v6065_v13, 0.0 }
 0x4d2   : > { %v10931_v63 = vsub.f32 %v11864_v39, %v10658_v37  ;;  %11866 = vst [vmem:[#allocation2_spill] sm:$0xff] %v10938_v46  ;;  %v6068_v39 = vmul.f32 %v10938_v46, %v10938_v46 }
 0x4d3   : > { %v6150_v28 = vadd.f32 %v6149_v62, %v6148_v59  ;;  %v6066_v62 = vmul.f32 %v10924_v2, %v10924_v2 }
 0x4d5   : > { %v6152_v32 = vadd.f32 %v6151_v23, %v6150_v28  ;;  %v6159_v28 = vsel %vm5833_vm3, %v6064_v8, 0.0  ;;  %v11867_v23 = vld [vmem:[#allocation4_spill] sm:$0xff]  ;;  %v6163_v8 = vsel %vm5833_vm3, %v6066_v62, 0.0  ;;  %v6167_v62 = vsel %vm5833_vm3, %v6068_v39, 0.0 }
 0x4d7   : > { %v6154_v3 = vadd.f32 %v6153_v44, %v6152_v32  ;;  %v10945_v32 = vsub.f32 %v11867_v23, %v10658_v37  ;;  %v6067_v44 = vmul.f32 %v10931_v63, %v10931_v63  ;;  %v11873_v23 = vld [vmem:[#allocation7_spill] sm:$0xff] }
 0x4d9   : > { %v6156_v29 = vadd.f32 %v6155_v43, %v6154_v3  ;;  %11868 = vst [vmem:[#allocation3_spill] sm:$0xff] %v10945_v32  ;;  %v11869_v43 = vld [vmem:[#allocation5_spill] sm:$0xff]  ;;  %v6165_v13 = vsel %vm5833_vm3, %v6067_v44, 0.0 }
 0x4db   : > { %v6158_v59 = vadd.f32 %v6157_v7, %v6156_v29  ;;  %v10952_v29 = vsub.f32 %v11869_v43, %v10658_v37 }
 0x4dd   : > { %v6160_v9 = vadd.f32 %v6159_v28, %v6158_v59  ;;  %11870 = vst [vmem:[#allocation4_spill] sm:$0xff] %v10952_v29  ;;  %v11871_v59 = vld [vmem:[#allocation6_spill] sm:$0xff]  ;;  %v6069_v28 = vmul.f32 %v10945_v32, %v10945_v32  ;;  %v6070_v43 = vmul.f32 %v10952_v29, %v10952_v29 }
 0x4de   : > { %v10959_v17 = vsub.f32 %v11871_v59, %v10658_v37 }
 0x4df   : > { %v6162_v3 = vadd.f32 %v6161_v4, %v6160_v9  ;;  %v10966_v4 = vsub.f32 %v11873_v23, %v10658_v37  ;;  %v6169_v44 = vsel %vm5833_vm3, %v6069_v28, 0.0  ;;  %v6171_v39 = vsel %vm5833_vm3, %v6070_v43, 0.0 }
 0x4e0   : > { %11872 = vst [vmem:[#allocation5_spill] sm:$0xff] %v10959_v17  ;;  %v6071_v32 = vmul.f32 %v10959_v17, %v10959_v17 }
 0x4e1   : > { %v6164_v7 = vadd.f32 %v6163_v8, %v6162_v3  ;;  %11874 = vst [vmem:[#allocation6_spill] sm:$0xff] %v10966_v4  ;;  %v11875_v8 = vld [vmem:[#allocation8_spill] sm:$0xff]  ;;  %v6072_v29 = vmul.f32 %v10966_v4, %v10966_v4 }
 0x4e2   : > { %v10973_v59 = vsub.f32 %v11875_v8, %v10658_v37  ;;  %v6173_v28 = vsel %vm5833_vm3, %v6071_v32, 0.0 }
 0x4e3   : > { %v6166_v9 = vadd.f32 %v6165_v13, %v6164_v7  ;;  %v11877_v13 = vld [vmem:[#allocation9_spill] sm:$0xff]  ;;  %v6175_v43 = vsel %vm5833_vm3, %v6072_v29, 0.0 }
 0x4e4   : > { %11876 = vst [vmem:[#allocation7_spill] sm:$0xff] %v10973_v59  ;;  %v10980_v23 = vsub.f32 %v11877_v13, %v10658_v37  ;;  %v6073_v17 = vmul.f32 %v10973_v59, %v10973_v59 }
 0x4e5   : > { %v6168_v3 = vadd.f32 %v6167_v62, %v6166_v9  ;;  %v11879_v62 = vld [vmem:[#allocation10_spill] sm:$0xff] }
 0x4e6   : > { %11878 = vst [vmem:[#allocation8_spill] sm:$0xff] %v10980_v23  ;;  %v10987_v8 = vsub.f32 %v11879_v62, %v10658_v37  ;;  %v6074_v4 = vmul.f32 %v10980_v23, %v10980_v23  ;;  %v6177_v32 = vsel %vm5833_vm3, %v6073_v17, 0.0 }
 0x4e7   : > { %v6170_v7 = vadd.f32 %v6169_v44, %v6168_v3  ;;  %v11881_v44 = vld [vmem:[#allocation11_spill] sm:$0xff] }
 0x4e8   : > { %11880 = vst [vmem:[#allocation9_spill] sm:$0xff] %v10987_v8  ;;  %v10994_v13 = vsub.f32 %v11881_v44, %v10658_v37  ;;  %v6075_v59 = vmul.f32 %v10987_v8, %v10987_v8  ;;  %v6179_v29 = vsel %vm5833_vm3, %v6074_v4, 0.0 }
 0x4e9   : > { %v6172_v9 = vadd.f32 %v6171_v39, %v6170_v7  ;;  %v11883_v39 = vld [vmem:[#allocation12_spill] sm:$0xff] }
 0x4ea   : > { %11882 = vst [vmem:[#allocation10_spill] sm:$0xff] %v10994_v13  ;;  %v11001_v62 = vsub.f32 %v11883_v39, %v10658_v37  ;;  %v6076_v23 = vmul.f32 %v10994_v13, %v10994_v13  ;;  %v6181_v17 = vsel %vm5833_vm3, %v6075_v59, 0.0 }
 0x4eb   : > { %v6174_v3 = vadd.f32 %v6173_v28, %v6172_v9  ;;  %v11885_v28 = vld [vmem:[#allocation13_spill] sm:$0xff] }
 0x4ec   : > { %11884 = vst [vmem:[#allocation11_spill] sm:$0xff] %v11001_v62  ;;  %v11008_v44 = vsub.f32 %v11885_v28, %v10658_v37  ;;  %v6077_v8 = vmul.f32 %v11001_v62, %v11001_v62  ;;  %v6183_v4 = vsel %vm5833_vm3, %v6076_v23, 0.0 }
 0x4ed   : > { %v6176_v7 = vadd.f32 %v6175_v43, %v6174_v3  ;;  %v11887_v43 = vld [vmem:[#allocation14_spill] sm:$0xff] }
 0x4ee   : > { %11886 = vst [vmem:[#allocation12_spill] sm:$0xff] %v11008_v44  ;;  %v11015_v39 = vsub.f32 %v11887_v43, %v10658_v37  ;;  %v6078_v13 = vmul.f32 %v11008_v44, %v11008_v44  ;;  %v6185_v59 = vsel %vm5833_vm3, %v6077_v8, 0.0 }
 0x4ef   : > { %v6178_v9 = vadd.f32 %v6177_v32, %v6176_v7  ;;  %v11889_v32 = vld [vmem:[#allocation15_spill] sm:$0xff] }
 0x4f0   : > { %11888 = vst [vmem:[#allocation13_spill] sm:$0xff] %v11015_v39  ;;  %v11022_v28 = vsub.f32 %v11889_v32, %v10658_v37  ;;  %v6079_v62 = vmul.f32 %v11015_v39, %v11015_v39  ;;  %v6187_v23 = vsel %vm5833_vm3, %v6078_v13, 0.0 }
 0x4f1   : > { %v6180_v3 = vadd.f32 %v6179_v29, %v6178_v9  ;;  %v11891_v29 = vld [vmem:[#allocation16_spill] sm:$0xff] }
 0x4f2   : > { %11890 = vst [vmem:[#allocation14_spill] sm:$0xff] %v11022_v28  ;;  %v11029_v43 = vsub.f32 %v11891_v29, %v10658_v37  ;;  %v6080_v44 = vmul.f32 %v11022_v28, %v11022_v28  ;;  %v6189_v8 = vsel %vm5833_vm3, %v6079_v62, 0.0 }
 0x4f3   : > { %v6182_v7 = vadd.f32 %v6181_v17, %v6180_v3  ;;  %v11893_v17 = vld [vmem:[#allocation17_spill] sm:$0xff] }
 0x4f4   : > { %11892 = vst [vmem:[#allocation15_spill] sm:$0xff] %v11029_v43  ;;  %v11036_v32 = vsub.f32 %v11893_v17, %v10658_v37  ;;  %v6081_v39 = vmul.f32 %v11029_v43, %v11029_v43  ;;  %v6191_v13 = vsel %vm5833_vm3, %v6080_v44, 0.0 }
 0x4f5   : > { %v6184_v9 = vadd.f32 %v6183_v4, %v6182_v7  ;;  %v11894_v4 = vld [vmem:[#allocation18_spill] sm:$0xff] }
 0x4f6   : > { %v11043_v29 = vsub.f32 %v11894_v4, %v10658_v37  ;;  %v6082_v28 = vmul.f32 %v11036_v32, %v11036_v32  ;;  %v6193_v62 = vsel %vm5833_vm3, %v6081_v39, 0.0  ;;  %v6087_v39 = vmul.f32 %v10666_v54, %v10666_v54 }
 0x4f7   : > { %v6186_v3 = vadd.f32 %v6185_v59, %v6184_v9  ;;  %v11896_v59 = vld [vmem:[#allocation19_spill] sm:$0xff] }
 0x4f8   : > { %11895 = vst [vmem:[#allocation16_spill] sm:$0xff] %v11043_v29  ;;  %v11050_v17 = vsub.f32 %v11896_v59, %v10658_v37  ;;  %v6083_v43 = vmul.f32 %v11043_v29, %v11043_v29  ;;  %v6195_v59 = vsel %vm5833_vm3, %v6082_v28, 0.0  ;;  %v6088_v28 = vmul.f32 %v10669_v27, %v10669_v27 }
 0x4f9   : > { %v6188_v7 = vadd.f32 %v6187_v23, %v6186_v3  ;;  %v11897_v23 = vld [vmem:[#allocation20_spill] sm:$0xff] }
 0x4fa   : > { %v11057_v4 = vsub.f32 %v11897_v23, %v10658_v37  ;;  %v6086_v37 = vmul.f32 %v10662_v51, %v10662_v51 }
 0x4fb   : > { %v6190_v9 = vadd.f32 %v6189_v8, %v6188_v7  ;;  %v6084_v8 = vmul.f32 %v11050_v17, %v11050_v17 }
 0x4fc   : > { %v6085_v44 = vmul.f32 %v11057_v4, %v11057_v4 }
 0x4fd   : > { %v6192_v3 = vadd.f32 %v6191_v13, %v6190_v9  ;;  %v6197_v9 = vsel %vm5833_vm3, %v6083_v43, 0.0  ;;  %v6199_v23 = vsel %vm5833_vm3, %v6084_v8, 0.0  ;;  %v6205_v43 = vsel %vm5833_vm3, %v6087_v39, 0.0 }
 0x4fe   : > { %v6090_v8 = vmul.f32 %v10675_v18, %v10675_v18  ;;  %v6093_v39 = vmul.f32 %v10684_v0, %v10684_v0 }
 0x4ff   : > { %v6194_v7 = vadd.f32 %v6193_v62, %v6192_v3  ;;  %v6201_v3 = vsel %vm5833_vm3, %v6085_v44, 0.0 }
 0x501   : > { %v6196_v46 = vadd.f32 %v6195_v59, %v6194_v7  ;;  %v6203_v7 = vsel %vm5833_vm3, %v6086_v37, 0.0  ;;  %v6092_v37 = vmul.f32 %v10681_v21, %v10681_v21 }
 0x503   : > { %v6198_v13 = vadd.f32 %v6197_v9, %v6196_v46  ;;  %v6089_v46 = vmul.f32 %v10672_v55, %v10672_v55 }
 0x505   : > { %v6200_v29 = vadd.f32 %v6199_v23, %v6198_v13  ;;  %v6207_v13 = vsel %vm5833_vm3, %v6088_v28, 0.0  ;;  %v6209_v44 = vsel %vm5833_vm3, %v6089_v46, 0.0  ;;  %v6094_v28 = vmul.f32 %v10687_v1, %v10687_v1 }
 0x506   : > { %v6095_v46 = vmul.f32 %v10690_v31, %v10690_v31 }
 0x507   : > { %v6202_v62 = vadd.f32 %v6201_v3, %v6200_v29  ;;  %v6091_v29 = vmul.f32 %v10678_v19, %v10678_v19 }
 0x509   : > { %v6204_v59 = vadd.f32 %v6203_v7, %v6202_v62  ;;  %v6211_v62 = vsel %vm5833_vm3, %v6090_v8, 0.0  ;;  %v6219_v8 = vsel %vm5833_vm3, %v6094_v28, 0.0 }
 0x50b   : > { %v6206_v9 = vadd.f32 %v6205_v43, %v6204_v59  ;;  %v6213_v59 = vsel %vm5833_vm3, %v6091_v29, 0.0 }
 0x50d   : > { %v6208_v23 = vadd.f32 %v6207_v13, %v6206_v9  ;;  %v6215_v9 = vsel %vm5833_vm3, %v6092_v37, 0.0 }
 0x50f   : > { %v6210_v3 = vadd.f32 %v6209_v44, %v6208_v23  ;;  %v6217_v23 = vsel %vm5833_vm3, %v6093_v39, 0.0 }
 0x511   : > { %v6212_v7 = vadd.f32 %v6211_v62, %v6210_v3  ;;  %v6221_v62 = vsel %vm5833_vm3, %v6095_v46, 0.0  ;;  %v11901_v46 = vld [vmem:[#allocation4_spill] sm:$0xff] }
 0x513   : > { %v6214_v43 = vadd.f32 %v6213_v59, %v6212_v7 }
 0x515   : > { %v6216_v13 = vadd.f32 %v6215_v9, %v6214_v43 }
 0x517   : > { %v6218_v44 = vadd.f32 %v6217_v23, %v6216_v13  ;;  %v11900_v13 = vld [vmem:[#allocation3_spill] sm:$0xff]  ;;  %v11902_v23 = vld [vmem:[#allocation5_spill] sm:$0xff] }
 0x519   : > { %v6220_v3 = vadd.f32 %v6219_v8, %v6218_v44  ;;  %v11903_v44 = vld [vmem:[#allocation6_spill] sm:$0xff]  ;;  %v11904_v8 = vld [vmem:[#allocation7_spill] sm:$0xff] }
 0x51b   : > { %v6222_v0 = vadd.f32 %v6221_v62, %v6220_v3  ;;  %v11905_v62 = vld [vmem:[#allocation8_spill] sm:$0xff] }
 0x51d   : > { %v6223_v29 = vrot.slane %v6222_v0, 4 }
 0x51f   : > { %v6224_v7 = vadd.f32 %v6223_v29, %v6222_v0 }
 0x521   : > { %v6225_v59 = vrot.slane %v6224_v7, 2 }
 0x523   : > { %v6226_v21 = vadd.f32 %v6225_v59, %v6224_v7  ;;  %v11906_v7 = vld [vmem:[#allocation9_spill] sm:$0xff] }
 0x525   : > { %v6227_v1 = vrot.slane %v6226_v21, 1 }
 0x527   : > { %v6228_v19 = vadd.f32 %v6227_v1, %v6226_v21 }
 0x529   : > { %v6229_v37 = vmul.f32 0.001953125, %v6228_v19 }
 0x52b   : > { %v6230_v43 = vadd.f32 1e-05, %v6229_v37  ;;  %v11908_v37 = vld [vmem:[#allocation10_spill] sm:$0xff] }
 0x52d   : > { %8823 = vrsqrt.f32 %v6230_v43 }
 0x537   : > { %v11100_v9 = vpop.eup %8823 }
 0x538   : > { %v11104_v39 = vmul.f32 %v11100_v9, %v10694_v57  ;;  %v11108_v28 = vmul.f32 %v11100_v9, %v10698_v24  ;;  %v11112_v0 = vmul.f32 %v11100_v9, %v10702_v47  ;;  %v11116_v21 = vmul.f32 %v11100_v9, %v10706_v34 }
 0x539   : > { %v11120_v19 = vmul.f32 %v11100_v9, %v10714_v36  ;;  %v11124_v1 = vmul.f32 %v11100_v9, %v10720_v14  ;;  %v11128_v57 = vmul.f32 %v11100_v9, %v10728_v15  ;;  %v11132_v24 = vmul.f32 %v11100_v9, %v10735_v30 }
 0x53a   : > { %v11136_v47 = vmul.f32 %v11100_v9, %v10742_v48  ;;  %v11140_v34 = vmul.f32 %v11100_v9, %v10749_v50  ;;  %v11144_v36 = vmul.f32 %v11100_v9, %v10756_v53  ;;  %v11148_v14 = vmul.f32 %v11100_v9, %v10763_v35 }
 0x53b   : > { %v11152_v15 = vmul.f32 %v11100_v9, %v10770_v49  ;;  %v11156_v30 = vmul.f32 %v11100_v9, %v10777_v33  ;;  %v11160_v48 = vmul.f32 %v11100_v9, %v10784_v10  ;;  %v11164_v50 = vmul.f32 %v11100_v9, %v10791_v61 }
 0x53c   : > { %v11168_v53 = vmul.f32 %v11100_v9, %v10798_v6  ;;  %v11172_v35 = vmul.f32 %v11100_v9, %v10805_v40  ;;  %v11176_v49 = vmul.f32 %v11100_v9, %v10812_v38  ;;  %v11180_v33 = vmul.f32 %v11100_v9, %v10819_v22 }
 0x53d   : > { %v11184_v10 = vmul.f32 %v11100_v9, %v10826_v12  ;;  %v11188_v61 = vmul.f32 %v11100_v9, %v10833_v45  ;;  %v11192_v6 = vmul.f32 %v11100_v9, %v10840_v52  ;;  %v11196_v40 = vmul.f32 %v11100_v9, %v10847_v41 }
 0x53e   : > { %v11200_v38 = vmul.f32 %v11100_v9, %v10854_v20  ;;  %v11204_v22 = vmul.f32 %v11100_v9, %v10861_v11  ;;  %v11208_v12 = vmul.f32 %v11100_v9, %v10868_v16  ;;  %v11212_v45 = vmul.f32 %v11100_v9, %v10875_v56 }
 0x53f   : > { %v11216_v52 = vmul.f32 %v11100_v9, %v10882_v58  ;;  %v11220_v41 = vmul.f32 %v11100_v9, %v10889_v26  ;;  %v11224_v20 = vmul.f32 %v11100_v9, %v10896_v60  ;;  %v11228_v11 = vmul.f32 %v11100_v9, %v10903_v42  ;;  %v11899_v60 = vld [vmem:[#allocation2_spill] sm:$0xff] }
 0x540   : > { %v11232_v16 = vmul.f32 %v11100_v9, %v10910_v25  ;;  %v11236_v56 = vmul.f32 %v11100_v9, %v10917_v5  ;;  %v11240_v58 = vmul.f32 %v11100_v9, %v10924_v2  ;;  %v11244_v26 = vmul.f32 %v11100_v9, %v10931_v63 }
 0x541   : > { %v11248_v42 = vmul.f32 %v11100_v9, %v11899_v60  ;;  %v11252_v25 = vmul.f32 %v11100_v9, %v11900_v13  ;;  %v11256_v5 = vmul.f32 %v11100_v9, %v11901_v46  ;;  %v11260_v2 = vmul.f32 %v11100_v9, %v11902_v23  ;;  %v11910_v60 = vld [vmem:[#allocation11_spill] sm:$0xff]  ;;  %v11912_v46 = vld [vmem:[#allocation12_spill] sm:$0xff] }
 0x542   : > { %11898 = vst [vmem:[#allocation17_spill] sm:$0xff] %v11240_v58  ;;  %v11264_v63 = vmul.f32 %v11100_v9, %v11903_v44  ;;  %v11268_v3 = vmul.f32 %v11100_v9, %v11904_v8  ;;  %v11272_v29 = vmul.f32 %v11100_v9, %v11905_v62  ;;  %v11276_v59 = vmul.f32 %v11100_v9, %v11906_v7  ;;  %v11914_v44 = vld [vmem:[#allocation13_spill] sm:$0xff]  ;;  %v11916_v62 = vld [vmem:[#allocation14_spill] sm:$0xff] }
 0x543   : > { %v11280_v43 = vmul.f32 %v11100_v9, %v11908_v37  ;;  %v11284_v13 = vmul.f32 %v11100_v9, %v11910_v60  ;;  %v11288_v23 = vmul.f32 %v11100_v9, %v11912_v46  ;;  %v11292_v8 = vmul.f32 %v11100_v9, %v11914_v44 }
 0x544   : > { %11907 = vst [vmem:[#allocation18_spill] sm:$0xff] %v11276_v59  ;;  %v11296_v7 = vmul.f32 %v11100_v9, %v11916_v62  ;;  %v11918_v59 = vld [vmem:[#allocation15_spill] sm:$0xff]  ;;  %v11304_v60 = vmul.f32 %v11100_v9, %v11036_v32  ;;  %v11312_v44 = vmul.f32 %v11100_v9, %v11050_v17  ;;  %v11316_v62 = vmul.f32 %v11100_v9, %v11057_v4 }
 0x545   : > { %11909 = vst [vmem:[#allocation19_spill] sm:$0xff] %v11280_v43  ;;  %11911 = vst [vmem:[#allocation20_spill] sm:$0xff] %v11284_v13  ;;  %v11300_v37 = vmul.f32 %v11100_v9, %v11918_v59  ;;  %v11919_v13 = vld [vmem:[#allocation16_spill] sm:$0xff]  ;;  %v11320_v59 = vmul.f32 %v11100_v9, %v10662_v51  ;;  %v11324_v32 = vmul.f32 %v11100_v9, %v10666_v54  ;;  %v11947_v43 = vmax.f32 %v11116_v21, 0.0 }
 0x546   : > { %11913 = vst [vmem:[#allocation2_spill] sm:$0xff] %v11288_v23  ;;  %11915 = vst [vmem:[#allocation3_spill] sm:$0xff] %v11292_v8  ;;  %v11308_v46 = vmul.f32 %v11100_v9, %v11919_v13  ;;  %v11328_v13 = vmul.f32 %v11100_v9, %v10669_v27  ;;  %v11332_v17 = vmul.f32 %v11100_v9, %v10672_v55  ;;  %v11945_v23 = vmax.f32 %v11108_v28, 0.0 }
 0x547   : > { %11917 = vst [vmem:[#allocation4_spill] sm:$0xff] %v11296_v7  ;;  %11920 = vst [vmem:[#allocation5_spill] sm:$0xff] %v11316_v62  ;;  %v11336_v4 = vmul.f32 %v11100_v9, %v10675_v18  ;;  %v11925_v62 = vld [vmem:[#allocation21_spill] sm:$0xff]  ;;  %v11356_v18 = vmul.f32 %v11100_v9, %v10690_v31  ;;  %v11944_v31 = vmax.f32 %v11104_v39, 0.0  ;;  %v7653_v58 = vpack.c.bf16 %v11947_v43, %v11947_v43 }
 0x548   : > { %11921 = vst [vmem:[#allocation6_spill] sm:$0xff] %v11320_v59  ;;  %11922 = vst [vmem:[#allocation7_spill] sm:$0xff] %v11324_v32  ;;  %v11340_v51 = vmul.f32 %v11100_v9, %v11925_v62  ;;  %v11927_v59 = vld [vmem:[#allocation22_spill] sm:$0xff]  ;;  %v11929_v32 = vld [vmem:[#allocation23_spill] sm:$0xff]  ;;  %v7651_v7 = vpack.c.bf16 %v11945_v23, %v11945_v23  ;;  %v11948_v62 = vmax.f32 %v11120_v19, 0.0  ;;  %v11949_v39 = vmax.f32 %v11124_v1, 0.0 }
 0x549   : > { %11923 = vst [vmem:[#allocation8_spill] sm:$0xff] %v11328_v13  ;;  %11924 = vst [vmem:[#allocation9_spill] sm:$0xff] %v11336_v4  ;;  %v11344_v54 = vmul.f32 %v11100_v9, %v11927_v59  ;;  %v11348_v27 = vmul.f32 %v11100_v9, %v11929_v32  ;;  %v11931_v13 = vld [vmem:[#allocation24_spill] sm:$0xff]  ;;  %v11946_v59 = vmax.f32 %v11112_v0, 0.0  ;;  %v11950_v28 = vmax.f32 %v11128_v57, 0.0 }
 0x54a   : > { %11926 = vst [vmem:[#allocation10_spill] sm:$0xff] %v11340_v51  ;;  %v11352_v55 = vmul.f32 %v11100_v9, %v11931_v13  ;;  %v7650_v9 = vpack.c.bf16 %v11944_v31, %v11944_v31  ;;  %v7655_v31 = vpack.c.bf16 %v11949_v39, %v11949_v39  ;;  %v11951_v23 = vmax.f32 %v11132_v24, 0.0  ;;  %6618 = vst.msk [vmem:[%s11422_s14 + $0x4] sm:$0xf] %vm6616_vm4, %v7651_v7 }
 0x54b   : > { %11928 = vst [vmem:[#allocation11_spill] sm:$0xff] %v11344_v54  ;;  %11930 = vst [vmem:[#allocation12_spill] sm:$0xff] %v11348_v27  ;;  %v7652_v51 = vpack.c.bf16 %v11946_v59, %v11946_v59  ;;  %v7656_v0 = vpack.c.bf16 %v11950_v28, %v11950_v28  ;;  %v11952_v43 = vmax.f32 %v11136_v47, 0.0  ;;  %v11953_v1 = vmax.f32 %v11140_v34, 0.0 }
 0x54c   : > { %11932 = vst [vmem:[#allocation13_spill] sm:$0xff] %v11352_v55  ;;  %v7654_v55 = vpack.c.bf16 %v11948_v62, %v11948_v62  ;;  %v7657_v21 = vpack.c.bf16 %v11951_v23, %v11951_v23  ;;  %v11954_v59 = vmax.f32 %v11144_v36, 0.0  ;;  %v11955_v39 = vmax.f32 %v11148_v14, 0.0  ;;  %6617 = vst.msk [vmem:[%s11422_s14] sm:$0xf] %vm6616_vm4, %v7650_v9 }
 0x54d   : > { %v7658_v19 = vpack.c.bf16 %v11952_v43, %v11952_v43  ;;  %v7659_v62 = vpack.c.bf16 %v11953_v1, %v11953_v1  ;;  %6619 = vst.msk [vmem:[%s11422_s14 + $0x8] sm:$0xf] %vm6616_vm4, %v7652_v51  ;;  %6620 = vst.msk [vmem:[%s11422_s14 + $0xc] sm:$0xf] %vm6616_vm4, %v7653_v58  ;;  %v11956_v47 = vmax.f32 %v11152_v15, 0.0  ;;  %v11957_v36 = vmax.f32 %v11156_v30, 0.0 }
 0x54e   : > { %v11935_v54 = vld [vmem:[#allocation5_spill] sm:$0xff]  ;;  %v7660_v57 = vpack.c.bf16 %v11954_v59, %v11954_v59  ;;  %v7661_v24 = vpack.c.bf16 %v11955_v39, %v11955_v39  ;;  %v11958_v9 = vmax.f32 %v11160_v48, 0.0  ;;  %v11959_v7 = vmax.f32 %v11164_v50, 0.0  ;;  %6621 = vst.msk [vmem:[%s11422_s14 + $0x10] sm:$0xf] %vm6616_vm4, %v7654_v55 }
 0x54f   : > { %v11936_v32 = vld [vmem:[#allocation6_spill] sm:$0xff]  ;;  %v11937_v27 = vld [vmem:[#allocation7_spill] sm:$0xff]  ;;  %v7662_v34 = vpack.c.bf16 %v11956_v47, %v11956_v47  ;;  %v7663_v14 = vpack.c.bf16 %v11957_v36, %v11957_v36  ;;  %6622 = vst.msk [vmem:[%s11422_s14 + $0x14] sm:$0xf] %vm6616_vm4, %v7655_v31  ;;  %6623 = vst.msk [vmem:[%s11422_s14 + $0x18] sm:$0xf] %vm6616_vm4, %v7656_v0 }
 0x550   : > { %v11938_v13 = vld [vmem:[#allocation8_spill] sm:$0xff]  ;;  %v11939_v8 = vld [vmem:[#allocation9_spill] sm:$0xff]  ;;  %v7664_v28 = vpack.c.bf16 %v11958_v9, %v11958_v9  ;;  %v7665_v51 = vpack.c.bf16 %v11959_v7, %v11959_v7  ;;  %6624 = vst.msk [vmem:[%s11422_s14 + $0x1c] sm:$0xf] %vm6616_vm4, %v7657_v21  ;;  %v11960_v15 = vmax.f32 %v11168_v53, 0.0  ;;  %v11961_v48 = vmax.f32 %v11172_v35, 0.0 }
 0x551   : > { %v11962_v58 = vmax.f32 %v11176_v49, 0.0  ;;  %v11963_v31 = vmax.f32 %v11180_v33, 0.0  ;;  %6625 = vst.msk [vmem:[%s11422_s14 + $0x20] sm:$0xf] %vm6616_vm4, %v7658_v19  ;;  %6626 = vst.msk [vmem:[%s11422_s14 + $0x24] sm:$0xf] %vm6616_vm4, %v7659_v62 }
 0x552   : > { %v11942_v4 = vld [vmem:[#allocation12_spill] sm:$0xff]  ;;  %v7666_v30 = vpack.c.bf16 %v11960_v15, %v11960_v15  ;;  %v7667_v50 = vpack.c.bf16 %v11961_v48, %v11961_v48  ;;  %6627 = vst.msk [vmem:[%s11422_s14 + $0x28] sm:$0xf] %vm6616_vm4, %v7660_v57  ;;  %6628 = vst.msk [vmem:[%s11422_s14 + $0x2c] sm:$0xf] %vm6616_vm4, %v7661_v24  ;;  %v11964_v53 = vmax.f32 %v11184_v10, 0.0 }
 0x553   : > { %v7668_v55 = vpack.c.bf16 %v11962_v58, %v11962_v58  ;;  %v7669_v0 = vpack.c.bf16 %v11963_v31, %v11963_v31  ;;  %v11965_v49 = vmax.f32 %v11188_v61, 0.0  ;;  %v11966_v23 = vmax.f32 %v11192_v6, 0.0  ;;  %6629 = vst.msk [vmem:[%s11422_s14 + $0x30] sm:$0xf] %vm6616_vm4, %v7662_v34  ;;  %6630 = vst.msk [vmem:[%s11422_s14 + $0x34] sm:$0xf] %vm6616_vm4, %v7663_v14 }
 0x554   : > { %v7670_v35 = vpack.c.bf16 %v11964_v53, %v11964_v53  ;;  %v11967_v43 = vmax.f32 %v11196_v40, 0.0  ;;  %6631 = vst.msk [vmem:[%s11422_s14 + $0x38] sm:$0xf] %vm6616_vm4, %v7664_v28  ;;  %6632 = vst.msk [vmem:[%s11422_s14 + $0x3c] sm:$0xf] %vm6616_vm4, %v7665_v51  ;;  %v11968_v10 = vmax.f32 %v11200_v38, 0.0 }
 0x555   : > { %v7671_v33 = vpack.c.bf16 %v11965_v49, %v11965_v49  ;;  %v7672_v21 = vpack.c.bf16 %v11966_v23, %v11966_v23  ;;  %v11969_v6 = vmax.f32 %v11204_v22, 0.0  ;;  %v11970_v1 = vmax.f32 %v11208_v12, 0.0  ;;  %6633 = vst.msk [vmem:[%s11422_s14 + $0x40] sm:$0xf] %vm6616_vm4, %v7666_v30  ;;  %6634 = vst.msk [vmem:[%s11422_s14 + $0x44] sm:$0xf] %vm6616_vm4, %v7667_v50 }
 0x556   : > { %v7673_v19 = vpack.c.bf16 %v11967_v43, %v11967_v43  ;;  %v7674_v61 = vpack.c.bf16 %v11968_v10, %v11968_v10  ;;  %v11971_v59 = vmax.f32 %v11212_v45, 0.0  ;;  %6635 = vst.msk [vmem:[%s11422_s14 + $0x48] sm:$0xf] %vm6616_vm4, %v7668_v55  ;;  %6636 = vst.msk [vmem:[%s11422_s14 + $0x4c] sm:$0xf] %vm6616_vm4, %v7669_v0  ;;  %v11972_v38 = vmax.f32 %v11216_v52, 0.0 }
 0x557   : > { %v7675_v40 = vpack.c.bf16 %v11969_v6, %v11969_v6  ;;  %v7676_v62 = vpack.c.bf16 %v11970_v1, %v11970_v1  ;;  %v11973_v12 = vmax.f32 %v11220_v41, 0.0  ;;  %v11974_v39 = vmax.f32 %v11224_v20, 0.0  ;;  %6637 = vst.msk [vmem:[%s11422_s14 + $0x50] sm:$0xf] %vm6616_vm4, %v7670_v35  ;;  %6638 = vst.msk [vmem:[%s11422_s14 + $0x54] sm:$0xf] %vm6616_vm4, %v7671_v33 }
 0x558   : > { %v7677_v57 = vpack.c.bf16 %v11971_v59, %v11971_v59  ;;  %v7678_v22 = vpack.c.bf16 %v11972_v38, %v11972_v38  ;;  %v11975_v47 = vmax.f32 %v11228_v11, 0.0  ;;  %6639 = vst.msk [vmem:[%s11422_s14 + $0x58] sm:$0xf] %vm6616_vm4, %v7672_v21  ;;  %6640 = vst.msk [vmem:[%s11422_s14 + $0x5c] sm:$0xf] %vm6616_vm4, %v7673_v19  ;;  %v11976_v52 = vmax.f32 %v11232_v16, 0.0 }
 0x559   : > { %v7679_v45 = vpack.c.bf16 %v11973_v12, %v11973_v12  ;;  %v7680_v24 = vpack.c.bf16 %v11974_v39, %v11974_v39  ;;  %v11977_v20 = vmax.f32 %v11236_v56, 0.0  ;;  %v11978_v36 = vld [vmem:[#allocation17_spill] sm:$0xff]  ;;  %v11980_v28 = vmax.f32 %v11244_v26, 0.0  ;;  %6641 = vst.msk [vmem:[%s11422_s14 + $0x60] sm:$0xf] %vm6616_vm4, %v7674_v61  ;;  %v11988_v31 = vld [vmem:[#allocation18_spill] sm:$0xff] }
 0x55a   : > { %v7681_v34 = vpack.c.bf16 %v11975_v47, %v11975_v47  ;;  %v7682_v41 = vpack.c.bf16 %v11976_v52, %v11976_v52  ;;  %v11979_v14 = vmax.f32 %v11978_v36, 0.0  ;;  %6642 = vst.msk [vmem:[%s11422_s14 + $0x64] sm:$0xf] %vm6616_vm4, %v7675_v40  ;;  %6643 = vst.msk [vmem:[%s11422_s14 + $0x68] sm:$0xf] %vm6616_vm4, %v7676_v62  ;;  %v11981_v16 = vmax.f32 %v11248_v42, 0.0 }
 0x55b   : > { %v7683_v11 = vpack.c.bf16 %v11977_v20, %v11977_v20  ;;  %v7685_v7 = vpack.c.bf16 %v11980_v28, %v11980_v28  ;;  %6644 = vst.msk [vmem:[%s11422_s14 + $0x6c] sm:$0xf] %vm6616_vm4, %v7677_v57  ;;  %v11982_v26 = vmax.f32 %v11252_v25, 0.0  ;;  %v11983_v15 = vmax.f32 %v11256_v5, 0.0  ;;  %6645 = vst.msk [vmem:[%s11422_s14 + $0x70] sm:$0xf] %vm6616_vm4, %v7678_v22 }
 0x55c   : > { %v7684_v9 = vpack.c.bf16 %v11979_v14, %v11979_v14  ;;  %v7686_v56 = vpack.c.bf16 %v11981_v16, %v11981_v16  ;;  %v11984_v48 = vmax.f32 %v11260_v2, 0.0  ;;  %6646 = vst.msk [vmem:[%s11422_s14 + $0x74] sm:$0xf] %vm6616_vm4, %v7679_v45  ;;  %6647 = vst.msk [vmem:[%s11422_s14 + $0x78] sm:$0xf] %vm6616_vm4, %v7680_v24  ;;  %v11985_v42 = vmax.f32 %v11264_v63, 0.0 }
 0x55d   : > { %v7687_v51 = vpack.c.bf16 %v11982_v26, %v11982_v26  ;;  %v7688_v30 = vpack.c.bf16 %v11983_v15, %v11983_v15  ;;  %6648 = vst.msk [vmem:[%s11422_s14 + $0x7c] sm:$0xf] %vm6616_vm4, %v7681_v34  ;;  %v11986_v5 = vmax.f32 %v11268_v3, 0.0  ;;  %v11987_v58 = vmax.f32 %v11272_v29, 0.0  ;;  %6649 = vst.msk [vmem:[%s11422_s14 + $0x80] sm:$0xf] %vm6616_vm4, %v7682_v41 }
 0x55e   : > { %v7689_v50 = vpack.c.bf16 %v11984_v48, %v11984_v48  ;;  %v7690_v25 = vpack.c.bf16 %v11985_v42, %v11985_v42  ;;  %v11989_v0 = vmax.f32 %v11988_v31, 0.0  ;;  %6650 = vst.msk [vmem:[%s11422_s14 + $0x84] sm:$0xf] %vm6616_vm4, %v7683_v11  ;;  %6651 = vst.msk [vmem:[%s11422_s14 + $0x88] sm:$0xf] %vm6616_vm4, %v7684_v9  ;;  %v11990_v63 = vld [vmem:[#allocation19_spill] sm:$0xff] }
 0x55f   : > { %v7691_v2 = vpack.c.bf16 %v11986_v5, %v11986_v5  ;;  %v7692_v55 = vpack.c.bf16 %v11987_v58, %v11987_v58  ;;  %6652 = vst.msk [vmem:[%s11422_s14 + $0x8c] sm:$0xf] %vm6616_vm4, %v7685_v7  ;;  %v11991_v3 = vmax.f32 %v11990_v63, 0.0  ;;  %v11992_v35 = vld [vmem:[#allocation20_spill] sm:$0xff]  ;;  %v11994_v23 = vld [vmem:[#allocation2_spill] sm:$0xff]  ;;  %v11996_v19 = vld [vmem:[#allocation3_spill] sm:$0xff] }
 0x560   : > { %v7693_v53 = vpack.c.bf16 %v11989_v0, %v11989_v0  ;;  %v11993_v49 = vmax.f32 %v11992_v35, 0.0  ;;  %v11995_v21 = vmax.f32 %v11994_v23, 0.0  ;;  %v11997_v10 = vmax.f32 %v11996_v19, 0.0  ;;  %6653 = vst.msk [vmem:[%s11422_s14 + $0x90] sm:$0xf] %vm6616_vm4, %v7686_v56  ;;  %v11998_v6 = vld [vmem:[#allocation4_spill] sm:$0xff] }
 0x561   : > { %v7694_v29 = vpack.c.bf16 %v11991_v3, %v11991_v3  ;;  %6654 = vst.msk [vmem:[%s11422_s14 + $0x94] sm:$0xf] %vm6616_vm4, %v7687_v51  ;;  %6655 = vst.msk [vmem:[%s11422_s14 + $0x98] sm:$0xf] %vm6616_vm4, %v7688_v30  ;;  %v11999_v40 = vmax.f32 %v11998_v6, 0.0  ;;  %v12000_v62 = vmax.f32 %v11300_v37, 0.0 }
 0x562   : > { %v7695_v33 = vpack.c.bf16 %v11993_v49, %v11993_v49  ;;  %v7696_v43 = vpack.c.bf16 %v11995_v21, %v11995_v21  ;;  %v7697_v61 = vpack.c.bf16 %v11997_v10, %v11997_v10  ;;  %6656 = vst.msk [vmem:[%s11422_s14 + $0x9c] sm:$0xf] %vm6616_vm4, %v7689_v50  ;;  %v12001_v57 = vmax.f32 %v11304_v60, 0.0  ;;  %6657 = vst.msk [vmem:[%s11422_s14 + $0xa0] sm:$0xf] %vm6616_vm4, %v7690_v25  ;;  %v12010_v20 = vld [vmem:[#allocation10_spill] sm:$0xff] }
 0x563   : > { %v7698_v1 = vpack.c.bf16 %v11999_v40, %v11999_v40  ;;  %v7699_v59 = vpack.c.bf16 %v12000_v62, %v12000_v62  ;;  %v12002_v22 = vmax.f32 %v11308_v46, 0.0  ;;  %6658 = vst.msk [vmem:[%s11422_s14 + $0xa4] sm:$0xf] %vm6616_vm4, %v7691_v2  ;;  %6659 = vst.msk [vmem:[%s11422_s14 + $0xa8] sm:$0xf] %vm6616_vm4, %v7692_v55  ;;  %v12003_v37 = vmax.f32 %v11312_v44, 0.0 }
 0x564   : > { %v7700_v38 = vpack.c.bf16 %v12001_v57, %v12001_v57  ;;  %6660 = vst.msk [vmem:[%s11422_s14 + $0xac] sm:$0xf] %vm6616_vm4, %v7693_v53  ;;  %v12004_v46 = vmax.f32 %v11935_v54, 0.0  ;;  %v12005_v39 = vmax.f32 %v11936_v32, 0.0  ;;  %v12006_v47 = vmax.f32 %v11937_v27, 0.0  ;;  %v12015_v28 = vld [vmem:[#allocation13_spill] sm:$0xff] }
 0x565   : > { %v7701_v12 = vpack.c.bf16 %v12002_v22, %v12002_v22  ;;  %v7702_v60 = vpack.c.bf16 %v12003_v37, %v12003_v37  ;;  %6661 = vst.msk [vmem:[%s11422_s14 + $0xb0] sm:$0xf] %vm6616_vm4, %v7694_v29  ;;  %6662 = vst.msk [vmem:[%s11422_s14 + $0xb4] sm:$0xf] %vm6616_vm4, %v7695_v33  ;;  %v12007_v44 = vmax.f32 %v11938_v13, 0.0  ;;  %v12008_v27 = vmax.f32 %v11332_v17, 0.0 }
 0x566   : > { %v7703_v45 = vpack.c.bf16 %v12004_v46, %v12004_v46  ;;  %v7704_v24 = vpack.c.bf16 %v12005_v39, %v12005_v39  ;;  %v7705_v34 = vpack.c.bf16 %v12006_v47, %v12006_v47  ;;  %6663 = vst.msk [vmem:[%s11422_s14 + $0xb8] sm:$0xf] %vm6616_vm4, %v7696_v43  ;;  %6664 = vst.msk [vmem:[%s11422_s14 + $0xbc] sm:$0xf] %vm6616_vm4, %v7697_v61  ;;  %v12009_v52 = vmax.f32 %v11939_v8, 0.0  ;;  %v12012_v8 = vld [vmem:[#allocation11_spill] sm:$0xff] }
 0x567   : > { %v7706_v54 = vpack.c.bf16 %v12007_v44, %v12007_v44  ;;  %v7707_v32 = vpack.c.bf16 %v12008_v27, %v12008_v27  ;;  %v12011_v11 = vmax.f32 %v12010_v20, 0.0  ;;  %6665 = vst.msk [vmem:[%s11422_s14 + $0xc0] sm:$0xf] %vm6616_vm4, %v7698_v1  ;;  %6666 = vst.msk [vmem:[%s11422_s14 + $0xc4] sm:$0xf] %vm6616_vm4, %v7699_v59  ;;  %v12013_v17 = vmax.f32 %v12012_v8, 0.0 }
 0x568   : > { %v7708_v41 = vpack.c.bf16 %v12009_v52, %v12009_v52  ;;  %6667 = vst.msk [vmem:[%s11422_s14 + $0xc8] sm:$0xf] %vm6616_vm4, %v7700_v38  ;;  %6668 = vst.msk [vmem:[%s11422_s14 + $0xcc] sm:$0xf] %vm6616_vm4, %v7701_v12  ;;  %v12014_v14 = vmax.f32 %v11942_v4, 0.0  ;;  %v12016_v7 = vmax.f32 %v12015_v28, 0.0 }
 0x569   : > { %v7709_v36 = vpack.c.bf16 %v12011_v11, %v12011_v11  ;;  %v7710_v13 = vpack.c.bf16 %v12013_v17, %v12013_v17  ;;  %v12017_v56 = vmax.f32 %v11356_v18, 0.0  ;;  %6669 = vst.msk [vmem:[%s11422_s14 + $0xd0] sm:$0xf] %vm6616_vm4, %v7702_v60  ;;  %6670 = vst.msk [vmem:[%s11422_s14 + $0xd4] sm:$0xf] %vm6616_vm4, %v7703_v45 }
 0x56a   : > { %v7711_v9 = vpack.c.bf16 %v12014_v14, %v12014_v14  ;;  %v7712_v16 = vpack.c.bf16 %v12016_v7, %v12016_v7  ;;  %6671 = vst.msk [vmem:[%s11422_s14 + $0xd8] sm:$0xf] %vm6616_vm4, %v7704_v24  ;;  %6672 = vst.msk [vmem:[%s11422_s14 + $0xdc] sm:$0xf] %vm6616_vm4, %v7705_v34 }
 0x56b   : > { %v7713_v26 = vpack.c.bf16 %v12017_v56, %v12017_v56  ;;  %6673 = vst.msk [vmem:[%s11422_s14 + $0xe0] sm:$0xf] %vm6616_vm4, %v7706_v54  ;;  %6674 = vst.msk [vmem:[%s11422_s14 + $0xe4] sm:$0xf] %vm6616_vm4, %v7707_v32 }
 0x56c   : > { %6675 = vst.msk [vmem:[%s11422_s14 + $0xe8] sm:$0xf] %vm6616_vm4, %v7708_v41  ;;  %6676 = vst.msk [vmem:[%s11422_s14 + $0xec] sm:$0xf] %vm6616_vm4, %v7709_v36 }
 0x56d   : > { %6677 = vst.msk [vmem:[%s11422_s14 + $0xf0] sm:$0xf] %vm6616_vm4, %v7710_v13  ;;  %6678 = vst.msk [vmem:[%s11422_s14 + $0xf4] sm:$0xf] %vm6616_vm4, %v7711_v9 }
 0x56e   : > { %6679 = vst.msk [vmem:[%s11422_s14 + $0xf8] sm:$0xf] %vm6616_vm4, %v7712_v16  ;;  %6680 = vst.msk [vmem:[%s11422_s14 + $0xfc] sm:$0xf] %vm6616_vm4, %v7713_v26 }
 0x56f PF: > { %s12_s11 = sadd.s32 1, %s8878_s11   ;;  %s12018_s9 = smov %s8874_s10 }
 0x570   : > { %p9_p5 = scmp.ge.s32.totalorder %s12_s11, 4   ;;  %s12019_s10 = smov %s12021_s12 }
 0x572   :  { %11 = sbr.rel (!%p9_p5) target bundleno = 2 (0x2), region = 67 }

// kernel: forward.5
= control target key start
LH: loop header
LB: loop body
LE: loop exit
PB: predicated region body
PF: predicated region fallthrough
CT: control target
= control target key end

     0   :  { %s1464_s9 = smov 0   ;;  %s1466_s10 = smov 0   ;;  %s1639_s0 = inlined_call_operand.vmem [shape: bf16[2,160,128], index: 0, kind: input, shape index: {}]   ;;  %s1640_s1 = inlined_call_operand.vmem [shape: bf16[4,128,16], index: 1, kind: input, shape index: {}]   ;;  %s1641_s2 = inlined_call_operand.vmem [shape: bf16[2,64,16], index: 2, kind: output, shape index: {}]  }
   0x1   :  { %s1468_s11 = smov 0  }
   0x2 LB: > { %s24_s12 = sadd.s32 1, %s1443_s10  ;;  %p1063_p0 = scmp.ge.s32.totalorder %s1447_s11, 1  ;;  %s1447_s11 = sphi %s1468_s11, %s12_s11   ;;  %s1443_s10 = sphi %s1466_s10, %s1643_s10   ;;  %s1439_s9 = sphi %s1464_s9, %s1642_s9  }
   0x3   : > { %p26_p1 = scmp.ge.s32.totalorder %s24_s12, 2  ;;  %p135_p2 = scmp.lt.s32.totalorder %s1447_s11, 3 }
   0x5   : > { %s1645_s12 = smov (%p26_p1, %s24_s12), 0  ;;  %p136_p3 = pnand %p1063_p0, %p135_p2 }
   0x6   : > { %v1375_v0 = vld [vmem:[%s1640_s1 + $0x40] sm:$0xff] (!%p136_p3)   ;;  %p164_p4 = scmp.lt.s32.totalorder (!%p136_p3), %s1439_s9, 1  ;;  %v1377_v2 = vld [vmem:[%s1640_s1 + $0x48] sm:$0xff] (!%p136_p3)   ;;  %v1379_v4 = vld [vmem:[%s1640_s1 + $0x50] sm:$0xff] (!%p136_p3)   ;;  %vm845_vm0 = vcmask (!%p136_p3), 130048   ;;  %vm956_vm1 = vcmask (!%p136_p3), 125952  }
   0x7   : > { %139 = sbr.rel (%p136_p3) target bundleno = 374 (0x176), region = 28  ;;  %v1376_v1 = vld [vmem:[%s1640_s1 + $0x80] sm:$0xff] (!%p136_p3)   ;;  %1230 = vmatprep.subr.bf16.mxu1 (!%p136_p3), %v1375_v0  ;;  %v1378_v3 = vld [vmem:[%s1640_s1 + $0x88] sm:$0xff] (!%p136_p3)   ;;  %v1380_v5 = vld [vmem:[%s1640_s1 + $0x90] sm:$0xff] (!%p136_p3)  }
   0x8   : > { %1278 = vmatprep.subr.bf16.mxu0 (!%p136_p3), %v1376_v1  ;;  %1231 = vmatpush3.bf16.msra.mxu1 (!%p136_p3), %v1375_v0  ;;  %v1381_v6 = vld [vmem:[%s1640_s1 + $0x58] sm:$0xff] (!%p136_p3)   ;;  %v1383_v8 = vld [vmem:[%s1640_s1 + $0x60] sm:$0xff] (!%p136_p3)   ;;  %v1385_v10 = vld [vmem:[%s1640_s1 + $0x68] sm:$0xff] (!%p136_p3)  }
   0x9   : > { %1279 = vmatpush3.bf16.msra.mxu0 (!%p136_p3), %v1376_v1  ;;  %1232 = vmatprep.subr.bf16.mxu1 (!%p136_p3), %v1377_v2  ;;  %v1382_v7 = vld [vmem:[%s1640_s1 + $0x98] sm:$0xff] (!%p136_p3)   ;;  %v1384_v9 = vld [vmem:[%s1640_s1 + $0xa0] sm:$0xff] (!%p136_p3)   ;;  %v1386_v12 = vld [vmem:[%s1640_s1 + $0xa8] sm:$0xff] (!%p136_p3)  }
   0xa   : > { %1280 = vmatprep.subr.bf16.mxu0 (!%p136_p3), %v1378_v3  ;;  %v1387_v14 = vld [vmem:[%s1640_s1 + $0x70] sm:$0xff] (!%p136_p3)   ;;  %v1389_v16 = vld [vmem:[%s1640_s1 + $0x78] sm:$0xff] (!%p136_p3)   ;;  %v1392_v18 = vld [vmem:[%s1640_s1] sm:$0xff] (!%p136_p3)  }
   0xb   : > { %v1388_v15 = vld [vmem:[%s1640_s1 + $0xb0] sm:$0xff] (!%p136_p3)   ;;  %v1390_v17 = vld [vmem:[%s1640_s1 + $0xb8] sm:$0xff] (!%p136_p3)   ;;  %v1394_v19 = vld [vmem:[%s1640_s1 + $0xc0] sm:$0xff] (!%p136_p3)  }
   0xc   : > { %1233 = vmatpush3.bf16.msra.mxu1 (!%p136_p3), %v1377_v2  ;;  %v1397_v22 = vld [vmem:[%s1640_s1 + $0x8] sm:$0xff] (!%p136_p3)   ;;  %v1399_v26 = vld [vmem:[%s1640_s1 + $0x10] sm:$0xff] (!%p136_p3)   ;;  %v1401_v28 = vld [vmem:[%s1640_s1 + $0x18] sm:$0xff] (!%p136_p3)  }
   0xd   : > { %1281 = vmatpush3.bf16.msra.mxu0 (!%p136_p3), %v1378_v3  ;;  %1234 = vmatprep.subr.bf16.mxu1 (!%p136_p3), %v1379_v4  ;;  %v1398_v23 = vld [vmem:[%s1640_s1 + $0xc8] sm:$0xff] (!%p136_p3)   ;;  %v1400_v27 = vld [vmem:[%s1640_s1 + $0xd0] sm:$0xff] (!%p136_p3)   ;;  %v1402_v31 = vld [vmem:[%s1640_s1 + $0xd8] sm:$0xff] (!%p136_p3)  }
   0xe   : > { %s1647_s9 = smov (!%p164_p4, %s1439_s9), 1  ;;  %1282 = vmatprep.subr.bf16.mxu0 %v1380_v5  ;;  %v1403_v34 = vld [vmem:[%s1640_s1 + $0x20] sm:$0xff]   ;;  %v1405_v36 = vld [vmem:[%s1640_s1 + $0x28] sm:$0xff]   ;;  %v1410_v38 = vld [vmem:[%s1640_s1 + $0x30] sm:$0xff]  }
   0xf   : > { %s1350_s29 = smul.u32 80, %s1647_s9  ;;  %v1404_v35 = vld [vmem:[%s1640_s1 + $0xe0] sm:$0xff]   ;;  %v1406_v37 = vld [vmem:[%s1640_s1 + $0xe8] sm:$0xff]   ;;  %v1412_v39 = vld [vmem:[%s1640_s1 + $0xf0] sm:$0xff]  }
  0x10   : > { %1235 = vmatpush3.bf16.msra.mxu1 %v1379_v4  ;;  %v1413_v40 = vld [vmem:[%s1640_s1 + $0x38] sm:$0xff]  }
  0x11   : > { %1283 = vmatpush3.bf16.msra.mxu0 %v1380_v5  ;;  %1236 = vmatprep.subr.bf16.mxu1 %v1381_v6  ;;  %s1518_s8 = scalar_lea.vmem %s1639_s0, %s1350_s29  ;;  %v1414_v41 = vld [vmem:[%s1640_s1 + $0xf8] sm:$0xff]  }
  0x12   : > { %1284 = vmatprep.subr.bf16.mxu0 %v1382_v7  ;;  %v1391_v11 = vld [vmem:[%s1518_s8 + $0x28] sm:$0xff]   ;;  %v1395_v20 = vld [vmem:[%s1518_s8 + $0x30] sm:$0xff]   ;;  %v1407_v24 = vld [vmem:[%s1518_s8 + $0x38] sm:$0xff]  }
  0x13   : > { %1246 = vmatprep.mubr.bf16.mxu1 %v1391_v11  ;;  %v1393_v13 = vld [vmem:[%s1518_s8 + $0x8] sm:$0xff]   ;;  %v1396_v21 = vld [vmem:[%s1518_s8 + $0x10] sm:$0xff]   ;;  %v1408_v25 = vld [vmem:[%s1518_s8 + $0x18] sm:$0xff]  }
  0x14   : > { %1237 = vmatpush3.bf16.msra.mxu1 %v1381_v6  ;;  %1294 = vmatprep.mubr.bf16.mxu0 %v1393_v13  ;;  %v1409_v29 = vld [vmem:[%s1518_s8 + $0x40] sm:$0xff]   ;;  %v1416_v33 = vld [vmem:[%s1518_s8 + $0x30] sm:$0xff]   ;;  %v1417_v42 = vld [vmem:[%s1518_s8 + $0x8] sm:$0xff]  }
  0x15   : > { %1285 = vmatpush3.bf16.msra.mxu0 %v1382_v7  ;;  %1238 = vmatprep.subr.bf16.mxu1 %v1383_v8  ;;  %v1411_v30 = vld [vmem:[%s1518_s8 + $0x20] sm:$0xff]   ;;  %v1418_v43 = vld [vmem:[%s1518_s8 + $0x38] sm:$0xff]   ;;  %v1419_v44 = vld [vmem:[%s1518_s8 + $0x10] sm:$0xff]  }
  0x16   : > { %1286 = vmatprep.subr.bf16.mxu0 %v1384_v9  ;;  %v1415_v32 = vld [vmem:[%s1518_s8] sm:$0xff]   ;;  %v1421_v46 = vld [vmem:[%s1518_s8 + $0x18] sm:$0xff]   ;;  %v1422_v47 = vld [vmem:[%s1518_s8 + $0x48] sm:$0xff]  }
  0x17   : > { %v1420_v45 = vld [vmem:[%s1518_s8 + $0x40] sm:$0xff]   ;;  %s1173_s8 = sshll.u32 %s1647_s9, 5 }
  0x18   : > { %1239 = vmatpush3.bf16.msra.mxu1 %v1383_v8  ;;  %s180_s13 = scalar_lea.vmem %s1641_s2, %s1173_s8 }
  0x19   : > { %1287 = vmatpush3.bf16.msra.mxu0 %v1384_v9  ;;  %1240 = vmatprep.subr.bf16.mxu1 %v1385_v10 }
  0x1a   : > { %1288 = vmatprep.subr.bf16.mxu0 %v1386_v12 }
  0x1c   : > { %1241 = vmatpush3.bf16.msra.mxu1 %v1385_v10 }
  0x1d   : > { %1289 = vmatpush3.bf16.msra.mxu0 %v1386_v12  ;;  %1242 = vmatprep.subr.bf16.mxu1 %v1387_v14 }
  0x1e   : > { %1290 = vmatprep.subr.bf16.mxu0 %v1388_v15 }
  0x20   : > { %1243 = vmatpush3.bf16.msra.mxu1 %v1387_v14 }
  0x21   : > { %1291 = vmatpush3.bf16.msra.mxu0 %v1388_v15  ;;  %1244 = vmatprep.subr.bf16.mxu1 %v1389_v16 }
  0x22   : > { %1292 = vmatprep.subr.bf16.mxu0 %v1390_v17 }
  0x24   : > { %1245 = vmatpush3.bf16.msra.mxu1 %v1389_v16 }
  0x25   : > { %1293 = vmatpush3.bf16.msra.mxu0 %v1390_v17  ;;  %1254 = vmatprep.subr.bf16.mxu1 %v1392_v18 }
  0x26   : > { %1302 = vmatprep.subr.bf16.mxu0 %v1394_v19 }
  0x27   : > { %1247 = vmatmul.mubr.bf16.vlgmr.msra.gmra.mrb[0].mxu1 %v1395_v20 }
  0x28   : > { %1255 = vmatpush3.bf16.msra.mxu1 %v1392_v18  ;;  %1295 = vmatmul.mubr.bf16.vlgmr.msra.gmra.mrb[0].mxu0 %v1396_v21 }
  0x29   : > { %1303 = vmatpush3.bf16.msra.mxu0 %v1394_v19  ;;  %1256 = vmatprep.subr.bf16.mxu1 %v1397_v22 }
  0x2a   : > { %1304 = vmatprep.subr.bf16.mxu0 %v1398_v23  ;;  %1250 = vmatprep.mubr.bf16.mxu1 %v1407_v24 }
  0x2b   : > { %1298 = vmatprep.mubr.bf16.mxu0 %v1408_v25 }
  0x2c   : > { %1257 = vmatpush3.bf16.msra.mxu1 %v1397_v22 }
  0x2d   : > { %1305 = vmatpush3.bf16.msra.mxu0 %v1398_v23  ;;  %1258 = vmatprep.subr.bf16.mxu1 %v1399_v26 }
  0x2e   : > { %1306 = vmatprep.subr.bf16.mxu0 %v1400_v27 }
  0x2f   : > { %1251 = vmatmul.mubr.bf16.gmra.mrb[4].mxu1 %v1409_v29 }
  0x30   : > { %1259 = vmatpush3.bf16.msra.mxu1 %v1399_v26  ;;  %1299 = vmatmul.mubr.bf16.gmra.mrb[4].mxu0 %v1411_v30 }
  0x31   : > { %1307 = vmatpush3.bf16.msra.mxu0 %v1400_v27  ;;  %1260 = vmatprep.subr.bf16.mxu1 %v1401_v28 }
  0x32   : > { %1308 = vmatprep.subr.bf16.mxu0 %v1402_v31  ;;  %1270 = vmatprep.mubr.bf16.mxu1 %v1415_v32 }
  0x33   : > { %1318 = vmatprep.mubr.bf16.mxu0 %v1416_v33 }
  0x34   : > { %1261 = vmatpush3.bf16.msra.mxu1 %v1401_v28 }
  0x35   : > { %1309 = vmatpush3.bf16.msra.mxu0 %v1402_v31  ;;  %1262 = vmatprep.subr.bf16.mxu1 %v1403_v34 }
  0x36   : > { %1310 = vmatprep.subr.bf16.mxu0 %v1404_v35 }
  0x38   : > { %1263 = vmatpush3.bf16.msra.mxu1 %v1403_v34 }
  0x39   : > { %1311 = vmatpush3.bf16.msra.mxu0 %v1404_v35  ;;  %1264 = vmatprep.subr.bf16.mxu1 %v1405_v36 }
  0x3a   : > { %1312 = vmatprep.subr.bf16.mxu0 %v1406_v37 }
  0x3c   : > { %1265 = vmatpush3.bf16.msra.mxu1 %v1405_v36 }
  0x3d   : > { %1313 = vmatpush3.bf16.msra.mxu0 %v1406_v37  ;;  %1266 = vmatprep.subr.bf16.mxu1 %v1410_v38 }
  0x3e   : > { %1314 = vmatprep.subr.bf16.mxu0 %v1412_v39 }
  0x40   : > { %1267 = vmatpush3.bf16.msra.mxu1 %v1410_v38 }
  0x41   : > { %1315 = vmatpush3.bf16.msra.mxu0 %v1412_v39  ;;  %1268 = vmatprep.subr.bf16.mxu1 %v1413_v40 }
  0x42   : > { %1316 = vmatprep.subr.bf16.mxu0 %v1414_v41 }
  0x44   : > { %1269 = vmatpush3.bf16.msra.mxu1 %v1413_v40 }
  0x45   : > { %1317 = vmatpush3.bf16.msra.mxu0 %v1414_v41 }
  0x47   : > { %1271 = vmatmul.mubr.bf16.vlgmr.msra.gmra.mrb[0].mxu1 %v1417_v42 }
  0x48   : > { %1319 = vmatmul.mubr.bf16.vlgmr.msra.gmra.mrb[0].mxu0 %v1418_v43  ;;  %1274 = vmatprep.mubr.bf16.mxu1 %v1419_v44 }
  0x49   : > { %1322 = vmatprep.mubr.bf16.mxu0 %v1420_v45 }
  0x4f   : > { %1275 = vmatmul.mubr.bf16.gmra.mrb[4].mxu1 %v1421_v46 }
  0x50   : > { %1323 = vmatmul.mubr.bf16.gmra.mrb[4].mxu0 %v1422_v47 }
 0x11a   : > { %v1272_v48 = vpop.f32.mrb[0].mxu1 }
 0x11b   : > { %v1320_v49 = vpop.f32.mrb[0].mxu0  ;;  %v474_v50 = vpop.f32.mrb[1].mxu1 }
 0x11c   : > { %v1326_v51 = vadd.f32 %v1320_v49, %v1272_v48  ;;  %v806_v52 = vpop.f32.mrb[1].mxu0  ;;  %v1273_v53 = vpop.f32.mrb[2].mxu1 }
 0x11d   : > { %v1327_v54 = vadd.f32 %v806_v52, %v474_v50  ;;  %v1321_v55 = vpop.f32.mrb[2].mxu0  ;;  %v477_v56 = vpop.f32.mrb[3].mxu1 }
 0x11e   : > { %v1328_v57 = vadd.f32 %v1321_v55, %v1273_v53  ;;  %v809_v58 = vpop.f32.mrb[3].mxu0  ;;  %v849_v0 = vsel %vm845_vm0, %v1326_v51, 0.0 }
 0x11f   : > { %v1329_v59 = vadd.f32 %v809_v58, %v477_v56  ;;  %v846_v60 = vsel %vm845_vm0, %v1327_v54, 0.0 }
 0x120   : > { %v851_v7 = vsel %vm845_vm0, %v1328_v57, 0.0 }
 0x121   : > { %v847_v61 = vsel %vm845_vm0, %v1329_v59, 0.0 }
 0x122   : > { %v848_v62 = vadd.f32 %v847_v61, %v846_v60  ;;  %v1276_v63 = vpop.f32.mrb[4].mxu1 }
 0x123   : > { %v1324_v1 = vpop.f32.mrb[4].mxu0  ;;  %v490_v2 = vpop.f32.mrb[5].mxu1 }
 0x124   : > { %v850_v3 = vadd.f32 %v849_v0, %v848_v62  ;;  %v1330_v4 = vadd.f32 %v1324_v1, %v1276_v63  ;;  %v822_v5 = vpop.f32.mrb[5].mxu0  ;;  %v1277_v6 = vpop.f32.mrb[6].mxu1 }
 0x125   : > { %v1331_v8 = vadd.f32 %v822_v5, %v490_v2  ;;  %v1325_v9 = vpop.f32.mrb[6].mxu0  ;;  %v493_v10 = vpop.f32.mrb[7].mxu1 }
 0x126   : > { %v852_v11 = vadd.f32 %v851_v7, %v850_v3  ;;  %v1332_v12 = vadd.f32 %v1325_v9, %v1277_v6  ;;  %v825_v13 = vpop.f32.mrb[7].mxu0  ;;  %v857_v19 = vsel %vm845_vm0, %v1330_v4, 0.0 }
 0x127   : > { %v853_v14 = vsel %vm845_vm0, %v1331_v8, 0.0  ;;  %v1333_v15 = vadd.f32 %v825_v13, %v493_v10 }
 0x128   : > { %v854_v16 = vadd.f32 %v853_v14, %v852_v11  ;;  %v859_v21 = vsel %vm845_vm0, %v1332_v12, 0.0 }
 0x129   : > { %v855_v17 = vsel %vm845_vm0, %v1333_v15, 0.0 }
 0x12a   : > { %v856_v18 = vadd.f32 %v855_v17, %v854_v16 }
 0x12c   : > { %v858_v20 = vadd.f32 %v857_v19, %v856_v18 }
 0x12e   : > { %v860_v22 = vadd.f32 %v859_v21, %v858_v20 }
 0x130   : > { %v861_v23 = vrot.slane %v860_v22, 4 }
 0x132   : > { %v862_v24 = vadd.f32 %v861_v23, %v860_v22 }
 0x134   : > { %v863_v25 = vrot.slane %v862_v24, 2 }
 0x136   : > { %v864_v26 = vadd.f32 %v863_v25, %v862_v24 }
 0x138   : > { %v865_v27 = vrot.slane %v864_v26, 1 }
 0x13a   : > { %v866_v28 = vadd.f32 %v865_v27, %v864_v26 }
 0x13c   : > { %v867_v29 = vmul.f32 0.015625, %v866_v28 }
 0x13e   : > { %v868_v30 = vsub.f32 %v1327_v54, %v867_v29  ;;  %v869_v31 = vsub.f32 %v1329_v59, %v867_v29  ;;  %v870_v32 = vsub.f32 %v1326_v51, %v867_v29  ;;  %v871_v33 = vsub.f32 %v1328_v57, %v867_v29 }
 0x13f   : > { %v872_v34 = vsub.f32 %v1331_v8, %v867_v29  ;;  %v873_v35 = vsub.f32 %v1333_v15, %v867_v29  ;;  %v874_v36 = vsub.f32 %v1330_v4, %v867_v29  ;;  %v875_v37 = vsub.f32 %v1332_v12, %v867_v29 }
 0x140   : > { %v876_v38 = vmul.f32 %v868_v30, %v868_v30  ;;  %v877_v39 = vmul.f32 %v869_v31, %v869_v31  ;;  %v878_v40 = vmul.f32 %v870_v32, %v870_v32  ;;  %v879_v41 = vmul.f32 %v871_v33, %v871_v33 }
 0x141   : > { %v880_v45 = vmul.f32 %v872_v34, %v872_v34  ;;  %v881_v48 = vmul.f32 %v873_v35, %v873_v35  ;;  %v882_v51 = vmul.f32 %v874_v36, %v874_v36  ;;  %v883_v54 = vmul.f32 %v875_v37, %v875_v37 }
 0x142   : > { %v884_v42 = vsel %vm845_vm0, %v876_v38, 0.0  ;;  %v885_v43 = vsel %vm845_vm0, %v877_v39, 0.0  ;;  %v887_v46 = vsel %vm845_vm0, %v878_v40, 0.0  ;;  %v889_v49 = vsel %vm845_vm0, %v879_v41, 0.0 }
 0x143   : > { %v886_v44 = vadd.f32 %v885_v43, %v884_v42  ;;  %v891_v52 = vsel %vm845_vm0, %v880_v45, 0.0  ;;  %v893_v55 = vsel %vm845_vm0, %v881_v48, 0.0  ;;  %v895_v57 = vsel %vm845_vm0, %v882_v51, 0.0 }
 0x144   : > { %v897_v59 = vsel %vm845_vm0, %v883_v54, 0.0 }
 0x145   : > { %v888_v47 = vadd.f32 %v887_v46, %v886_v44 }
 0x147   : > { %v890_v50 = vadd.f32 %v889_v49, %v888_v47 }
 0x149   : > { %v892_v53 = vadd.f32 %v891_v52, %v890_v50 }
 0x14b   : > { %v894_v56 = vadd.f32 %v893_v55, %v892_v53 }
 0x14d   : > { %v896_v58 = vadd.f32 %v895_v57, %v894_v56 }
 0x14f   : > { %v898_v60 = vadd.f32 %v897_v59, %v896_v58 }
 0x151   : > { %v899_v61 = vrot.slane %v898_v60, 4 }
 0x153   : > { %v900_v62 = vadd.f32 %v899_v61, %v898_v60 }
 0x155   : > { %v901_v63 = vrot.slane %v900_v62, 2 }
 0x157   : > { %v902_v0 = vadd.f32 %v901_v63, %v900_v62 }
 0x159   : > { %v903_v1 = vrot.slane %v902_v0, 1 }
 0x15b   : > { %v904_v2 = vadd.f32 %v903_v1, %v902_v0 }
 0x15d   : > { %v905_v3 = vmul.f32 0.015625, %v904_v2 }
 0x15f   : > { %v906_v4 = vadd.f32 1e-05, %v905_v3 }
 0x161   : > { %1423 = vrsqrt.f32 %v906_v4 }
 0x16b   : > { %v1424_v5 = vpop.eup %1423 }
 0x16c   : > { %v908_v6 = vmul.f32 %v1424_v5, %v868_v30  ;;  %v909_v7 = vmul.f32 %v1424_v5, %v869_v31  ;;  %v910_v8 = vmul.f32 %v1424_v5, %v870_v32  ;;  %v911_v9 = vmul.f32 %v1424_v5, %v871_v33 }
 0x16d   : > { %v912_v10 = vmul.f32 %v1424_v5, %v872_v34  ;;  %v913_v11 = vmul.f32 %v1424_v5, %v873_v35  ;;  %v914_v12 = vmul.f32 %v1424_v5, %v874_v36  ;;  %v915_v13 = vmul.f32 %v1424_v5, %v875_v37 }
 0x16e   : > { %v916_v14 = vmax.f32 %v908_v6, 0.0  ;;  %v917_v15 = vmax.f32 %v909_v7, 0.0  ;;  %v918_v16 = vmax.f32 %v910_v8, 0.0  ;;  %v919_v17 = vmax.f32 %v911_v9, 0.0 }
 0x16f   : > { %v920_v18 = vmax.f32 %v912_v10, 0.0  ;;  %v921_v19 = vmax.f32 %v913_v11, 0.0  ;;  %v922_v20 = vmax.f32 %v914_v12, 0.0  ;;  %v923_v21 = vmax.f32 %v915_v13, 0.0 }
 0x170   : > { %v1174_v22 = vpack.c.bf16 %v916_v14, %v916_v14  ;;  %v1175_v23 = vpack.c.bf16 %v917_v15, %v917_v15  ;;  %v1176_v24 = vpack.c.bf16 %v918_v16, %v918_v16  ;;  %v1177_v25 = vpack.c.bf16 %v919_v17, %v919_v17 }
 0x171   : > { %v1178_v26 = vpack.c.bf16 %v920_v18, %v920_v18  ;;  %v1179_v27 = vpack.c.bf16 %v921_v19, %v921_v19  ;;  %v1180_v28 = vpack.c.bf16 %v922_v20, %v922_v20  ;;  %v1181_v29 = vpack.c.bf16 %v923_v21, %v923_v21 }
 0x172   : > { %957 = vst.msk [vmem:[%s180_s13] sm:$0xf] %vm956_vm1, %v1174_v22  ;;  %958 = vst.msk [vmem:[%s180_s13 + $0x4] sm:$0xf] %vm956_vm1, %v1175_v23 }
 0x173   : > { %959 = vst.msk [vmem:[%s180_s13 + $0x8] sm:$0xf] %vm956_vm1, %v1176_v24  ;;  %960 = vst.msk [vmem:[%s180_s13 + $0xc] sm:$0xf] %vm956_vm1, %v1177_v25 }
 0x174   : > { %961 = vst.msk [vmem:[%s180_s13 + $0x10] sm:$0xf] %vm956_vm1, %v1178_v26  ;;  %962 = vst.msk [vmem:[%s180_s13 + $0x14] sm:$0xf] %vm956_vm1, %v1179_v27 }
 0x175   : > { %963 = vst.msk [vmem:[%s180_s13 + $0x18] sm:$0xf] %vm956_vm1, %v1180_v28  ;;  %964 = vst.msk [vmem:[%s180_s13 + $0x1c] sm:$0xf] %vm956_vm1, %v1181_v29 }
 0x176 PF: > { %s12_s11 = sadd.s32 1, %s1447_s11   ;;  %s1642_s9 = smov %s1443_s10 }
 0x177   : > { %p9_p5 = scmp.ge.s32.totalorder %s12_s11, 4   ;;  %s1643_s10 = smov %s1645_s12 }
 0x179   :  { %11 = sbr.rel (!%p9_p5) target bundleno = 2 (0x2), region = 64 }

// kernel: forward.6
= control target key start
LH: loop header
LB: loop body
LE: loop exit
PB: predicated region body
PF: predicated region fallthrough
CT: control target
= control target key end

     0   :  { %s1214_s9 = smov 0   ;;  %s1216_s10 = smov 0   ;;  %s1418_s0 = inlined_call_operand.vmem [shape: bf16[2,96,144], index: 0, kind: input, shape index: {}]   ;;  %s1419_s1 = inlined_call_operand.vmem [shape: bf16[3,144,16], index: 1, kind: input, shape index: {}]   ;;  %s1420_s2 = inlined_call_operand.vmem [shape: bf16[2,64,16], index: 2, kind: output, shape index: {}]  }
   0x1   :  { %s1218_s11 = smov 0  }
   0x2 LB: > { %s24_s12 = sadd.s32 1, %s1192_s10  ;;  %p947_p0 = scmp.ge.s32.totalorder %s1196_s11, 1  ;;  %s1196_s11 = sphi %s1218_s11, %s12_s11   ;;  %s1192_s10 = sphi %s1216_s10, %s1422_s10   ;;  %s1188_s9 = sphi %s1214_s9, %s1421_s9  }
   0x3   : > { %p26_p1 = scmp.ge.s32.totalorder %s24_s12, 2  ;;  %p135_p2 = scmp.lt.s32.totalorder %s1196_s11, 3 }
   0x5   : > { %s1424_s12 = smov (%p26_p1, %s24_s12), 0  ;;  %p136_p3 = pnand %p947_p0, %p135_p2 }
   0x6   : > { %v1127_v0 = vld [vmem:[%s1419_s1 + $0x48] sm:$0xff] (!%p136_p3)   ;;  %v1198_v1 = vmov (!%p136_p3), 0   ;;  %v1128_v2 = vld [vmem:[%s1419_s1] sm:$0xff] (!%p136_p3)   ;;  %v1129_v3 = vld [vmem:[%s1419_s1 + $0x50] sm:$0xff] (!%p136_p3)   ;;  %p164_p4 = scmp.lt.s32.totalorder (!%p136_p3), %s1188_s9, 1  ;;  %vm319_vm0 = vcmask (!%p136_p3), 130048  }
   0x7   : > { %139 = sbr.rel (%p136_p3) target bundleno = 384 (0x180), region = 28  ;;  %332 = vmatprep.subr.bf16.mxu1 (!%p136_p3), %v1198_v1  ;;  %463 = vmatprep.subr.bf16.mxu0 (!%p136_p3), %v1198_v1  ;;  %v1130_v4 = vld [vmem:[%s1419_s1 + $0x8] sm:$0xff] (!%p136_p3)   ;;  %v1131_v5 = vld [vmem:[%s1419_s1 + $0x58] sm:$0xff] (!%p136_p3)   ;;  %v1132_v6 = vld [vmem:[%s1419_s1 + $0x10] sm:$0xff] (!%p136_p3)   ;;  %vm840_vm1 = vcmask (!%p136_p3), 125952  }
   0x8   : > { %333 = vmatpush1.bf16.msra.mxu1 (!%p136_p3), %v1127_v0  ;;  %464 = vmatpush1.bf16.msra.mxu0 (!%p136_p3), %v1128_v2  ;;  %v1133_v7 = vld [vmem:[%s1419_s1 + $0x60] sm:$0xff] (!%p136_p3)   ;;  %v1134_v8 = vld [vmem:[%s1419_s1 + $0x18] sm:$0xff] (!%p136_p3)   ;;  %v1135_v9 = vld [vmem:[%s1419_s1 + $0x68] sm:$0xff] (!%p136_p3)  }
   0x9   : > { %334 = vmatprep.subr.bf16.mxu1 (!%p136_p3), %v1198_v1  ;;  %465 = vmatprep.subr.bf16.mxu0 (!%p136_p3), %v1198_v1  ;;  %v1136_v10 = vld [vmem:[%s1419_s1 + $0x20] sm:$0xff] (!%p136_p3)   ;;  %v1137_v11 = vld [vmem:[%s1419_s1 + $0x70] sm:$0xff] (!%p136_p3)   ;;  %v1138_v12 = vld [vmem:[%s1419_s1 + $0x28] sm:$0xff] (!%p136_p3)  }
   0xa   : > { %v1139_v15 = vld [vmem:[%s1419_s1 + $0x78] sm:$0xff] (!%p136_p3)   ;;  %v1140_v16 = vld [vmem:[%s1419_s1 + $0x30] sm:$0xff] (!%p136_p3)   ;;  %v1141_v17 = vld [vmem:[%s1419_s1 + $0x80] sm:$0xff] (!%p136_p3)  }
   0xb   : > { %v1142_v18 = vld [vmem:[%s1419_s1 + $0x38] sm:$0xff] (!%p136_p3)   ;;  %v1143_v19 = vld [vmem:[%s1419_s1 + $0x88] sm:$0xff] (!%p136_p3)   ;;  %v1144_v20 = vld [vmem:[%s1419_s1 + $0x40] sm:$0xff] (!%p136_p3)  }
   0xc   : > { %335 = vmatpush1.bf16.msra.mxu1 (!%p136_p3), %v1129_v3  ;;  %466 = vmatpush1.bf16.msra.mxu0 (!%p136_p3), %v1130_v4  ;;  %v1151_v23 = vld [vmem:[%s1419_s1 + $0x90] sm:$0xff] (!%p136_p3)   ;;  %v1152_v25 = vld [vmem:[%s1419_s1 + $0x98] sm:$0xff] (!%p136_p3)   ;;  %v1155_v27 = vld [vmem:[%s1419_s1 + $0xa0] sm:$0xff] (!%p136_p3)  }
   0xd   : > { %336 = vmatprep.subr.bf16.mxu1 (!%p136_p3), %v1198_v1  ;;  %467 = vmatprep.subr.bf16.mxu0 (!%p136_p3), %v1198_v1  ;;  %v1157_v29 = vld [vmem:[%s1419_s1 + $0xa8] sm:$0xff] (!%p136_p3)   ;;  %v1160_v31 = vld [vmem:[%s1419_s1 + $0xb0] sm:$0xff] (!%p136_p3)   ;;  %v1162_v33 = vld [vmem:[%s1419_s1 + $0xb8] sm:$0xff] (!%p136_p3)  }
   0xe   : > { %s1426_s9 = smov (!%p164_p4, %s1188_s9), 1  ;;  %v1165_v35 = vld [vmem:[%s1419_s1 + $0xc0] sm:$0xff]   ;;  %v1167_v36 = vld [vmem:[%s1419_s1 + $0xc8] sm:$0xff]   ;;  %v1168_v37 = vld [vmem:[%s1419_s1 + $0xd0] sm:$0xff]  }
   0xf   : > { %s1101_s29 = smul.u32 96, %s1426_s9 }
  0x10   : > { %337 = vmatpush1.bf16.msra.mxu1 %v1131_v5  ;;  %468 = vmatpush1.bf16.msra.mxu0 %v1132_v6 }
  0x11   : > { %338 = vmatprep.subr.bf16.mxu1 %v1198_v1  ;;  %469 = vmatprep.subr.bf16.mxu0 %v1198_v1  ;;  %s1278_s8 = scalar_lea.vmem %s1418_s0, %s1101_s29 }
  0x12   : > { %v1147_v13 = vld [vmem:[%s1278_s8 + $0x14] ss:$8 sps:$4 sm:$0xff]   ;;  %v1150_v14 = vld [vmem:[%s1278_s8 + $0x4] ss:$8 sps:$4 sm:$0xff]   ;;  %v1145_v21 = vld [vmem:[%s1278_s8 + $0x10] ss:$8 sps:$4 sm:$0xff]  }
  0x13   : > { %986 = vmatprep.mubr.msk.bf16.mxu1 %vm319_vm0, %v1147_v13  ;;  %1001 = vmatprep.mubr.msk.bf16.mxu0 %vm319_vm0, %v1150_v14  ;;  %v1148_v22 = vld [vmem:[%s1278_s8] ss:$8 sps:$4 sm:$0xff]   ;;  %v1153_v24 = vld [vmem:[%s1278_s8 + $0x24] ss:$8 sps:$4 sm:$0xff]   ;;  %v1158_v28 = vld [vmem:[%s1278_s8 + $0x34] ss:$8 sps:$4 sm:$0xff]  }
  0x14   : > { %339 = vmatpush1.bf16.msra.mxu1 %v1133_v7  ;;  %470 = vmatpush1.bf16.msra.mxu0 %v1134_v8  ;;  %v1156_v26 = vld [vmem:[%s1278_s8 + $0x20] ss:$8 sps:$4 sm:$0xff]   ;;  %v1161_v30 = vld [vmem:[%s1278_s8 + $0x30] ss:$8 sps:$4 sm:$0xff]   ;;  %v1163_v32 = vld [vmem:[%s1278_s8 + $0x44] ss:$8 sps:$4 sm:$0xff]  }
  0x15   : > { %340 = vmatprep.subr.bf16.mxu1 %v1198_v1  ;;  %471 = vmatprep.subr.bf16.mxu0 %v1198_v1  ;;  %v1166_v34 = vld [vmem:[%s1278_s8 + $0x40] ss:$8 sps:$4 sm:$0xff]   ;;  %v1169_v38 = vld [vmem:[%s1278_s8 + $0x54] ss:$8 sps:$4 sm:$0xff]   ;;  %v1171_v39 = vld [vmem:[%s1278_s8 + $0x50] ss:$8 sps:$4 sm:$0xff]  }
  0x16   : > { %s1054_s8 = sshll.u32 %s1426_s9, 5 }
  0x17   : > { %s180_s26 = scalar_lea.vmem %s1420_s2, %s1054_s8 }
  0x18   : > { %341 = vmatpush1.bf16.msra.mxu1 %v1135_v9  ;;  %472 = vmatpush1.bf16.msra.mxu0 %v1136_v10 }
  0x19   : > { %342 = vmatprep.subr.bf16.mxu1 %v1198_v1  ;;  %473 = vmatprep.subr.bf16.mxu0 %v1198_v1 }
  0x1c   : > { %343 = vmatpush1.bf16.msra.mxu1 %v1137_v11  ;;  %474 = vmatpush1.bf16.msra.mxu0 %v1138_v12 }
  0x1d   : > { %344 = vmatprep.subr.bf16.mxu1 %v1198_v1  ;;  %475 = vmatprep.subr.bf16.mxu0 %v1198_v1 }
  0x20   : > { %345 = vmatpush1.bf16.msra.mxu1 %v1139_v15  ;;  %476 = vmatpush1.bf16.msra.mxu0 %v1140_v16 }
  0x21   : > { %346 = vmatprep.subr.bf16.mxu1 %v1198_v1  ;;  %477 = vmatprep.subr.bf16.mxu0 %v1198_v1 }
  0x24   : > { %347 = vmatpush1.bf16.msra.mxu1 %v1141_v17  ;;  %478 = vmatpush1.bf16.msra.mxu0 %v1142_v18 }
  0x25   : > { %348 = vmatprep.subr.bf16.mxu1 %v1198_v1  ;;  %479 = vmatprep.subr.bf16.mxu0 %v1198_v1 }
  0x28   : > { %349 = vmatpush1.bf16.msra.mxu1 %v1143_v19  ;;  %480 = vmatpush1.bf16.msra.mxu0 %v1144_v20 }
  0x29   : > { %1063 = vmatprep.subr.bf16.mxu1 %v1198_v1  ;;  %657 = vmatprep.subr.bf16.mxu0 %v1198_v1 }
  0x2b   : > { %365 = vmatmul.mubr.bf16.vlgmr.msra.gmra.mrb[0].mxu1 %v1145_v21  ;;  %496 = vmatmul.mubr.bf16.vlgmr.msra.gmra.mrb[0].mxu0 %v1148_v22 }
  0x2c   : > { %1072 = vmatpush1.bf16.msra.mxu1 %v1151_v23  ;;  %658 = vmatpush1.bf16.msra.mxu0 %v1151_v23 }
  0x2d   : > { %1064 = vmatprep.subr.bf16.mxu1 %v1198_v1  ;;  %659 = vmatprep.subr.bf16.mxu0 %v1198_v1 }
  0x2e   : > { %1002 = vmatprep.mubr.msk.bf16.mxu0 %vm319_vm0, %v1147_v13  ;;  %987 = vmatprep.mubr.msk.bf16.mxu1 %vm319_vm0, %v1153_v24 }
  0x30   : > { %1073 = vmatpush1.bf16.msra.mxu1 %v1152_v25  ;;  %660 = vmatpush1.bf16.msra.mxu0 %v1152_v25 }
  0x31   : > { %1065 = vmatprep.subr.bf16.mxu1 %v1198_v1  ;;  %661 = vmatprep.subr.bf16.mxu0 %v1198_v1 }
  0x33   : > { %373 = vmatmul.mubr.bf16.gmra.mrb[4].mxu1 %v1156_v26  ;;  %504 = vmatmul.mubr.bf16.gmra.mrb[4].mxu0 %v1145_v21 }
  0x34   : > { %1074 = vmatpush1.bf16.msra.mxu1 %v1155_v27  ;;  %662 = vmatpush1.bf16.msra.mxu0 %v1155_v27 }
  0x35   : > { %1066 = vmatprep.subr.bf16.mxu1 %v1198_v1  ;;  %663 = vmatprep.subr.bf16.mxu0 %v1198_v1 }
  0x36   : > { %1003 = vmatprep.mubr.msk.bf16.mxu0 %vm319_vm0, %v1153_v24  ;;  %988 = vmatprep.mubr.msk.bf16.mxu1 %vm319_vm0, %v1158_v28 }
  0x38   : > { %1075 = vmatpush1.bf16.msra.mxu1 %v1157_v29  ;;  %664 = vmatpush1.bf16.msra.mxu0 %v1157_v29 }
  0x39   : > { %1067 = vmatprep.subr.bf16.mxu1 %v1198_v1  ;;  %665 = vmatprep.subr.bf16.mxu0 %v1198_v1 }
  0x3b   : > { %381 = vmatmul.mubr.bf16.gmra.mrb[8].mxu1 %v1161_v30  ;;  %512 = vmatmul.mubr.bf16.gmra.mrb[8].mxu0 %v1156_v26 }
  0x3c   : > { %1076 = vmatpush1.bf16.msra.mxu1 %v1160_v31  ;;  %666 = vmatpush1.bf16.msra.mxu0 %v1160_v31 }
  0x3d   : > { %1068 = vmatprep.subr.bf16.mxu1 %v1198_v1  ;;  %667 = vmatprep.subr.bf16.mxu0 %v1198_v1 }
  0x3e   : > { %1004 = vmatprep.mubr.msk.bf16.mxu0 %vm319_vm0, %v1158_v28  ;;  %989 = vmatprep.mubr.msk.bf16.mxu1 %vm319_vm0, %v1163_v32 }
  0x40   : > { %1077 = vmatpush1.bf16.msra.mxu1 %v1162_v33  ;;  %668 = vmatpush1.bf16.msra.mxu0 %v1162_v33 }
  0x41   : > { %1069 = vmatprep.subr.bf16.mxu1 %v1198_v1  ;;  %669 = vmatprep.subr.bf16.mxu0 %v1198_v1 }
  0x43   : > { %389 = vmatmul.mubr.bf16.gmra.mrb[12].mxu1 %v1166_v34  ;;  %520 = vmatmul.mubr.bf16.gmra.mrb[12].mxu0 %v1161_v30 }
  0x44   : > { %1078 = vmatpush1.bf16.msra.mxu1 %v1165_v35  ;;  %670 = vmatpush1.bf16.msra.mxu0 %v1165_v35 }
  0x45   : > { %1070 = vmatprep.subr.bf16.mxu1 %v1198_v1  ;;  %671 = vmatprep.subr.bf16.mxu0 %v1198_v1 }
  0x46   : > { %1040 = vmatprep.mubr.msk.bf16.mxu0 %vm319_vm0, %v1153_v24  ;;  %1042 = vmatprep.mubr.msk.bf16.mxu1 %vm319_vm0, %v1163_v32 }
  0x48   : > { %1079 = vmatpush1.bf16.msra.mxu1 %v1167_v36  ;;  %672 = vmatpush1.bf16.msra.mxu0 %v1167_v36 }
  0x49   : > { %1071 = vmatprep.subr.bf16.mxu1 %v1198_v1  ;;  %673 = vmatprep.subr.bf16.mxu0 %v1198_v1 }
  0x4c   : > { %1080 = vmatpush1.bf16.msra.mxu1 %v1168_v37  ;;  %674 = vmatpush1.bf16.msra.mxu0 %v1168_v37 }
  0x4f   : > { %706 = vmatmul.mubr.bf16.vlgmr.msra.gmra.mrb[16].mxu1 %v1166_v34  ;;  %690 = vmatmul.mubr.bf16.vlgmr.msra.gmra.mrb[0].mxu0 %v1156_v26 }
  0x50   : > { %1043 = vmatprep.mubr.msk.bf16.mxu1 %vm319_vm0, %v1169_v38  ;;  %1041 = vmatprep.mubr.msk.bf16.mxu0 %vm319_vm0, %v1158_v28 }
  0x57   : > { %714 = vmatmul.mubr.bf16.gmra.mrb[20].mxu1 %v1171_v39  ;;  %698 = vmatmul.mubr.bf16.gmra.mrb[4].mxu0 %v1161_v30 }
  0xfe   : > { %v366_v40 = vpop.f32.mrb[0].mxu1 }
  0xff   : > { %v368_v41 = vpop.f32.mrb[1].mxu1 }
 0x100   : > { %v369_v42 = vpop.f32.mrb[2].mxu1 }
 0x101   : > { %v371_v43 = vpop.f32.mrb[3].mxu1 }
 0x106   : > { %v374_v44 = vpop.f32.mrb[4].mxu1 }
 0x107   : > { %v376_v45 = vpop.f32.mrb[5].mxu1 }
 0x108   : > { %v377_v46 = vpop.f32.mrb[6].mxu1 }
 0x109   : > { %v379_v47 = vpop.f32.mrb[7].mxu1 }
 0x10e   : > { %v382_v48 = vpop.f32.mrb[8].mxu1  ;;  %v513_v49 = vpop.f32.mrb[8].mxu0 }
 0x10f   : > { %v384_v50 = vpop.f32.mrb[9].mxu1  ;;  %v514_v51 = vadd.f32 %v513_v49, %v382_v48  ;;  %v515_v52 = vpop.f32.mrb[9].mxu0 }
 0x110   : > { %v385_v53 = vpop.f32.mrb[10].mxu1  ;;  %v516_v54 = vpop.f32.mrb[10].mxu0 }
 0x111   : > { %v387_v55 = vpop.f32.mrb[11].mxu1  ;;  %v517_v56 = vadd.f32 %v516_v54, %v385_v53  ;;  %v518_v57 = vpop.f32.mrb[11].mxu0 }
 0x116   : > { %v390_v58 = vpop.f32.mrb[12].mxu1  ;;  %v521_v59 = vpop.f32.mrb[12].mxu0 }
 0x117   : > { %v392_v60 = vpop.f32.mrb[13].mxu1  ;;  %v522_v61 = vadd.f32 %v521_v59, %v390_v58  ;;  %v523_v62 = vpop.f32.mrb[13].mxu0 }
 0x118   : > { %v393_v63 = vpop.f32.mrb[14].mxu1  ;;  %v524_v0 = vpop.f32.mrb[14].mxu0 }
 0x119   : > { %v395_v1 = vpop.f32.mrb[15].mxu1  ;;  %v525_v2 = vadd.f32 %v524_v0, %v393_v63  ;;  %v526_v3 = vpop.f32.mrb[15].mxu0 }
 0x122   : > { %v707_v4 = vpop.f32.mrb[16].mxu1  ;;  %v691_v5 = vpop.f32.mrb[0].mxu0 }
 0x123   : > { %v726_v6 = vadd.f32 %v707_v4, %v514_v51  ;;  %v709_v7 = vpop.f32.mrb[17].mxu1  ;;  %v1081_v8 = vadd.f32 %v691_v5, %v366_v40  ;;  %v693_v9 = vpop.f32.mrb[1].mxu0 }
 0x124   : > { %v710_v10 = vpop.f32.mrb[18].mxu1  ;;  %v694_v11 = vpop.f32.mrb[2].mxu0 }
 0x125   : > { %v727_v12 = vadd.f32 %v710_v10, %v517_v56  ;;  %v712_v13 = vpop.f32.mrb[19].mxu1  ;;  %v1082_v14 = vadd.f32 %v694_v11, %v369_v42  ;;  %v696_v15 = vpop.f32.mrb[3].mxu0  ;;  %v730_v16 = vsel %vm319_vm0, %v1081_v8, 0.0  ;;  %v737_v35 = vsel %vm319_vm0, %v726_v6, 0.0 }
 0x127   : > { %v731_v17 = vsel %vm319_vm0, %v1082_v14, 0.0  ;;  %v739_v37 = vsel %vm319_vm0, %v727_v12, 0.0 }
 0x128   : > { %v732_v18 = vadd.f32 %v731_v17, %v730_v16 }
 0x12a   : > { %v715_v19 = vpop.f32.mrb[20].mxu1  ;;  %v699_v20 = vpop.f32.mrb[4].mxu0 }
 0x12b   : > { %v728_v21 = vadd.f32 %v715_v19, %v522_v61  ;;  %v717_v22 = vpop.f32.mrb[21].mxu1  ;;  %v1083_v23 = vadd.f32 %v699_v20, %v374_v44  ;;  %v701_v24 = vpop.f32.mrb[5].mxu0 }
 0x12c   : > { %v718_v25 = vpop.f32.mrb[22].mxu1  ;;  %v702_v26 = vpop.f32.mrb[6].mxu0 }
 0x12d   : > { %v729_v27 = vadd.f32 %v718_v25, %v525_v2  ;;  %v720_v28 = vpop.f32.mrb[23].mxu1  ;;  %v733_v29 = vsel %vm319_vm0, %v1083_v23, 0.0  ;;  %v1084_v30 = vadd.f32 %v702_v26, %v377_v46  ;;  %v704_v31 = vpop.f32.mrb[7].mxu0  ;;  %v741_v39 = vsel %vm319_vm0, %v728_v21, 0.0 }
 0x12e   : > { %v734_v32 = vadd.f32 %v733_v29, %v732_v18 }
 0x12f   : > { %v735_v33 = vsel %vm319_vm0, %v1084_v30, 0.0  ;;  %v743_v41 = vsel %vm319_vm0, %v729_v27, 0.0 }
 0x130   : > { %v736_v34 = vadd.f32 %v735_v33, %v734_v32 }
 0x132   : > { %v738_v36 = vadd.f32 %v737_v35, %v736_v34 }
 0x134   : > { %v740_v38 = vadd.f32 %v739_v37, %v738_v36 }
 0x136   : > { %v742_v40 = vadd.f32 %v741_v39, %v740_v38 }
 0x138   : > { %v744_v42 = vadd.f32 %v743_v41, %v742_v40 }
 0x13a   : > { %v745_v43 = vrot.slane %v744_v42, 4 }
 0x13c   : > { %v746_v44 = vadd.f32 %v745_v43, %v744_v42 }
 0x13e   : > { %v747_v45 = vrot.slane %v746_v44, 2 }
 0x140   : > { %v748_v46 = vadd.f32 %v747_v45, %v746_v44 }
 0x142   : > { %v749_v47 = vrot.slane %v748_v46, 1 }
 0x144   : > { %v750_v48 = vadd.f32 %v749_v47, %v748_v46 }
 0x146   : > { %v751_v49 = vmul.f32 0.015625, %v750_v48 }
 0x148   : > { %v752_v50 = vsub.f32 %v1081_v8, %v751_v49  ;;  %v753_v51 = vsub.f32 %v1082_v14, %v751_v49  ;;  %v754_v52 = vsub.f32 %v1083_v23, %v751_v49  ;;  %v755_v53 = vsub.f32 %v1084_v30, %v751_v49 }
 0x149   : > { %v756_v54 = vsub.f32 %v726_v6, %v751_v49  ;;  %v757_v55 = vsub.f32 %v727_v12, %v751_v49  ;;  %v758_v56 = vsub.f32 %v728_v21, %v751_v49  ;;  %v759_v57 = vsub.f32 %v729_v27, %v751_v49 }
 0x14a   : > { %v760_v58 = vmul.f32 %v752_v50, %v752_v50  ;;  %v761_v59 = vmul.f32 %v753_v51, %v753_v51  ;;  %v762_v60 = vmul.f32 %v754_v52, %v754_v52  ;;  %v763_v61 = vmul.f32 %v755_v53, %v755_v53 }
 0x14b   : > { %v764_v1 = vmul.f32 %v756_v54, %v756_v54  ;;  %v765_v4 = vmul.f32 %v757_v55, %v757_v55  ;;  %v766_v7 = vmul.f32 %v758_v56, %v758_v56  ;;  %v767_v10 = vmul.f32 %v759_v57, %v759_v57 }
 0x14c   : > { %v768_v62 = vsel %vm319_vm0, %v760_v58, 0.0  ;;  %v769_v63 = vsel %vm319_vm0, %v761_v59, 0.0  ;;  %v771_v2 = vsel %vm319_vm0, %v762_v60, 0.0  ;;  %v773_v5 = vsel %vm319_vm0, %v763_v61, 0.0 }
 0x14d   : > { %v770_v0 = vadd.f32 %v769_v63, %v768_v62  ;;  %v775_v8 = vsel %vm319_vm0, %v764_v1, 0.0  ;;  %v777_v11 = vsel %vm319_vm0, %v765_v4, 0.0  ;;  %v779_v13 = vsel %vm319_vm0, %v766_v7, 0.0 }
 0x14e   : > { %v781_v15 = vsel %vm319_vm0, %v767_v10, 0.0 }
 0x14f   : > { %v772_v3 = vadd.f32 %v771_v2, %v770_v0 }
 0x151   : > { %v774_v6 = vadd.f32 %v773_v5, %v772_v3 }
 0x153   : > { %v776_v9 = vadd.f32 %v775_v8, %v774_v6 }
 0x155   : > { %v778_v12 = vadd.f32 %v777_v11, %v776_v9 }
 0x157   : > { %v780_v14 = vadd.f32 %v779_v13, %v778_v12 }
 0x159   : > { %v782_v16 = vadd.f32 %v781_v15, %v780_v14 }
 0x15b   : > { %v783_v17 = vrot.slane %v782_v16, 4 }
 0x15d   : > { %v784_v18 = vadd.f32 %v783_v17, %v782_v16 }
 0x15f   : > { %v785_v19 = vrot.slane %v784_v18, 2 }
 0x161   : > { %v786_v20 = vadd.f32 %v785_v19, %v784_v18 }
 0x163   : > { %v787_v21 = vrot.slane %v786_v20, 1 }
 0x165   : > { %v788_v22 = vadd.f32 %v787_v21, %v786_v20 }
 0x167   : > { %v789_v23 = vmul.f32 0.015625, %v788_v22 }
 0x169   : > { %v790_v24 = vadd.f32 1e-05, %v789_v23 }
 0x16b   : > { %1172 = vrsqrt.f32 %v790_v24 }
 0x175   : > { %v1173_v25 = vpop.eup %1172 }
 0x176   : > { %v792_v26 = vmul.f32 %v1173_v25, %v752_v50  ;;  %v793_v27 = vmul.f32 %v1173_v25, %v753_v51  ;;  %v794_v28 = vmul.f32 %v1173_v25, %v754_v52  ;;  %v795_v29 = vmul.f32 %v1173_v25, %v755_v53 }
 0x177   : > { %v796_v30 = vmul.f32 %v1173_v25, %v756_v54  ;;  %v797_v31 = vmul.f32 %v1173_v25, %v757_v55  ;;  %v798_v32 = vmul.f32 %v1173_v25, %v758_v56  ;;  %v799_v33 = vmul.f32 %v1173_v25, %v759_v57 }
 0x178   : > { %v800_v34 = vmax.f32 %v792_v26, 0.0  ;;  %v801_v35 = vmax.f32 %v793_v27, 0.0  ;;  %v802_v36 = vmax.f32 %v794_v28, 0.0  ;;  %v803_v37 = vmax.f32 %v795_v29, 0.0 }
 0x179   : > { %v804_v38 = vmax.f32 %v796_v30, 0.0  ;;  %v805_v39 = vmax.f32 %v797_v31, 0.0  ;;  %v806_v40 = vmax.f32 %v798_v32, 0.0  ;;  %v807_v41 = vmax.f32 %v799_v33, 0.0 }
 0x17a   : > { %v1055_v42 = vpack.c.bf16 %v800_v34, %v800_v34  ;;  %v1056_v43 = vpack.c.bf16 %v801_v35, %v801_v35  ;;  %v1057_v44 = vpack.c.bf16 %v802_v36, %v802_v36  ;;  %v1058_v45 = vpack.c.bf16 %v803_v37, %v803_v37 }
 0x17b   : > { %v1059_v46 = vpack.c.bf16 %v804_v38, %v804_v38  ;;  %v1060_v47 = vpack.c.bf16 %v805_v39, %v805_v39  ;;  %v1061_v48 = vpack.c.bf16 %v806_v40, %v806_v40  ;;  %v1062_v49 = vpack.c.bf16 %v807_v41, %v807_v41 }
 0x17c   : > { %841 = vst.msk [vmem:[%s180_s26] sm:$0xf] %vm840_vm1, %v1055_v42  ;;  %842 = vst.msk [vmem:[%s180_s26 + $0x4] sm:$0xf] %vm840_vm1, %v1056_v43 }
 0x17d   : > { %843 = vst.msk [vmem:[%s180_s26 + $0x8] sm:$0xf] %vm840_vm1, %v1057_v44  ;;  %844 = vst.msk [vmem:[%s180_s26 + $0xc] sm:$0xf] %vm840_vm1, %v1058_v45 }
 0x17e   : > { %845 = vst.msk [vmem:[%s180_s26 + $0x10] sm:$0xf] %vm840_vm1, %v1059_v46  ;;  %846 = vst.msk [vmem:[%s180_s26 + $0x14] sm:$0xf] %vm840_vm1, %v1060_v47 }
 0x17f   : > { %847 = vst.msk [vmem:[%s180_s26 + $0x18] sm:$0xf] %vm840_vm1, %v1061_v48  ;;  %848 = vst.msk [vmem:[%s180_s26 + $0x1c] sm:$0xf] %vm840_vm1, %v1062_v49 }
 0x180 PF: > { %s12_s11 = sadd.s32 1, %s1196_s11   ;;  %s1421_s9 = smov %s1192_s10 }
 0x181   : > { %p9_p5 = scmp.ge.s32.totalorder %s12_s11, 4   ;;  %s1422_s10 = smov %s1424_s12 }
 0x183   :  { %11 = sbr.rel (!%p9_p5) target bundleno = 2 (0x2), region = 63 }

// kernel: forward.7
= control target key start
LH: loop header
LB: loop body
LE: loop exit
PB: predicated region body
PF: predicated region fallthrough
CT: control target
= control target key end

     0   :  { %s1333_s12 = smov 0   ;;  %s1335_s13 = smov 0   ;;  %s1544_s0 = inlined_call_operand.vmem [shape: bf16[2,96,144], index: 0, kind: input, shape index: {}]   ;;  %s1545_s1 = inlined_call_operand.vmem [shape: bf16[3,144,16], index: 1, kind: input, shape index: {}]   ;;  %s1546_s2 = inlined_call_operand.vmem [shape: bf16[2,64,16], index: 2, kind: input, shape index: {}]   ;;  %s1547_s3 = inlined_call_operand.vmem [shape: bf16[2,64,16], index: 3, kind: output, shape index: {}]  }
   0x1   :  { %s1337_s14 = smov 0  }
   0x2 LB: > { %s25_s15 = sadd.s32 1, %s1306_s13  ;;  %p1039_p0 = scmp.ge.s32.totalorder %s1310_s14, 1  ;;  %s1310_s14 = sphi %s1337_s14, %s13_s14   ;;  %s1306_s13 = sphi %s1335_s13, %s1549_s13   ;;  %s1302_s12 = sphi %s1333_s12, %s1548_s12  }
   0x3   : > { %p27_p1 = scmp.ge.s32.totalorder %s25_s15, 2  ;;  %p175_p2 = scmp.lt.s32.totalorder %s1310_s14, 3 }
   0x5   : > { %s1551_s15 = smov (%p27_p1, %s25_s15), 0  ;;  %p176_p3 = pnand %p1039_p0, %p175_p2 }
   0x6   : > { %v1241_v0 = vld [vmem:[%s1545_s1 + $0x48] sm:$0xff] (!%p176_p3)   ;;  %v1312_v1 = vmov (!%p176_p3), 0   ;;  %v1242_v2 = vld [vmem:[%s1545_s1] sm:$0xff] (!%p176_p3)   ;;  %v1243_v3 = vld [vmem:[%s1545_s1 + $0x50] sm:$0xff] (!%p176_p3)   ;;  %p214_p4 = scmp.lt.s32.totalorder (!%p176_p3), %s1302_s12, 1  ;;  %vm377_vm0 = vcmask (!%p176_p3), 130048  }
   0x7   : > { %179 = sbr.rel (%p176_p3) target bundleno = 384 (0x180), region = 32  ;;  %390 = vmatprep.subr.bf16.mxu1 (!%p176_p3), %v1312_v1  ;;  %521 = vmatprep.subr.bf16.mxu0 (!%p176_p3), %v1312_v1  ;;  %v1244_v4 = vld [vmem:[%s1545_s1 + $0x8] sm:$0xff] (!%p176_p3)   ;;  %v1245_v5 = vld [vmem:[%s1545_s1 + $0x58] sm:$0xff] (!%p176_p3)   ;;  %v1246_v6 = vld [vmem:[%s1545_s1 + $0x10] sm:$0xff] (!%p176_p3)   ;;  %vm914_vm1 = vcmask (!%p176_p3), 125952  }
   0x8   : > { %391 = vmatpush1.bf16.msra.mxu1 (!%p176_p3), %v1241_v0  ;;  %522 = vmatpush1.bf16.msra.mxu0 (!%p176_p3), %v1242_v2  ;;  %v1247_v7 = vld [vmem:[%s1545_s1 + $0x60] sm:$0xff] (!%p176_p3)   ;;  %v1248_v8 = vld [vmem:[%s1545_s1 + $0x18] sm:$0xff] (!%p176_p3)   ;;  %v1249_v9 = vld [vmem:[%s1545_s1 + $0x68] sm:$0xff] (!%p176_p3)  }
   0x9   : > { %392 = vmatprep.subr.bf16.mxu1 (!%p176_p3), %v1312_v1  ;;  %523 = vmatprep.subr.bf16.mxu0 (!%p176_p3), %v1312_v1  ;;  %v1250_v10 = vld [vmem:[%s1545_s1 + $0x20] sm:$0xff] (!%p176_p3)   ;;  %v1251_v11 = vld [vmem:[%s1545_s1 + $0x70] sm:$0xff] (!%p176_p3)   ;;  %v1252_v12 = vld [vmem:[%s1545_s1 + $0x28] sm:$0xff] (!%p176_p3)  }
   0xa   : > { %v1253_v15 = vld [vmem:[%s1545_s1 + $0x78] sm:$0xff] (!%p176_p3)   ;;  %v1254_v16 = vld [vmem:[%s1545_s1 + $0x30] sm:$0xff] (!%p176_p3)   ;;  %v1255_v17 = vld [vmem:[%s1545_s1 + $0x80] sm:$0xff] (!%p176_p3)  }
   0xb   : > { %v1256_v18 = vld [vmem:[%s1545_s1 + $0x38] sm:$0xff] (!%p176_p3)   ;;  %v1257_v19 = vld [vmem:[%s1545_s1 + $0x88] sm:$0xff] (!%p176_p3)   ;;  %v1258_v20 = vld [vmem:[%s1545_s1 + $0x40] sm:$0xff] (!%p176_p3)  }
   0xc   : > { %393 = vmatpush1.bf16.msra.mxu1 (!%p176_p3), %v1243_v3  ;;  %524 = vmatpush1.bf16.msra.mxu0 (!%p176_p3), %v1244_v4  ;;  %v1265_v23 = vld [vmem:[%s1545_s1 + $0x90] sm:$0xff] (!%p176_p3)   ;;  %v1266_v25 = vld [vmem:[%s1545_s1 + $0x98] sm:$0xff] (!%p176_p3)   ;;  %v1269_v27 = vld [vmem:[%s1545_s1 + $0xa0] sm:$0xff] (!%p176_p3)  }
   0xd   : > { %394 = vmatprep.subr.bf16.mxu1 (!%p176_p3), %v1312_v1  ;;  %525 = vmatprep.subr.bf16.mxu0 (!%p176_p3), %v1312_v1  ;;  %v1271_v29 = vld [vmem:[%s1545_s1 + $0xa8] sm:$0xff] (!%p176_p3)   ;;  %v1274_v31 = vld [vmem:[%s1545_s1 + $0xb0] sm:$0xff] (!%p176_p3)   ;;  %v1276_v33 = vld [vmem:[%s1545_s1 + $0xb8] sm:$0xff] (!%p176_p3)  }
   0xe   : > { %s1553_s12 = smov (!%p214_p4, %s1302_s12), 1  ;;  %v1279_v35 = vld [vmem:[%s1545_s1 + $0xc0] sm:$0xff]   ;;  %v1281_v36 = vld [vmem:[%s1545_s1 + $0xc8] sm:$0xff]   ;;  %v1282_v37 = vld [vmem:[%s1545_s1 + $0xd0] sm:$0xff]  }
   0xf   : > { %s1215_s5 = smul.u32 96, %s1553_s12 }
  0x10   : > { %395 = vmatpush1.bf16.msra.mxu1 %v1245_v5  ;;  %526 = vmatpush1.bf16.msra.mxu0 %v1246_v6 }
  0x11   : > { %396 = vmatprep.subr.bf16.mxu1 %v1312_v1  ;;  %527 = vmatprep.subr.bf16.mxu0 %v1312_v1  ;;  %s1397_s16 = scalar_lea.vmem %s1544_s0, %s1215_s5 }
  0x12   : > { %v1261_v13 = vld [vmem:[%s1397_s16 + $0x14] ss:$8 sps:$4 sm:$0xff]   ;;  %v1264_v14 = vld [vmem:[%s1397_s16 + $0x4] ss:$8 sps:$4 sm:$0xff]   ;;  %v1259_v21 = vld [vmem:[%s1397_s16 + $0x10] ss:$8 sps:$4 sm:$0xff]  }
  0x13   : > { %1080 = vmatprep.mubr.msk.bf16.mxu1 %vm377_vm0, %v1261_v13  ;;  %1095 = vmatprep.mubr.msk.bf16.mxu0 %vm377_vm0, %v1264_v14  ;;  %v1262_v22 = vld [vmem:[%s1397_s16] ss:$8 sps:$4 sm:$0xff]   ;;  %v1267_v24 = vld [vmem:[%s1397_s16 + $0x24] ss:$8 sps:$4 sm:$0xff]   ;;  %v1272_v28 = vld [vmem:[%s1397_s16 + $0x34] ss:$8 sps:$4 sm:$0xff]  }
  0x14   : > { %397 = vmatpush1.bf16.msra.mxu1 %v1247_v7  ;;  %528 = vmatpush1.bf16.msra.mxu0 %v1248_v8  ;;  %v1270_v26 = vld [vmem:[%s1397_s16 + $0x20] ss:$8 sps:$4 sm:$0xff]   ;;  %v1275_v30 = vld [vmem:[%s1397_s16 + $0x30] ss:$8 sps:$4 sm:$0xff]   ;;  %v1277_v32 = vld [vmem:[%s1397_s16 + $0x44] ss:$8 sps:$4 sm:$0xff]  }
  0x15   : > { %398 = vmatprep.subr.bf16.mxu1 %v1312_v1  ;;  %529 = vmatprep.subr.bf16.mxu0 %v1312_v1  ;;  %v1280_v34 = vld [vmem:[%s1397_s16 + $0x40] ss:$8 sps:$4 sm:$0xff]   ;;  %v1283_v38 = vld [vmem:[%s1397_s16 + $0x54] ss:$8 sps:$4 sm:$0xff]   ;;  %v1285_v39 = vld [vmem:[%s1397_s16 + $0x50] ss:$8 sps:$4 sm:$0xff]  }
  0x16   : > { %s1148_s16 = sshll.u32 %s1553_s12, 5 }
  0x17   : > { %s230_s4 = scalar_lea.vmem %s1546_s2, %s1148_s16  ;;  %s238_s7 = scalar_lea.vmem %s1547_s3, %s1148_s16 }
  0x18   : > { %399 = vmatpush1.bf16.msra.mxu1 %v1249_v9  ;;  %530 = vmatpush1.bf16.msra.mxu0 %v1250_v10 }
  0x19   : > { %400 = vmatprep.subr.bf16.mxu1 %v1312_v1  ;;  %531 = vmatprep.subr.bf16.mxu0 %v1312_v1 }
  0x1c   : > { %401 = vmatpush1.bf16.msra.mxu1 %v1251_v11  ;;  %532 = vmatpush1.bf16.msra.mxu0 %v1252_v12 }
  0x1d   : > { %402 = vmatprep.subr.bf16.mxu1 %v1312_v1  ;;  %533 = vmatprep.subr.bf16.mxu0 %v1312_v1 }
  0x20   : > { %403 = vmatpush1.bf16.msra.mxu1 %v1253_v15  ;;  %534 = vmatpush1.bf16.msra.mxu0 %v1254_v16 }
  0x21   : > { %404 = vmatprep.subr.bf16.mxu1 %v1312_v1  ;;  %535 = vmatprep.subr.bf16.mxu0 %v1312_v1 }
  0x24   : > { %405 = vmatpush1.bf16.msra.mxu1 %v1255_v17  ;;  %536 = vmatpush1.bf16.msra.mxu0 %v1256_v18 }
  0x25   : > { %406 = vmatprep.subr.bf16.mxu1 %v1312_v1  ;;  %537 = vmatprep.subr.bf16.mxu0 %v1312_v1 }
  0x28   : > { %407 = vmatpush1.bf16.msra.mxu1 %v1257_v19  ;;  %538 = vmatpush1.bf16.msra.mxu0 %v1258_v20 }
  0x29   : > { %1177 = vmatprep.subr.bf16.mxu1 %v1312_v1  ;;  %715 = vmatprep.subr.bf16.mxu0 %v1312_v1 }
  0x2b   : > { %423 = vmatmul.mubr.bf16.vlgmr.msra.gmra.mrb[0].mxu1 %v1259_v21  ;;  %554 = vmatmul.mubr.bf16.vlgmr.msra.gmra.mrb[0].mxu0 %v1262_v22 }
  0x2c   : > { %1186 = vmatpush1.bf16.msra.mxu1 %v1265_v23  ;;  %716 = vmatpush1.bf16.msra.mxu0 %v1265_v23 }
  0x2d   : > { %1178 = vmatprep.subr.bf16.mxu1 %v1312_v1  ;;  %717 = vmatprep.subr.bf16.mxu0 %v1312_v1 }
  0x2e   : > { %1096 = vmatprep.mubr.msk.bf16.mxu0 %vm377_vm0, %v1261_v13  ;;  %1081 = vmatprep.mubr.msk.bf16.mxu1 %vm377_vm0, %v1267_v24 }
  0x30   : > { %1187 = vmatpush1.bf16.msra.mxu1 %v1266_v25  ;;  %718 = vmatpush1.bf16.msra.mxu0 %v1266_v25 }
  0x31   : > { %1179 = vmatprep.subr.bf16.mxu1 %v1312_v1  ;;  %719 = vmatprep.subr.bf16.mxu0 %v1312_v1 }
  0x33   : > { %431 = vmatmul.mubr.bf16.gmra.mrb[4].mxu1 %v1270_v26  ;;  %562 = vmatmul.mubr.bf16.gmra.mrb[4].mxu0 %v1259_v21 }
  0x34   : > { %1188 = vmatpush1.bf16.msra.mxu1 %v1269_v27  ;;  %720 = vmatpush1.bf16.msra.mxu0 %v1269_v27 }
  0x35   : > { %1180 = vmatprep.subr.bf16.mxu1 %v1312_v1  ;;  %721 = vmatprep.subr.bf16.mxu0 %v1312_v1 }
  0x36   : > { %1097 = vmatprep.mubr.msk.bf16.mxu0 %vm377_vm0, %v1267_v24  ;;  %1082 = vmatprep.mubr.msk.bf16.mxu1 %vm377_vm0, %v1272_v28 }
  0x38   : > { %1189 = vmatpush1.bf16.msra.mxu1 %v1271_v29  ;;  %722 = vmatpush1.bf16.msra.mxu0 %v1271_v29 }
  0x39   : > { %1181 = vmatprep.subr.bf16.mxu1 %v1312_v1  ;;  %723 = vmatprep.subr.bf16.mxu0 %v1312_v1 }
  0x3b   : > { %439 = vmatmul.mubr.bf16.gmra.mrb[8].mxu1 %v1275_v30  ;;  %570 = vmatmul.mubr.bf16.gmra.mrb[8].mxu0 %v1270_v26 }
  0x3c   : > { %1190 = vmatpush1.bf16.msra.mxu1 %v1274_v31  ;;  %724 = vmatpush1.bf16.msra.mxu0 %v1274_v31 }
  0x3d   : > { %1182 = vmatprep.subr.bf16.mxu1 %v1312_v1  ;;  %725 = vmatprep.subr.bf16.mxu0 %v1312_v1 }
  0x3e   : > { %1098 = vmatprep.mubr.msk.bf16.mxu0 %vm377_vm0, %v1272_v28  ;;  %1083 = vmatprep.mubr.msk.bf16.mxu1 %vm377_vm0, %v1277_v32 }
  0x40   : > { %1191 = vmatpush1.bf16.msra.mxu1 %v1276_v33  ;;  %726 = vmatpush1.bf16.msra.mxu0 %v1276_v33 }
  0x41   : > { %1183 = vmatprep.subr.bf16.mxu1 %v1312_v1  ;;  %727 = vmatprep.subr.bf16.mxu0 %v1312_v1 }
  0x43   : > { %447 = vmatmul.mubr.bf16.gmra.mrb[12].mxu1 %v1280_v34  ;;  %578 = vmatmul.mubr.bf16.gmra.mrb[12].mxu0 %v1275_v30 }
  0x44   : > { %1192 = vmatpush1.bf16.msra.mxu1 %v1279_v35  ;;  %728 = vmatpush1.bf16.msra.mxu0 %v1279_v35 }
  0x45   : > { %1184 = vmatprep.subr.bf16.mxu1 %v1312_v1  ;;  %729 = vmatprep.subr.bf16.mxu0 %v1312_v1 }
  0x46   : > { %1134 = vmatprep.mubr.msk.bf16.mxu0 %vm377_vm0, %v1267_v24  ;;  %1136 = vmatprep.mubr.msk.bf16.mxu1 %vm377_vm0, %v1277_v32 }
  0x48   : > { %1193 = vmatpush1.bf16.msra.mxu1 %v1281_v36  ;;  %730 = vmatpush1.bf16.msra.mxu0 %v1281_v36 }
  0x49   : > { %1185 = vmatprep.subr.bf16.mxu1 %v1312_v1  ;;  %731 = vmatprep.subr.bf16.mxu0 %v1312_v1 }
  0x4c   : > { %1194 = vmatpush1.bf16.msra.mxu1 %v1282_v37  ;;  %732 = vmatpush1.bf16.msra.mxu0 %v1282_v37 }
  0x4f   : > { %764 = vmatmul.mubr.bf16.vlgmr.msra.gmra.mrb[16].mxu1 %v1280_v34  ;;  %748 = vmatmul.mubr.bf16.vlgmr.msra.gmra.mrb[0].mxu0 %v1270_v26 }
  0x50   : > { %1137 = vmatprep.mubr.msk.bf16.mxu1 %vm377_vm0, %v1283_v38  ;;  %1135 = vmatprep.mubr.msk.bf16.mxu0 %vm377_vm0, %v1272_v28 }
  0x57   : > { %772 = vmatmul.mubr.bf16.gmra.mrb[20].mxu1 %v1285_v39  ;;  %756 = vmatmul.mubr.bf16.gmra.mrb[4].mxu0 %v1275_v30 }
  0xfe   : > { %v424_v40 = vpop.f32.mrb[0].mxu1 }
  0xff   : > { %v426_v41 = vpop.f32.mrb[1].mxu1 }
 0x100   : > { %v427_v42 = vpop.f32.mrb[2].mxu1 }
 0x101   : > { %v429_v43 = vpop.f32.mrb[3].mxu1 }
 0x106   : > { %v432_v44 = vpop.f32.mrb[4].mxu1 }
 0x107   : > { %v434_v45 = vpop.f32.mrb[5].mxu1 }
 0x108   : > { %v435_v46 = vpop.f32.mrb[6].mxu1 }
 0x109   : > { %v437_v47 = vpop.f32.mrb[7].mxu1 }
 0x10e   : > { %v440_v48 = vpop.f32.mrb[8].mxu1  ;;  %v571_v49 = vpop.f32.mrb[8].mxu0 }
 0x10f   : > { %v442_v50 = vpop.f32.mrb[9].mxu1  ;;  %v572_v51 = vadd.f32 %v571_v49, %v440_v48  ;;  %v573_v52 = vpop.f32.mrb[9].mxu0 }
 0x110   : > { %v443_v53 = vpop.f32.mrb[10].mxu1  ;;  %v574_v54 = vpop.f32.mrb[10].mxu0 }
 0x111   : > { %v445_v55 = vpop.f32.mrb[11].mxu1  ;;  %v575_v56 = vadd.f32 %v574_v54, %v443_v53  ;;  %v576_v57 = vpop.f32.mrb[11].mxu0 }
 0x116   : > { %v448_v58 = vpop.f32.mrb[12].mxu1  ;;  %v579_v59 = vpop.f32.mrb[12].mxu0 }
 0x117   : > { %v450_v60 = vpop.f32.mrb[13].mxu1  ;;  %v580_v61 = vadd.f32 %v579_v59, %v448_v58  ;;  %v581_v62 = vpop.f32.mrb[13].mxu0 }
 0x118   : > { %v451_v63 = vpop.f32.mrb[14].mxu1  ;;  %v582_v0 = vpop.f32.mrb[14].mxu0 }
 0x119   : > { %v453_v1 = vpop.f32.mrb[15].mxu1  ;;  %v583_v2 = vadd.f32 %v582_v0, %v451_v63  ;;  %v584_v3 = vpop.f32.mrb[15].mxu0 }
 0x122   : > { %v765_v4 = vpop.f32.mrb[16].mxu1  ;;  %v749_v5 = vpop.f32.mrb[0].mxu0 }
 0x123   : > { %v784_v6 = vadd.f32 %v765_v4, %v572_v51  ;;  %v767_v7 = vpop.f32.mrb[17].mxu1  ;;  %v1195_v8 = vadd.f32 %v749_v5, %v424_v40  ;;  %v751_v9 = vpop.f32.mrb[1].mxu0 }
 0x124   : > { %v768_v10 = vpop.f32.mrb[18].mxu1  ;;  %v752_v11 = vpop.f32.mrb[2].mxu0 }
 0x125   : > { %v785_v12 = vadd.f32 %v768_v10, %v575_v56  ;;  %v770_v13 = vpop.f32.mrb[19].mxu1  ;;  %v1196_v14 = vadd.f32 %v752_v11, %v427_v42  ;;  %v754_v15 = vpop.f32.mrb[3].mxu0  ;;  %v788_v16 = vsel %vm377_vm0, %v1195_v8, 0.0  ;;  %v795_v35 = vsel %vm377_vm0, %v784_v6, 0.0 }
 0x127   : > { %v789_v17 = vsel %vm377_vm0, %v1196_v14, 0.0  ;;  %v797_v37 = vsel %vm377_vm0, %v785_v12, 0.0 }
 0x128   : > { %v790_v18 = vadd.f32 %v789_v17, %v788_v16 }
 0x12a   : > { %v773_v19 = vpop.f32.mrb[20].mxu1  ;;  %v757_v20 = vpop.f32.mrb[4].mxu0 }
 0x12b   : > { %v786_v21 = vadd.f32 %v773_v19, %v580_v61  ;;  %v775_v22 = vpop.f32.mrb[21].mxu1  ;;  %v1197_v23 = vadd.f32 %v757_v20, %v432_v44  ;;  %v759_v24 = vpop.f32.mrb[5].mxu0 }
 0x12c   : > { %v776_v25 = vpop.f32.mrb[22].mxu1  ;;  %v760_v26 = vpop.f32.mrb[6].mxu0 }
 0x12d   : > { %v787_v27 = vadd.f32 %v776_v25, %v583_v2  ;;  %v778_v28 = vpop.f32.mrb[23].mxu1  ;;  %v791_v29 = vsel %vm377_vm0, %v1197_v23, 0.0  ;;  %v1198_v30 = vadd.f32 %v760_v26, %v435_v46  ;;  %v762_v31 = vpop.f32.mrb[7].mxu0  ;;  %v799_v39 = vsel %vm377_vm0, %v786_v21, 0.0  ;;  %v1159_v25 = vld [vmem:[%s230_s4] sm:$0xff]   ;;  %v1174_v26 = vld [vmem:[%s230_s4 + $0x8] sm:$0xff]  }
 0x12e   : > { %v792_v32 = vadd.f32 %v791_v29, %v790_v18  ;;  %v1176_v28 = vld [vmem:[%s230_s4 + $0x18] sm:$0xff]   ;;  %v1160_v29 = vunpack.c.l.bf16 %v1159_v25  ;;  %v1164_v31 = vunpack.c.l.bf16 %v1174_v26 }
 0x12f   : > { %v793_v33 = vsel %vm377_vm0, %v1198_v30, 0.0  ;;  %v801_v41 = vsel %vm377_vm0, %v787_v27, 0.0 }
 0x130   : > { %v794_v34 = vadd.f32 %v793_v33, %v792_v32  ;;  %v1165_v32 = vunpack.c.h.bf16 %v1174_v26 }
 0x132   : > { %v796_v36 = vadd.f32 %v795_v35, %v794_v34 }
 0x134   : > { %v798_v38 = vadd.f32 %v797_v37, %v796_v36  ;;  %v1172_v36 = vunpack.c.l.bf16 %v1176_v28  ;;  %v1173_v37 = vunpack.c.h.bf16 %v1176_v28 }
 0x136   : > { %v800_v40 = vadd.f32 %v799_v39, %v798_v38 }
 0x138   : > { %v802_v42 = vadd.f32 %v801_v41, %v800_v40 }
 0x13a   : > { %v803_v43 = vrot.slane %v802_v42, 4 }
 0x13c   : > { %v804_v44 = vadd.f32 %v803_v43, %v802_v42 }
 0x13e   : > { %v805_v45 = vrot.slane %v804_v44, 2 }
 0x140   : > { %v806_v46 = vadd.f32 %v805_v45, %v804_v44 }
 0x142   : > { %v807_v47 = vrot.slane %v806_v46, 1 }
 0x144   : > { %v808_v48 = vadd.f32 %v807_v47, %v806_v46 }
 0x146   : > { %v809_v49 = vmul.f32 0.015625, %v808_v48 }
 0x148   : > { %v810_v50 = vsub.f32 %v1195_v8, %v809_v49  ;;  %v811_v51 = vsub.f32 %v1196_v14, %v809_v49  ;;  %v812_v52 = vsub.f32 %v1197_v23, %v809_v49  ;;  %v813_v53 = vsub.f32 %v1198_v30, %v809_v49 }
 0x149   : > { %v814_v54 = vsub.f32 %v784_v6, %v809_v49  ;;  %v815_v55 = vsub.f32 %v785_v12, %v809_v49  ;;  %v816_v56 = vsub.f32 %v786_v21, %v809_v49  ;;  %v817_v57 = vsub.f32 %v787_v27, %v809_v49  ;;  %v1175_v27 = vld [vmem:[%s230_s4 + $0x10] sm:$0xff]  }
 0x14a   : > { %v818_v58 = vmul.f32 %v810_v50, %v810_v50  ;;  %v819_v59 = vmul.f32 %v811_v51, %v811_v51  ;;  %v820_v60 = vmul.f32 %v812_v52, %v812_v52  ;;  %v821_v61 = vmul.f32 %v813_v53, %v813_v53 }
 0x14b   : > { %v822_v1 = vmul.f32 %v814_v54, %v814_v54  ;;  %v823_v4 = vmul.f32 %v815_v55, %v815_v55  ;;  %v824_v7 = vmul.f32 %v816_v56, %v816_v56  ;;  %v825_v10 = vmul.f32 %v817_v57, %v817_v57 }
 0x14c   : > { %v826_v62 = vsel %vm377_vm0, %v818_v58, 0.0  ;;  %v827_v63 = vsel %vm377_vm0, %v819_v59, 0.0  ;;  %v829_v2 = vsel %vm377_vm0, %v820_v60, 0.0  ;;  %v831_v5 = vsel %vm377_vm0, %v821_v61, 0.0 }
 0x14d   : > { %v828_v0 = vadd.f32 %v827_v63, %v826_v62  ;;  %v833_v8 = vsel %vm377_vm0, %v822_v1, 0.0  ;;  %v835_v11 = vsel %vm377_vm0, %v823_v4, 0.0  ;;  %v837_v13 = vsel %vm377_vm0, %v824_v7, 0.0 }
 0x14e   : > { %v839_v15 = vsel %vm377_vm0, %v825_v10, 0.0  ;;  %v1161_v30 = vunpack.c.h.bf16 %v1159_v25  ;;  %v1168_v33 = vunpack.c.l.bf16 %v1175_v27  ;;  %v1169_v35 = vunpack.c.h.bf16 %v1175_v27 }
 0x14f   : > { %v830_v3 = vadd.f32 %v829_v2, %v828_v0 }
 0x151   : > { %v832_v6 = vadd.f32 %v831_v5, %v830_v3 }
 0x153   : > { %v834_v9 = vadd.f32 %v833_v8, %v832_v6 }
 0x155   : > { %v836_v12 = vadd.f32 %v835_v11, %v834_v9 }
 0x157   : > { %v838_v14 = vadd.f32 %v837_v13, %v836_v12 }
 0x159   : > { %v840_v16 = vadd.f32 %v839_v15, %v838_v14 }
 0x15b   : > { %v841_v17 = vrot.slane %v840_v16, 4 }
 0x15d   : > { %v842_v18 = vadd.f32 %v841_v17, %v840_v16 }
 0x15f   : > { %v843_v19 = vrot.slane %v842_v18, 2 }
 0x161   : > { %v844_v20 = vadd.f32 %v843_v19, %v842_v18 }
 0x163   : > { %v845_v21 = vrot.slane %v844_v20, 1 }
 0x165   : > { %v846_v22 = vadd.f32 %v845_v21, %v844_v20 }
 0x167   : > { %v847_v23 = vmul.f32 0.015625, %v846_v22 }
 0x169   : > { %v848_v24 = vadd.f32 1e-05, %v847_v23 }
 0x16b   : > { %1286 = vrsqrt.f32 %v848_v24 }
 0x175   : > { %v1287_v34 = vpop.eup %1286 }
 0x176   : > { %v850_v38 = vmul.f32 %v1287_v34, %v810_v50  ;;  %v851_v39 = vmul.f32 %v1287_v34, %v811_v51  ;;  %v852_v40 = vmul.f32 %v1287_v34, %v812_v52  ;;  %v853_v41 = vmul.f32 %v1287_v34, %v813_v53 }
 0x177   : > { %v854_v42 = vmul.f32 %v1287_v34, %v814_v54  ;;  %v855_v43 = vmul.f32 %v1287_v34, %v815_v55  ;;  %v856_v44 = vmul.f32 %v1287_v34, %v816_v56  ;;  %v857_v45 = vmul.f32 %v1287_v34, %v817_v57 }
 0x178   : > { %v874_v46 = vadd.f32 %v1160_v29, %v850_v38  ;;  %v875_v47 = vadd.f32 %v1161_v30, %v851_v39  ;;  %v876_v48 = vadd.f32 %v1164_v31, %v852_v40  ;;  %v877_v49 = vadd.f32 %v1165_v32, %v853_v41 }
 0x179   : > { %v878_v58 = vadd.f32 %v1168_v33, %v854_v42  ;;  %v879_v59 = vadd.f32 %v1169_v35, %v855_v43  ;;  %v880_v60 = vadd.f32 %v1172_v36, %v856_v44  ;;  %v881_v50 = vadd.f32 %v1173_v37, %v857_v45 }
 0x17a   : > { %v1150_v51 = vpack.c.bf16 %v874_v46, %v874_v46  ;;  %v1151_v52 = vpack.c.bf16 %v875_v47, %v875_v47  ;;  %v1152_v53 = vpack.c.bf16 %v876_v48, %v876_v48  ;;  %v1153_v54 = vpack.c.bf16 %v877_v49, %v877_v49 }
 0x17b   : > { %v1154_v55 = vpack.c.bf16 %v878_v58, %v878_v58  ;;  %v1155_v56 = vpack.c.bf16 %v879_v59, %v879_v59  ;;  %v1156_v57 = vpack.c.bf16 %v880_v60, %v880_v60  ;;  %v1157_v61 = vpack.c.bf16 %v881_v50, %v881_v50 }
 0x17c   : > { %915 = vst.msk [vmem:[%s238_s7] sm:$0xf] %vm914_vm1, %v1150_v51  ;;  %916 = vst.msk [vmem:[%s238_s7 + $0x4] sm:$0xf] %vm914_vm1, %v1151_v52 }
 0x17d   : > { %917 = vst.msk [vmem:[%s238_s7 + $0x8] sm:$0xf] %vm914_vm1, %v1152_v53  ;;  %918 = vst.msk [vmem:[%s238_s7 + $0xc] sm:$0xf] %vm914_vm1, %v1153_v54 }
 0x17e   : > { %919 = vst.msk [vmem:[%s238_s7 + $0x10] sm:$0xf] %vm914_vm1, %v1154_v55  ;;  %920 = vst.msk [vmem:[%s238_s7 + $0x14] sm:$0xf] %vm914_vm1, %v1155_v56 }
 0x17f   : > { %921 = vst.msk [vmem:[%s238_s7 + $0x18] sm:$0xf] %vm914_vm1, %v1156_v57  ;;  %922 = vst.msk [vmem:[%s238_s7 + $0x1c] sm:$0xf] %vm914_vm1, %v1157_v61 }
 0x180 PF: > { %s13_s14 = sadd.s32 1, %s1310_s14   ;;  %s1548_s12 = smov %s1306_s13 }
 0x181   : > { %p10_p5 = scmp.ge.s32.totalorder %s13_s14, 4   ;;  %s1549_s13 = smov %s1551_s15 }
 0x183   :  { %12 = sbr.rel (!%p10_p5) target bundleno = 2 (0x2), region = 70 }

</bundles_post_ra>
